<compile_context>
chip_gen: v6e
topology: v6e:2x2x1
jax: 0.10.0
libtpu: 0.0.40
codegen_flags: <defaults>
</compile_context>

<pallas_src>
import functools
import math

import jax
import jax.numpy as jnp
from jax.experimental import pallas as pl
from jax.experimental.pallas import tpu as pltpu


def _round_up(x, m):
    return (x + m - 1) // m * m


def _row_shift(v, off):
    """u[i] = v[i + off] along axis 0 (static off), zero fill out of range."""
    if off == 0:
        return v
    p = v.shape[0]
    zeros = jnp.zeros((abs(off),) + v.shape[1:], v.dtype)
    if off > 0:
        return jnp.concatenate([v[off:], zeros], axis=0)
    return jnp.concatenate([zeros, v[: p + off]], axis=0)


def _conv3x3_flat(x, w3, bias, mask, *, row_stride, relu):
    """3x3 'same' conv in flattened zero-padded layout.

    x    : (P, Cin)  bf16 activation, exact zeros at all padding rows
    w3   : (3, 3*Cin, Cout) bf16, w3[dy][dx*Cin + ci, co] = W[co, ci, dy, dx]
    bias : (1, Cout) f32
    mask : (P, 1)    f32, 1.0 at interior (real-pixel) rows else 0.0
    returns f32 (P, Cout); only interior rows are meaningful.
    """
    xm = _row_shift(x, -1)                       # x[i-1]  -> dx = 0
    xp = _row_shift(x, 1)                        # x[i+1]  -> dx = 2
    patch3 = jnp.concatenate([xm, x, xp], axis=-1)   # (P, 3*Cin)

    acc = jnp.dot(_row_shift(patch3, -row_stride), w3[0],
                  preferred_element_type=jnp.float32)           # dy = 0
    acc = acc + jnp.dot(patch3, w3[1],
                        preferred_element_type=jnp.float32)     # dy = 1
    acc = acc + jnp.dot(_row_shift(patch3, row_stride), w3[2],
                        preferred_element_type=jnp.float32)     # dy = 2
    acc = acc + bias
    if relu:
        acc = jnp.maximum(acc, 0.0) * mask       # keep padding rows exactly 0
    return acc


def _head_kernel(x_ref, wt_ref, bt_ref, wc_ref, bc_ref, mask_ref, o_ref,
                 *, row_stride):
    mask = mask_ref[...]                         # (P, 1) f32
    x = x_ref[0]                                 # (P, Cin) bf16
    num_trunk = wt_ref.shape[0]
    for l in range(num_trunk):                   # 4 fused conv+bias+ReLU
        y = _conv3x3_flat(x, wt_ref[l], bt_ref[l], mask,
                          row_stride=row_stride, relu=True)
        x = y.astype(jnp.bfloat16)
    y = _conv3x3_flat(x, wc_ref[...], bc_ref[...], mask,
                      row_stride=row_stride, relu=False)        # cls conv
    o_ref[0] = y.astype(o_ref.dtype)


def _head_level_pallas(x_nchw, wt, bt, wc, bc):
    """Runs the full head on one pyramid level.  Returns (N, H, W, A*C) f32."""
    n, c, h, w = x_nchw.shape
    ccls = wc.shape[-1]
    s = _round_up(w + 2, 8)                      # padded row stride (sublanes)
    p = (h + 2) * s                              # flattened padded rows

    # Single pad per level: spatial +1 ring (+ right alignment), NHWC, bf16.
    x = jnp.transpose(x_nchw, (0, 2, 3, 1))
    x = jnp.pad(x, ((0, 0), (1, 1), (1, s - w - 1), (0, 0)))
    x = x.astype(jnp.bfloat16).reshape(n, p, c)

    mask = jnp.zeros((h + 2, s), jnp.float32)
    mask = mask.at[1:h + 1, 1:w + 1].set(1.0).reshape(p, 1)

    flops = 2 * n * p * 9 * c * (4 * c + ccls)
    bytes_accessed = (n * p * c * 2 + n * p * ccls * 4
                      + int(wt.size) * 2 + int(wc.size) * 2
                      + int(bt.size) * 4 + int(bc.size) * 4 + p * 4)

    kernel = functools.partial(_head_kernel, row_stride=s)
    out_flat = pl.pallas_call(
        kernel,
        out_shape=jax.ShapeDtypeStruct((n, p, ccls), jnp.float32),
        grid=(n,),
        in_specs=[
            pl.BlockSpec((1, p, c), lambda i: (i, 0, 0)),
            pl.BlockSpec(wt.shape, lambda i: (0, 0, 0, 0)),
            pl.BlockSpec(bt.shape, lambda i: (0, 0, 0)),
            pl.BlockSpec(wc.shape, lambda i: (0, 0, 0)),
            pl.BlockSpec(bc.shape, lambda i: (0, 0)),
            pl.BlockSpec((p, 1), lambda i: (0, 0)),
        ],
        out_specs=pl.BlockSpec((1, p, ccls), lambda i: (i, 0, 0)),
        compiler_params=pltpu.CompilerParams(
            dimension_semantics=("parallel",)),
        cost_estimate=pl.CostEstimate(flops=flops, transcendentals=0,
                                      bytes_accessed=bytes_accessed),
    )(x, wt, bt, wc, bc, mask)

    # Extract interior pixels (padding rows hold garbage by construction).
    out = out_flat.reshape(n, h + 2, s, ccls)[:, 1:h + 1, 1:w + 1, :]
    return out


def _pack_conv_weight(w_oihw):
    """(Cout, Cin, 3, 3) OIHW -> (3, 3*Cin, Cout), rows ordered (dx, ci)."""
    cout, cin = w_oihw.shape[0], w_oihw.shape[1]
    return jnp.transpose(w_oihw, (2, 3, 1, 0)).reshape(3, 3 * cin, cout)


# ----------------------------------------------------------------------------
# RetinaNetClassificationHead forward (fusion=False semantics, fp32 I/O).
# ----------------------------------------------------------------------------
def init_head_params(key, in_channels, num_anchors, num_classes,
                     prior_probability=0.01):
    params = {}
    keys = jax.random.split(key, 5)
    for i in range(4):
        params[f"conv{i}_w"] = 0.01 * jax.random.normal(
            keys[i], (in_channels, in_channels, 3, 3), jnp.float32)
        params[f"conv{i}_b"] = jnp.zeros((in_channels,), jnp.float32)
    params["cls_w"] = 0.01 * jax.random.normal(
        keys[4], (num_anchors * num_classes, in_channels, 3, 3), jnp.float32)
    params["cls_b"] = jnp.full(
        (num_anchors * num_classes,),
        -math.log((1 - prior_probability) / prior_probability), jnp.float32)
    return params


def classification_head_forward(features, params, num_anchors, num_classes):
    """features: list of NCHW arrays (like the torch module's input list)."""
    in_channels = params["conv0_w"].shape[0]
    wt = jnp.stack([_pack_conv_weight(params[f"conv{i}_w"])
                    for i in range(4)]).astype(jnp.bfloat16)   # (4, 3, 3C, C)
    bt = jnp.stack([params[f"conv{i}_b"]
                    for i in range(4)]).reshape(4, 1, in_channels)  # f32
    wc = _pack_conv_weight(params["cls_w"]).astype(jnp.bfloat16)    # (3,3C,AC)
    bc = params["cls_b"].reshape(1, -1)                             # f32

    all_cls_logits = []
    for feat in features:
        n, _, h, w = feat.shape
        y = _head_level_pallas(feat, wt, bt, wc, bc)      # (N, H, W, A*C)
        # (N, H, W, A*C) -> (N, H*W*A, C)  == torch view/permute/reshape
        all_cls_logits.append(y.reshape(n, h * w * num_anchors, num_classes))
    return jnp.concatenate(all_cls_logits, axis=1)


# ----------------------------------------------------------------------------
# Pure-JAX reference (mirrors the PyTorch NCHW code path exactly).
# ----------------------------------------------------------------------------
def reference_forward(features, params, num_anchors, num_classes):
    def conv(x, w, b):
        y = jax.lax.conv_general_dilated(
            x, w, (1, 1), "SAME",
            dimension_numbers=("NCHW", "OIHW", "NCHW"))
        return y + b[None, :, None, None]

    outs = []
    for feat in features:
        y = feat
        for i in range(4):
            y = jnp.maximum(conv(y, params[f"conv{i}_w"],
                                 params[f"conv{i}_b"]), 0.0)
        y = conv(y, params["cls_w"], params["cls_b"])
        n, _, h, w = y.shape
        y = y.reshape(n, num_anchors, num_classes, h, w)
        y = jnp.transpose(y, (0, 3, 4, 1, 2))
        y = y.reshape(n, h * w * num_anchors, num_classes)
        outs.append(y)
    return jnp.concatenate(outs, axis=1)


if __name__ == "__main__":
    key = jax.random.PRNGKey(0)
    k_feat0, k_feat1, k_params = jax.random.split(key, 3)

    batch, in_channels = 2, 32
    num_anchors, num_classes = 3, 6

    # Two pyramid levels (list input, NCHW like the torch module).
    features = [
        jax.random.normal(k_feat0, (batch, in_channels, 8, 8), jnp.float32),
        jax.random.normal(k_feat1, (batch, in_channels, 4, 4), jnp.float32),
    ]
    params = init_head_params(k_params, in_channels, num_anchors, num_classes)

    out = classification_head_forward(features, params, num_anchors,
                                      num_classes)
    out = jax.block_until_ready(out)

    expected_rows = sum(f.shape[2] * f.shape[3] * num_anchors
                        for f in features)
    assert out.shape == (batch, expected_rows, num_classes), out.shape

    ref = jax.block_until_ready(
        reference_forward(features, params, num_anchors, num_classes))
    max_err = float(jnp.max(jnp.abs(out - ref)))
    assert jnp.allclose(out, ref, atol=5e-3, rtol=2e-2), max_err

    print("KERNEL_OK")
</pallas_src>

<mosaic_0001>
module attributes {stable_mosaic.version = 11 : i64} {
  func.func @_head_kernel(%arg0: i32, %arg1: memref<1x160x32xbf16, #tpu.memory_space<vmem>>, %arg2: memref<4x3x96x32xbf16, #tpu.memory_space<vmem>>, %arg3: memref<4x1x32xf32, #tpu.memory_space<vmem>>, %arg4: memref<3x96x18xbf16, #tpu.memory_space<vmem>>, %arg5: memref<1x18xf32, #tpu.memory_space<vmem>>, %arg6: memref<160x1xf32, #tpu.memory_space<vmem>>, %arg7: memref<1x160x18xf32, #tpu.memory_space<vmem>>) attributes {dimension_semantics = [#tpu.dimension_semantics<parallel>], iteration_bounds = array<i64: 2>, scalar_prefetch = 0 : i64, scratch_operands = 0 : i64, tpu.core_type = #tpu.core_type<tc>, window_params = [{transform_indices = @transform_0, window_bounds = array<i64: 1, 160, 32>}, {pipeline_mode = #tpu.pipeline_mode<synchronous>, transform_indices = @transform_1, window_bounds = array<i64: 4, 3, 96, 32>}, {pipeline_mode = #tpu.pipeline_mode<synchronous>, transform_indices = @transform_2, window_bounds = array<i64: 4, 1, 32>}, {pipeline_mode = #tpu.pipeline_mode<synchronous>, transform_indices = @transform_3, window_bounds = array<i64: 3, 96, 18>}, {pipeline_mode = #tpu.pipeline_mode<synchronous>, transform_indices = @transform_4, window_bounds = array<i64: 1, 18>}, {pipeline_mode = #tpu.pipeline_mode<synchronous>, transform_indices = @transform_5, window_bounds = array<i64: 160, 1>}, {transform_indices = @transform_6, window_bounds = array<i64: 1, 160, 18>}]} {
    %c0 = arith.constant 0 : index
    %c0_0 = arith.constant 0 : index
    %0 = vector.load %arg6[%c0, %c0_0] : memref<160x1xf32, #tpu.memory_space<vmem>>, vector<160x1xf32>
    %c0_1 = arith.constant 0 : index
    %c0_2 = arith.constant 0 : index
    %c0_3 = arith.constant 0 : index
    %1 = vector.load %arg1[%c0_1, %c0_2, %c0_3] : memref<1x160x32xbf16, #tpu.memory_space<vmem>>, vector<1x160x32xbf16>
    %2 = vector.shape_cast %1 : vector<1x160x32xbf16> to vector<160x32xbf16>
    %c0_4 = arith.constant 0 : index
    %c0_5 = arith.constant 0 : index
    %c0_6 = arith.constant 0 : index
    %c0_7 = arith.constant 0 : index
    %3 = vector.load %arg2[%c0_4, %c0_5, %c0_6, %c0_7] : memref<4x3x96x32xbf16, #tpu.memory_space<vmem>>, vector<1x3x96x32xbf16>
    %4 = vector.shape_cast %3 : vector<1x3x96x32xbf16> to vector<3x96x32xbf16>
    %c0_8 = arith.constant 0 : index
    %c0_9 = arith.constant 0 : index
    %c0_10 = arith.constant 0 : index
    %5 = vector.load %arg3[%c0_8, %c0_9, %c0_10] : memref<4x1x32xf32, #tpu.memory_space<vmem>>, vector<1x1x32xf32>
    %6 = vector.shape_cast %5 : vector<1x1x32xf32> to vector<1x32xf32>
    %cst = arith.constant 0.000000e+00 : bf16
    %7 = vector.broadcast %cst : bf16 to vector<1x32xbf16>
    %8 = vector.extract_strided_slice %2 {offsets = [0, 0], sizes = [159, 32], strides = [1, 1]} : vector<160x32xbf16> to vector<159x32xbf16>
    %9 = tpu.concatenate %7, %8 in 0 : vector<1x32xbf16>, vector<159x32xbf16> -> vector<160x32xbf16>
    %cst_11 = arith.constant 0.000000e+00 : bf16
    %10 = vector.broadcast %cst_11 : bf16 to vector<1x32xbf16>
    %11 = vector.extract_strided_slice %2 {offsets = [1, 0], sizes = [159, 32], strides = [1, 1]} : vector<160x32xbf16> to vector<159x32xbf16>
    %12 = tpu.concatenate %11, %10 in 0 : vector<159x32xbf16>, vector<1x32xbf16> -> vector<160x32xbf16>
    %13 = tpu.concatenate %9, %2, %12 in 1 : vector<160x32xbf16>, vector<160x32xbf16>, vector<160x32xbf16> -> vector<160x96xbf16>
    %cst_12 = arith.constant 0.000000e+00 : bf16
    %14 = vector.broadcast %cst_12 : bf16 to vector<16x96xbf16>
    %15 = vector.extract_strided_slice %13 {offsets = [0, 0], sizes = [144, 96], strides = [1, 1]} : vector<160x96xbf16> to vector<144x96xbf16>
    %16 = tpu.concatenate %14, %15 in 0 : vector<16x96xbf16>, vector<144x96xbf16> -> vector<160x96xbf16>
    %17 = vector.extract_strided_slice %4 {offsets = [0, 0, 0], sizes = [1, 96, 32], strides = [1, 1, 1]} : vector<3x96x32xbf16> to vector<1x96x32xbf16>
    %18 = vector.shape_cast %17 : vector<1x96x32xbf16> to vector<96x32xbf16>
    %cst_13 = arith.constant dense<0.000000e+00> : vector<160x32xf32>
    %19 = tpu.matmul %16, %18, %cst_13 {dimension_numbers = #tpu.dot_dimension_numbers<[1], [0], [0], [1], [0, 0, 1, 1], [], []>} : vector<160x96xbf16>, vector<96x32xbf16>, vector<160x32xf32> -> vector<160x32xf32>
    %20 = vector.extract_strided_slice %4 {offsets = [1, 0, 0], sizes = [1, 96, 32], strides = [1, 1, 1]} : vector<3x96x32xbf16> to vector<1x96x32xbf16>
    %21 = vector.shape_cast %20 : vector<1x96x32xbf16> to vector<96x32xbf16>
    %cst_14 = arith.constant dense<0.000000e+00> : vector<160x32xf32>
    %22 = tpu.matmul %13, %21, %cst_14 {dimension_numbers = #tpu.dot_dimension_numbers<[1], [0], [0], [1], [0, 0, 1, 1], [], []>} : vector<160x96xbf16>, vector<96x32xbf16>, vector<160x32xf32> -> vector<160x32xf32>
    %23 = arith.addf %19, %22 : vector<160x32xf32>
    %cst_15 = arith.constant 0.000000e+00 : bf16
    %24 = vector.broadcast %cst_15 : bf16 to vector<16x96xbf16>
    %25 = vector.extract_strided_slice %13 {offsets = [16, 0], sizes = [144, 96], strides = [1, 1]} : vector<160x96xbf16> to vector<144x96xbf16>
    %26 = tpu.concatenate %25, %24 in 0 : vector<144x96xbf16>, vector<16x96xbf16> -> vector<160x96xbf16>
    %27 = vector.extract_strided_slice %4 {offsets = [2, 0, 0], sizes = [1, 96, 32], strides = [1, 1, 1]} : vector<3x96x32xbf16> to vector<1x96x32xbf16>
    %28 = vector.shape_cast %27 : vector<1x96x32xbf16> to vector<96x32xbf16>
    %cst_16 = arith.constant dense<0.000000e+00> : vector<160x32xf32>
    %29 = tpu.matmul %26, %28, %cst_16 {dimension_numbers = #tpu.dot_dimension_numbers<[1], [0], [0], [1], [0, 0, 1, 1], [], []>} : vector<160x96xbf16>, vector<96x32xbf16>, vector<160x32xf32> -> vector<160x32xf32>
    %30 = arith.addf %23, %29 : vector<160x32xf32>
    %31 = vector.broadcast %6 : vector<1x32xf32> to vector<160x32xf32>
    %32 = arith.addf %30, %31 : vector<160x32xf32>
    %cst_17 = arith.constant 0.000000e+00 : f32
    %33 = vector.broadcast %cst_17 : f32 to vector<160x32xf32>
    %34 = arith.maximumf %32, %33 : vector<160x32xf32>
    %35 = vector.broadcast %0 : vector<160x1xf32> to vector<160x32xf32>
    %36 = arith.mulf %34, %35 : vector<160x32xf32>
    %37 = arith.truncf %36 : vector<160x32xf32> to vector<160x32xbf16>
    %c1 = arith.constant 1 : index
    %c0_18 = arith.constant 0 : index
    %c0_19 = arith.constant 0 : index
    %c0_20 = arith.constant 0 : index
    %38 = vector.load %arg2[%c1, %c0_18, %c0_19, %c0_20] : memref<4x3x96x32xbf16, #tpu.memory_space<vmem>>, vector<1x3x96x32xbf16>
    %39 = vector.shape_cast %38 : vector<1x3x96x32xbf16> to vector<3x96x32xbf16>
    %c1_21 = arith.constant 1 : index
    %c0_22 = arith.constant 0 : index
    %c0_23 = arith.constant 0 : index
    %40 = vector.load %arg3[%c1_21, %c0_22, %c0_23] : memref<4x1x32xf32, #tpu.memory_space<vmem>>, vector<1x1x32xf32>
    %41 = vector.shape_cast %40 : vector<1x1x32xf32> to vector<1x32xf32>
    %cst_24 = arith.constant 0.000000e+00 : bf16
    %42 = vector.broadcast %cst_24 : bf16 to vector<1x32xbf16>
    %43 = vector.extract_strided_slice %37 {offsets = [0, 0], sizes = [159, 32], strides = [1, 1]} : vector<160x32xbf16> to vector<159x32xbf16>
    %44 = tpu.concatenate %42, %43 in 0 : vector<1x32xbf16>, vector<159x32xbf16> -> vector<160x32xbf16>
    %cst_25 = arith.constant 0.000000e+00 : bf16
    %45 = vector.broadcast %cst_25 : bf16 to vector<1x32xbf16>
    %46 = vector.extract_strided_slice %37 {offsets = [1, 0], sizes = [159, 32], strides = [1, 1]} : vector<160x32xbf16> to vector<159x32xbf16>
    %47 = tpu.concatenate %46, %45 in 0 : vector<159x32xbf16>, vector<1x32xbf16> -> vector<160x32xbf16>
    %48 = tpu.concatenate %44, %37, %47 in 1 : vector<160x32xbf16>, vector<160x32xbf16>, vector<160x32xbf16> -> vector<160x96xbf16>
    %cst_26 = arith.constant 0.000000e+00 : bf16
    %49 = vector.broadcast %cst_26 : bf16 to vector<16x96xbf16>
    %50 = vector.extract_strided_slice %48 {offsets = [0, 0], sizes = [144, 96], strides = [1, 1]} : vector<160x96xbf16> to vector<144x96xbf16>
    %51 = tpu.concatenate %49, %50 in 0 : vector<16x96xbf16>, vector<144x96xbf16> -> vector<160x96xbf16>
    %52 = vector.extract_strided_slice %39 {offsets = [0, 0, 0], sizes = [1, 96, 32], strides = [1, 1, 1]} : vector<3x96x32xbf16> to vector<1x96x32xbf16>
    %53 = vector.shape_cast %52 : vector<1x96x32xbf16> to vector<96x32xbf16>
    %cst_27 = arith.constant dense<0.000000e+00> : vector<160x32xf32>
    %54 = tpu.matmul %51, %53, %cst_27 {dimension_numbers = #tpu.dot_dimension_numbers<[1], [0], [0], [1], [0, 0, 1, 1], [], []>} : vector<160x96xbf16>, vector<96x32xbf16>, vector<160x32xf32> -> vector<160x32xf32>
    %55 = vector.extract_strided_slice %39 {offsets = [1, 0, 0], sizes = [1, 96, 32], strides = [1, 1, 1]} : vector<3x96x32xbf16> to vector<1x96x32xbf16>
    %56 = vector.shape_cast %55 : vector<1x96x32xbf16> to vector<96x32xbf16>
    %cst_28 = arith.constant dense<0.000000e+00> : vector<160x32xf32>
    %57 = tpu.matmul %48, %56, %cst_28 {dimension_numbers = #tpu.dot_dimension_numbers<[1], [0], [0], [1], [0, 0, 1, 1], [], []>} : vector<160x96xbf16>, vector<96x32xbf16>, vector<160x32xf32> -> vector<160x32xf32>
    %58 = arith.addf %54, %57 : vector<160x32xf32>
    %cst_29 = arith.constant 0.000000e+00 : bf16
    %59 = vector.broadcast %cst_29 : bf16 to vector<16x96xbf16>
    %60 = vector.extract_strided_slice %48 {offsets = [16, 0], sizes = [144, 96], strides = [1, 1]} : vector<160x96xbf16> to vector<144x96xbf16>
    %61 = tpu.concatenate %60, %59 in 0 : vector<144x96xbf16>, vector<16x96xbf16> -> vector<160x96xbf16>
    %62 = vector.extract_strided_slice %39 {offsets = [2, 0, 0], sizes = [1, 96, 32], strides = [1, 1, 1]} : vector<3x96x32xbf16> to vector<1x96x32xbf16>
    %63 = vector.shape_cast %62 : vector<1x96x32xbf16> to vector<96x32xbf16>
    %cst_30 = arith.constant dense<0.000000e+00> : vector<160x32xf32>
    %64 = tpu.matmul %61, %63, %cst_30 {dimension_numbers = #tpu.dot_dimension_numbers<[1], [0], [0], [1], [0, 0, 1, 1], [], []>} : vector<160x96xbf16>, vector<96x32xbf16>, vector<160x32xf32> -> vector<160x32xf32>
    %65 = arith.addf %58, %64 : vector<160x32xf32>
    %66 = vector.broadcast %41 : vector<1x32xf32> to vector<160x32xf32>
    %67 = arith.addf %65, %66 : vector<160x32xf32>
    %cst_31 = arith.constant 0.000000e+00 : f32
    %68 = vector.broadcast %cst_31 : f32 to vector<160x32xf32>
    %69 = arith.maximumf %67, %68 : vector<160x32xf32>
    %70 = vector.broadcast %0 : vector<160x1xf32> to vector<160x32xf32>
    %71 = arith.mulf %69, %70 : vector<160x32xf32>
    %72 = arith.truncf %71 : vector<160x32xf32> to vector<160x32xbf16>
    %c2 = arith.constant 2 : index
    %c0_32 = arith.constant 0 : index
    %c0_33 = arith.constant 0 : index
    %c0_34 = arith.constant 0 : index
    %73 = vector.load %arg2[%c2, %c0_32, %c0_33, %c0_34] : memref<4x3x96x32xbf16, #tpu.memory_space<vmem>>, vector<1x3x96x32xbf16>
    %74 = vector.shape_cast %73 : vector<1x3x96x32xbf16> to vector<3x96x32xbf16>
    %c2_35 = arith.constant 2 : index
    %c0_36 = arith.constant 0 : index
    %c0_37 = arith.constant 0 : index
    %75 = vector.load %arg3[%c2_35, %c0_36, %c0_37] : memref<4x1x32xf32, #tpu.memory_space<vmem>>, vector<1x1x32xf32>
    %76 = vector.shape_cast %75 : vector<1x1x32xf32> to vector<1x32xf32>
    %cst_38 = arith.constant 0.000000e+00 : bf16
    %77 = vector.broadcast %cst_38 : bf16 to vector<1x32xbf16>
    %78 = vector.extract_strided_slice %72 {offsets = [0, 0], sizes = [159, 32], strides = [1, 1]} : vector<160x32xbf16> to vector<159x32xbf16>
    %79 = tpu.concatenate %77, %78 in 0 : vector<1x32xbf16>, vector<159x32xbf16> -> vector<160x32xbf16>
    %cst_39 = arith.constant 0.000000e+00 : bf16
    %80 = vector.broadcast %cst_39 : bf16 to vector<1x32xbf16>
    %81 = vector.extract_strided_slice %72 {offsets = [1, 0], sizes = [159, 32], strides = [1, 1]} : vector<160x32xbf16> to vector<159x32xbf16>
    %82 = tpu.concatenate %81, %80 in 0 : vector<159x32xbf16>, vector<1x32xbf16> -> vector<160x32xbf16>
    %83 = tpu.concatenate %79, %72, %82 in 1 : vector<160x32xbf16>, vector<160x32xbf16>, vector<160x32xbf16> -> vector<160x96xbf16>
    %cst_40 = arith.constant 0.000000e+00 : bf16
    %84 = vector.broadcast %cst_40 : bf16 to vector<16x96xbf16>
    %85 = vector.extract_strided_slice %83 {offsets = [0, 0], sizes = [144, 96], strides = [1, 1]} : vector<160x96xbf16> to vector<144x96xbf16>
    %86 = tpu.concatenate %84, %85 in 0 : vector<16x96xbf16>, vector<144x96xbf16> -> vector<160x96xbf16>
    %87 = vector.extract_strided_slice %74 {offsets = [0, 0, 0], sizes = [1, 96, 32], strides = [1, 1, 1]} : vector<3x96x32xbf16> to vector<1x96x32xbf16>
    %88 = vector.shape_cast %87 : vector<1x96x32xbf16> to vector<96x32xbf16>
    %cst_41 = arith.constant dense<0.000000e+00> : vector<160x32xf32>
    %89 = tpu.matmul %86, %88, %cst_41 {dimension_numbers = #tpu.dot_dimension_numbers<[1], [0], [0], [1], [0, 0, 1, 1], [], []>} : vector<160x96xbf16>, vector<96x32xbf16>, vector<160x32xf32> -> vector<160x32xf32>
    %90 = vector.extract_strided_slice %74 {offsets = [1, 0, 0], sizes = [1, 96, 32], strides = [1, 1, 1]} : vector<3x96x32xbf16> to vector<1x96x32xbf16>
    %91 = vector.shape_cast %90 : vector<1x96x32xbf16> to vector<96x32xbf16>
    %cst_42 = arith.constant dense<0.000000e+00> : vector<160x32xf32>
    %92 = tpu.matmul %83, %91, %cst_42 {dimension_numbers = #tpu.dot_dimension_numbers<[1], [0], [0], [1], [0, 0, 1, 1], [], []>} : vector<160x96xbf16>, vector<96x32xbf16>, vector<160x32xf32> -> vector<160x32xf32>
    %93 = arith.addf %89, %92 : vector<160x32xf32>
    %cst_43 = arith.constant 0.000000e+00 : bf16
    %94 = vector.broadcast %cst_43 : bf16 to vector<16x96xbf16>
    %95 = vector.extract_strided_slice %83 {offsets = [16, 0], sizes = [144, 96], strides = [1, 1]} : vector<160x96xbf16> to vector<144x96xbf16>
    %96 = tpu.concatenate %95, %94 in 0 : vector<144x96xbf16>, vector<16x96xbf16> -> vector<160x96xbf16>
    %97 = vector.extract_strided_slice %74 {offsets = [2, 0, 0], sizes = [1, 96, 32], strides = [1, 1, 1]} : vector<3x96x32xbf16> to vector<1x96x32xbf16>
    %98 = vector.shape_cast %97 : vector<1x96x32xbf16> to vector<96x32xbf16>
    %cst_44 = arith.constant dense<0.000000e+00> : vector<160x32xf32>
    %99 = tpu.matmul %96, %98, %cst_44 {dimension_numbers = #tpu.dot_dimension_numbers<[1], [0], [0], [1], [0, 0, 1, 1], [], []>} : vector<160x96xbf16>, vector<96x32xbf16>, vector<160x32xf32> -> vector<160x32xf32>
    %100 = arith.addf %93, %99 : vector<160x32xf32>
    %101 = vector.broadcast %76 : vector<1x32xf32> to vector<160x32xf32>
    %102 = arith.addf %100, %101 : vector<160x32xf32>
    %cst_45 = arith.constant 0.000000e+00 : f32
    %103 = vector.broadcast %cst_45 : f32 to vector<160x32xf32>
    %104 = arith.maximumf %102, %103 : vector<160x32xf32>
    %105 = vector.broadcast %0 : vector<160x1xf32> to vector<160x32xf32>
    %106 = arith.mulf %104, %105 : vector<160x32xf32>
    %107 = arith.truncf %106 : vector<160x32xf32> to vector<160x32xbf16>
    %c3 = arith.constant 3 : index
    %c0_46 = arith.constant 0 : index
    %c0_47 = arith.constant 0 : index
    %c0_48 = arith.constant 0 : index
    %108 = vector.load %arg2[%c3, %c0_46, %c0_47, %c0_48] : memref<4x3x96x32xbf16, #tpu.memory_space<vmem>>, vector<1x3x96x32xbf16>
    %109 = vector.shape_cast %108 : vector<1x3x96x32xbf16> to vector<3x96x32xbf16>
    %c3_49 = arith.constant 3 : index
    %c0_50 = arith.constant 0 : index
    %c0_51 = arith.constant 0 : index
    %110 = vector.load %arg3[%c3_49, %c0_50, %c0_51] : memref<4x1x32xf32, #tpu.memory_space<vmem>>, vector<1x1x32xf32>
    %111 = vector.shape_cast %110 : vector<1x1x32xf32> to vector<1x32xf32>
    %cst_52 = arith.constant 0.000000e+00 : bf16
    %112 = vector.broadcast %cst_52 : bf16 to vector<1x32xbf16>
    %113 = vector.extract_strided_slice %107 {offsets = [0, 0], sizes = [159, 32], strides = [1, 1]} : vector<160x32xbf16> to vector<159x32xbf16>
    %114 = tpu.concatenate %112, %113 in 0 : vector<1x32xbf16>, vector<159x32xbf16> -> vector<160x32xbf16>
    %cst_53 = arith.constant 0.000000e+00 : bf16
    %115 = vector.broadcast %cst_53 : bf16 to vector<1x32xbf16>
    %116 = vector.extract_strided_slice %107 {offsets = [1, 0], sizes = [159, 32], strides = [1, 1]} : vector<160x32xbf16> to vector<159x32xbf16>
    %117 = tpu.concatenate %116, %115 in 0 : vector<159x32xbf16>, vector<1x32xbf16> -> vector<160x32xbf16>
    %118 = tpu.concatenate %114, %107, %117 in 1 : vector<160x32xbf16>, vector<160x32xbf16>, vector<160x32xbf16> -> vector<160x96xbf16>
    %cst_54 = arith.constant 0.000000e+00 : bf16
    %119 = vector.broadcast %cst_54 : bf16 to vector<16x96xbf16>
    %120 = vector.extract_strided_slice %118 {offsets = [0, 0], sizes = [144, 96], strides = [1, 1]} : vector<160x96xbf16> to vector<144x96xbf16>
    %121 = tpu.concatenate %119, %120 in 0 : vector<16x96xbf16>, vector<144x96xbf16> -> vector<160x96xbf16>
    %122 = vector.extract_strided_slice %109 {offsets = [0, 0, 0], sizes = [1, 96, 32], strides = [1, 1, 1]} : vector<3x96x32xbf16> to vector<1x96x32xbf16>
    %123 = vector.shape_cast %122 : vector<1x96x32xbf16> to vector<96x32xbf16>
    %cst_55 = arith.constant dense<0.000000e+00> : vector<160x32xf32>
    %124 = tpu.matmul %121, %123, %cst_55 {dimension_numbers = #tpu.dot_dimension_numbers<[1], [0], [0], [1], [0, 0, 1, 1], [], []>} : vector<160x96xbf16>, vector<96x32xbf16>, vector<160x32xf32> -> vector<160x32xf32>
    %125 = vector.extract_strided_slice %109 {offsets = [1, 0, 0], sizes = [1, 96, 32], strides = [1, 1, 1]} : vector<3x96x32xbf16> to vector<1x96x32xbf16>
    %126 = vector.shape_cast %125 : vector<1x96x32xbf16> to vector<96x32xbf16>
    %cst_56 = arith.constant dense<0.000000e+00> : vector<160x32xf32>
    %127 = tpu.matmul %118, %126, %cst_56 {dimension_numbers = #tpu.dot_dimension_numbers<[1], [0], [0], [1], [0, 0, 1, 1], [], []>} : vector<160x96xbf16>, vector<96x32xbf16>, vector<160x32xf32> -> vector<160x32xf32>
    %128 = arith.addf %124, %127 : vector<160x32xf32>
    %cst_57 = arith.constant 0.000000e+00 : bf16
    %129 = vector.broadcast %cst_57 : bf16 to vector<16x96xbf16>
    %130 = vector.extract_strided_slice %118 {offsets = [16, 0], sizes = [144, 96], strides = [1, 1]} : vector<160x96xbf16> to vector<144x96xbf16>
    %131 = tpu.concatenate %130, %129 in 0 : vector<144x96xbf16>, vector<16x96xbf16> -> vector<160x96xbf16>
    %132 = vector.extract_strided_slice %109 {offsets = [2, 0, 0], sizes = [1, 96, 32], strides = [1, 1, 1]} : vector<3x96x32xbf16> to vector<1x96x32xbf16>
    %133 = vector.shape_cast %132 : vector<1x96x32xbf16> to vector<96x32xbf16>
    %cst_58 = arith.constant dense<0.000000e+00> : vector<160x32xf32>
    %134 = tpu.matmul %131, %133, %cst_58 {dimension_numbers = #tpu.dot_dimension_numbers<[1], [0], [0], [1], [0, 0, 1, 1], [], []>} : vector<160x96xbf16>, vector<96x32xbf16>, vector<160x32xf32> -> vector<160x32xf32>
    %135 = arith.addf %128, %134 : vector<160x32xf32>
    %136 = vector.broadcast %111 : vector<1x32xf32> to vector<160x32xf32>
    %137 = arith.addf %135, %136 : vector<160x32xf32>
    %cst_59 = arith.constant 0.000000e+00 : f32
    %138 = vector.broadcast %cst_59 : f32 to vector<160x32xf32>
    %139 = arith.maximumf %137, %138 : vector<160x32xf32>
    %140 = vector.broadcast %0 : vector<160x1xf32> to vector<160x32xf32>
    %141 = arith.mulf %139, %140 : vector<160x32xf32>
    %142 = arith.truncf %141 : vector<160x32xf32> to vector<160x32xbf16>
    %c0_60 = arith.constant 0 : index
    %c0_61 = arith.constant 0 : index
    %c0_62 = arith.constant 0 : index
    %143 = vector.load %arg4[%c0_60, %c0_61, %c0_62] : memref<3x96x18xbf16, #tpu.memory_space<vmem>>, vector<3x96x18xbf16>
    %c0_63 = arith.constant 0 : index
    %c0_64 = arith.constant 0 : index
    %144 = vector.load %arg5[%c0_63, %c0_64] : memref<1x18xf32, #tpu.memory_space<vmem>>, vector<1x18xf32>
    %cst_65 = arith.constant 0.000000e+00 : bf16
    %145 = vector.broadcast %cst_65 : bf16 to vector<1x32xbf16>
    %146 = vector.extract_strided_slice %142 {offsets = [0, 0], sizes = [159, 32], strides = [1, 1]} : vector<160x32xbf16> to vector<159x32xbf16>
    %147 = tpu.concatenate %145, %146 in 0 : vector<1x32xbf16>, vector<159x32xbf16> -> vector<160x32xbf16>
    %cst_66 = arith.constant 0.000000e+00 : bf16
    %148 = vector.broadcast %cst_66 : bf16 to vector<1x32xbf16>
    %149 = vector.extract_strided_slice %142 {offsets = [1, 0], sizes = [159, 32], strides = [1, 1]} : vector<160x32xbf16> to vector<159x32xbf16>
    %150 = tpu.concatenate %149, %148 in 0 : vector<159x32xbf16>, vector<1x32xbf16> -> vector<160x32xbf16>
    %151 = tpu.concatenate %147, %142, %150 in 1 : vector<160x32xbf16>, vector<160x32xbf16>, vector<160x32xbf16> -> vector<160x96xbf16>
    %cst_67 = arith.constant 0.000000e+00 : bf16
    %152 = vector.broadcast %cst_67 : bf16 to vector<16x96xbf16>
    %153 = vector.extract_strided_slice %151 {offsets = [0, 0], sizes = [144, 96], strides = [1, 1]} : vector<160x96xbf16> to vector<144x96xbf16>
    %154 = tpu.concatenate %152, %153 in 0 : vector<16x96xbf16>, vector<144x96xbf16> -> vector<160x96xbf16>
    %155 = vector.extract_strided_slice %143 {offsets = [0, 0, 0], sizes = [1, 96, 18], strides = [1, 1, 1]} : vector<3x96x18xbf16> to vector<1x96x18xbf16>
    %156 = vector.shape_cast %155 : vector<1x96x18xbf16> to vector<96x18xbf16>
    %cst_68 = arith.constant dense<0.000000e+00> : vector<160x18xf32>
    %157 = tpu.matmul %154, %156, %cst_68 {dimension_numbers = #tpu.dot_dimension_numbers<[1], [0], [0], [1], [0, 0, 1, 1], [], []>} : vector<160x96xbf16>, vector<96x18xbf16>, vector<160x18xf32> -> vector<160x18xf32>
    %158 = vector.extract_strided_slice %143 {offsets = [1, 0, 0], sizes = [1, 96, 18], strides = [1, 1, 1]} : vector<3x96x18xbf16> to vector<1x96x18xbf16>
    %159 = vector.shape_cast %158 : vector<1x96x18xbf16> to vector<96x18xbf16>
    %cst_69 = arith.constant dense<0.000000e+00> : vector<160x18xf32>
    %160 = tpu.matmul %151, %159, %cst_69 {dimension_numbers = #tpu.dot_dimension_numbers<[1], [0], [0], [1], [0, 0, 1, 1], [], []>} : vector<160x96xbf16>, vector<96x18xbf16>, vector<160x18xf32> -> vector<160x18xf32>
    %161 = arith.addf %157, %160 : vector<160x18xf32>
    %cst_70 = arith.constant 0.000000e+00 : bf16
    %162 = vector.broadcast %cst_70 : bf16 to vector<16x96xbf16>
    %163 = vector.extract_strided_slice %151 {offsets = [16, 0], sizes = [144, 96], strides = [1, 1]} : vector<160x96xbf16> to vector<144x96xbf16>
    %164 = tpu.concatenate %163, %162 in 0 : vector<144x96xbf16>, vector<16x96xbf16> -> vector<160x96xbf16>
    %165 = vector.extract_strided_slice %143 {offsets = [2, 0, 0], sizes = [1, 96, 18], strides = [1, 1, 1]} : vector<3x96x18xbf16> to vector<1x96x18xbf16>
    %166 = vector.shape_cast %165 : vector<1x96x18xbf16> to vector<96x18xbf16>
    %cst_71 = arith.constant dense<0.000000e+00> : vector<160x18xf32>
    %167 = tpu.matmul %164, %166, %cst_71 {dimension_numbers = #tpu.dot_dimension_numbers<[1], [0], [0], [1], [0, 0, 1, 1], [], []>} : vector<160x96xbf16>, vector<96x18xbf16>, vector<160x18xf32> -> vector<160x18xf32>
    %168 = arith.addf %161, %167 : vector<160x18xf32>
    %169 = vector.broadcast %144 : vector<1x18xf32> to vector<160x18xf32>
    %170 = arith.addf %168, %169 : vector<160x18xf32>
    %c0_72 = arith.constant 0 : index
    %c0_73 = arith.constant 0 : index
    %c0_74 = arith.constant 0 : index
    %171 = vector.load %arg7[%c0_72, %c0_73, %c0_74] : memref<1x160x18xf32, #tpu.memory_space<vmem>>, vector<1x160x18xf32>
    %172 = vector.shape_cast %171 : vector<1x160x18xf32> to vector<160x18xf32>
    %173 = vector.shape_cast %170 : vector<160x18xf32> to vector<1x160x18xf32>
    tpu.vector_store %arg7[%c0_72, %c0_73, %c0_74], %173 {strides = array<i32>} : memref<1x160x18xf32, #tpu.memory_space<vmem>>, vector<1x160x18xf32>,
    return
  }
  func.func @transform_0(%arg0: i32) -> (i32, i32, i32) {
    %c0_i32 = arith.constant 0 : i32
    %c0_i32_0 = arith.constant 0 : i32
    %c0_i32_1 = arith.constant 0 : i32
    return %arg0, %c0_i32, %c0_i32_0 : i32, i32, i32
  }
  func.func @transform_1(%arg0: i32) -> (i32, i32, i32, i32) {
    %c0_i32 = arith.constant 0 : i32
    %c0_i32_0 = arith.constant 0 : i32
    %c0_i32_1 = arith.constant 0 : i32
    %c0_i32_2 = arith.constant 0 : i32
    %c0_i32_3 = arith.constant 0 : i32
    return %c0_i32, %c0_i32_0, %c0_i32_1, %c0_i32_2 : i32, i32, i32, i32
  }
  func.func @transform_2(%arg0: i32) -> (i32, i32, i32) {
    %c0_i32 = arith.constant 0 : i32
    %c0_i32_0 = arith.constant 0 : i32
    %c0_i32_1 = arith.constant 0 : i32
    %c0_i32_2 = arith.constant 0 : i32
    return %c0_i32, %c0_i32_0, %c0_i32_1 : i32, i32, i32
  }
  func.func @transform_3(%arg0: i32) -> (i32, i32, i32) {
    %c0_i32 = arith.constant 0 : i32
    %c0_i32_0 = arith.constant 0 : i32
    %c0_i32_1 = arith.constant 0 : i32
    %c0_i32_2 = arith.constant 0 : i32
    return %c0_i32, %c0_i32_0, %c0_i32_1 : i32, i32, i32
  }
  func.func @transform_4(%arg0: i32) -> (i32, i32) {
    %c0_i32 = arith.constant 0 : i32
    %c0_i32_0 = arith.constant 0 : i32
    %c0_i32_1 = arith.constant 0 : i32
    return %c0_i32, %c0_i32_0 : i32, i32
  }
  func.func @transform_5(%arg0: i32) -> (i32, i32) {
    %c0_i32 = arith.constant 0 : i32
    %c0_i32_0 = arith.constant 0 : i32
    %c0_i32_1 = arith.constant 0 : i32
    return %c0_i32, %c0_i32_0 : i32, i32
  }
  func.func @transform_6(%arg0: i32) -> (i32, i32, i32) {
    %c0_i32 = arith.constant 0 : i32
    %c0_i32_0 = arith.constant 0 : i32
    %c0_i32_1 = arith.constant 0 : i32
    return %arg0, %c0_i32, %c0_i32_0 : i32, i32, i32
  }
}

</mosaic_0001>

<bundles_post_ra>
// kernel: tpu_custom_call.1
= control target key start
LH: loop header
LB: loop body
LE: loop exit
PB: predicated region body
PF: predicated region fallthrough
CT: control target
= control target key end

     0   :  { %s5800_s21 = smov 0   ;;  %s7552_s0 = inlined_call_operand.vmem [shape: bf16[2,160,32], index: 0, kind: input, shape index: {}]   ;;  %s7553_s1 = inlined_call_operand.vmem [shape: bf16[4,3,96,32], index: 1, kind: input, shape index: {}]   ;;  %s7554_s2 = inlined_call_operand.vmem [shape: f32[4,1,32], index: 2, kind: input, shape index: {}]   ;;  %s7555_s3 = inlined_call_operand.vmem [shape: bf16[3,96,18], index: 3, kind: input, shape index: {}]   ;;  %s7556_s4 = inlined_call_operand.vmem [shape: f32[1,18], index: 4, kind: input, shape index: {}]   ;;  %s7557_s5 = inlined_call_operand.vmem [shape: f32[160,1], index: 5, kind: input, shape index: {}]   ;;  %s7558_s6 = inlined_call_operand.vmem [shape: f32[2,160,18], index: 6, kind: output, shape index: {}]  }
   0x1 LB: > { %s4542_s22 = sadd.s32 4294967295, %s5760_s21   ;;  %p4546_p0 = scmp.ge.s32.totalorder %s5760_s21, 1  ;;  %s5760_s21 = sphi %s5800_s21, %s16_s21  }
   0x2   : > { %p212_p1 = scmp.lt.s32.totalorder %s5760_s21, 3 }
   0x4   : > { %p213_p2 = pnand %p4546_p0, %p212_p1 }
   0x6   : > { %216 = sbr.rel (%p213_p2) target bundleno = 1933 (0x78d), region = 44 }
   0xb   : > { %p242_p3 = scmp.lt.s32.totalorder %s4542_s22, 1  ;;  %v5664_v0 = vld [vmem:[%s7553_s1 + $0x58] sm:$0xff]   ;;  %v5665_v1 = vld [vmem:[%s7553_s1 + $0x50] sm:$0xff]   ;;  %v5666_v2 = vld [vmem:[%s7553_s1 + $0x48] sm:$0xff]   ;;  %vm464_vm0 = vsmask.f32 7424 }
   0xc   : > { %5147 = vmatprep.subr.bf16.mxu0 %v5664_v0  ;;  %5627 = vmatprep.subr.bf16.mxu1 %v5664_v0  ;;  %v5667_v3 = vld [vmem:[%s7553_s1 + $0x40] sm:$0xff]   ;;  %s5762_s11 = smov 32   ;;  %v5668_v10 = vld [vmem:[%s7553_s1 + $0x38] sm:$0xff]   ;;  %s5763_s14 = smov 64   ;;  %vm380_vm1 = vsmask.f32 256 }
   0xd   : > { %s7630_s22 = smov (!%p242_p3, %s4542_s22), 1  ;;  %5148 = vmatpush3.bf16.msra.mxu0 %v5664_v0  ;;  %5633 = vmatpush3.bf16.msra.mxu1 %v5664_v0  ;;  %v5669_v40 = vld [vmem:[%s7553_s1 + $0x30] sm:$0xff]   ;;  %v5912_v44 = vld [vmem:[%s7553_s1 + $0x28] sm:$0xff]   ;;  %vm495_vm2 = vcmask 1047552   ;;  %vm461_vm4 = vcmask 1040384   ;;  %vm539_vm5 = vcmask 261120  }
   0xe   : > { %s5639_s27 = smul.u32 80, %s7630_s22  ;;  %5149 = vmatprep.subr.bf16.mxu0 %v5665_v1  ;;  %5628 = vmatprep.subr.bf16.mxu1 %v5665_v1  ;;  %v5936_v59 = vld [vmem:[%s7553_s1 + $0x88] sm:$0xff]   ;;  %vm5995_vm3 = vmand %vm495_vm2, %vm464_vm0  ;;  %vm570_vm7 = vcmask 523264   ;;  %vm627_vm8 = vcmask 785408   ;;  %vm4466_vm9 = vcmask 146432  }
   0xf   : > { %vm6079_vm6 = vmand %vm461_vm4, %vm380_vm1  ;;  %s5640_s9 = smul.u32 160, %s7630_s22 }
  0x10   : > { %s5823_s8 = scalar_lea.vmem %s7552_s0, %s5639_s27 }
  0x11   : > { %v5829_v4 = vld [vmem:[%s5823_s8 + $0x38] sm:$0xff]   ;;  %5150 = vmatpush3.bf16.msra.mxu0 %v5665_v1  ;;  %5634 = vmatpush3.bf16.msra.mxu1 %v5665_v1  ;;  %v5832_v5 = vld [vmem:[%s5823_s8 + $0x30] sm:$0xff]   ;;  %v5844_v9 = vld [vmem:[%s5823_s8] sm:$0xff]   ;;  %s7476_s16 = scalar_lea.vmem %s7558_s6, %s5640_s9 }
  0x12   : > { %5151 = vmatprep.subr.bf16.mxu0 %v5666_v2  ;;  %5629 = vmatprep.subr.bf16.mxu1 %v5666_v2  ;;  %v5837_v6 = vld [vmem:[%s5823_s8 + $0x18] sm:$0xff]   ;;  %v440_v7 = vshll.u32 %v5829_v4, 16  ;;  %v432_v8 = vshll.u32 %v5832_v5, 16  ;;  %v429_v11 = vshrl.u32 %v5832_v5, 16  ;;  %v385_v13 = vshll.u32 %v5844_v9, 16  ;;  %v5858_v15 = vld [vmem:[%s5823_s8 + $0x8] sm:$0xff]  }
  0x13   : > { %512 = vrot.lane.b32.xlu1 %v5829_v4, %s5762_s11  ;;  %510 = vrot.lane.b32.xlu0 %v5832_v5, %s5762_s11  ;;  %v5861_v16 = vld [vmem:[%s5823_s8 + $0x10] sm:$0xff]   ;;  %v382_v17 = vshrl.u32 %v5844_v9, 16  ;;  %v5867_v18 = vld [vmem:[%s5823_s8 + $0x40] sm:$0xff]   ;;  %v392_v20 = vshll.u32 %v5858_v15, 16  ;;  %v437_v22 = vshrl.u32 %v5829_v4, 16  ;;  %v389_v24 = vshrl.u32 %v5858_v15, 16 }
  0x14   : > { %v485_v12 = vrot.slane %v440_v7, 1  ;;  %v5855_v14 = vrot.slane %v432_v8, 1  ;;  %v465_v21 = vrot.slane %v385_v13, 1  ;;  %v448_v23 = vshll.u32 %v5867_v18, 16  ;;  %v5882_v26 = vld [vmem:[%s5823_s8 + $0x20] sm:$0xff]   ;;  %v5898_v34 = vld [vmem:[%s5823_s8 + $0x48] sm:$0xff]  }
  0x15   : > { %5152 = vmatpush3.bf16.msra.mxu0 %v5666_v2  ;;  %5635 = vmatpush3.bf16.msra.mxu1 %v5666_v2  ;;  %v400_v25 = vshll.u32 %v5861_v16, 16  ;;  %v467_v29 = vrot.slane %v392_v20, 1  ;;  %v397_v33 = vshrl.u32 %v5861_v16, 16  ;;  %v408_v37 = vshll.u32 %v5837_v6, 16  ;;  %v5921_v49 = vld [vmem:[%s5823_s8 + $0x28] sm:$0xff]  }
  0x16   : > { %5153 = vmatprep.subr.bf16.mxu0 %v5667_v3  ;;  %5630 = vmatprep.subr.bf16.mxu1 %v5667_v3  ;;  %v484_v19 = vor.u32 %v5855_v14, %v429_v11  ;;  %v466_v28 = vor.u32 %v465_v21, %v382_v17  ;;  %v487_v30 = vor.u32 %v485_v12, %v437_v22  ;;  %v5892_v31 = vrot.slane %v448_v23, 1 }
  0x17   : > { %504 = vrot.lane.b32.xlu1 %v5837_v6, %s5762_s11  ;;  %498 = vrot.lane.b32.xlu0 %v5844_v9, %s5762_s11  ;;  %v470_v32 = vrot.slane %v400_v25, 1  ;;  %v469_v36 = vor.u32 %v467_v29, %v389_v24  ;;  %v405_v38 = vshrl.u32 %v5837_v6, 16  ;;  %v416_v39 = vshll.u32 %v5882_v26, 16 }
  0x18   : > { %v486_v27 = vsel %vm464_vm0, %v484_v19, %v485_v12  ;;  %v468_v35 = vsel %vm464_vm0, %v466_v28, %v467_v29  ;;  %v439_v41 = vrot.slane %v437_v22, 7  ;;  %v391_v42 = vrot.slane %v389_v24, 7 }
  0x19   : > { %5154 = vmatpush3.bf16.msra.mxu0 %v5667_v3  ;;  %5636 = vmatpush3.bf16.msra.mxu1 %v5667_v3  ;;  %v473_v43 = vrot.slane %v408_v37, 1  ;;  %v489_v45 = vsel %vm464_vm0, %v487_v30, %v5892_v31  ;;  %v472_v46 = vor.u32 %v470_v32, %v397_v33  ;;  %v5917_v47 = vrot.slane %v416_v39, 1 }
  0x1a   : > { %5155 = vmatprep.subr.bf16.mxu0 %v5668_v10  ;;  %5631 = vmatprep.subr.bf16.mxu1 %v5668_v10  ;;  %v445_v48 = vshrl.u32 %v5867_v18, 16  ;;  %v471_v50 = vsel %vm464_vm0, %v469_v36, %v470_v32  ;;  %v407_v51 = vrot.slane %v405_v38, 7  ;;  %v456_v53 = vshll.u32 %v5898_v34, 16  ;;  %v253_v36 = vld [vmem:[%s7557_s5] sm:$0xff] }
  0x1b   : > { %531 = vrot.lane.b32.xlu1 %v486_v27, %s5763_s14  ;;  %500 = vrot.lane.b32.xlu0 %v5858_v15, %s5762_s11  ;;  %v475_v52 = vor.u32 %v473_v43, %v405_v38  ;;  %v453_v55 = vshrl.u32 %v5898_v34, 16  ;;  %v421_v56 = vshrl.u32 %v5921_v49, 16  ;;  %v431_v57 = vrot.slane %v429_v11, 7  ;;  %v255_v38 = vld [vmem:[%s7557_s5 + $0x10] sm:$0xff] }
  0x1c   : > { %v447_v54 = vrot.slane %v445_v48, 7  ;;  %v413_v58 = vshrl.u32 %v5882_v26, 16  ;;  %v442_v62 = vor.u32 %v440_v7, %v439_v41  ;;  %v399_v2 = vrot.slane %v397_v33, 7 }
  0x1d   : > { %5156 = vmatpush3.bf16.msra.mxu0 %v5668_v10  ;;  %5637 = vmatpush3.bf16.msra.mxu1 %v5668_v10  ;;  %v477_v60 = vsel %vm464_vm0, %v475_v52, %v5917_v47  ;;  %v455_v61 = vrot.slane %v453_v55, 7  ;;  %v423_v63 = vrot.slane %v421_v56, 7  ;;  %v434_v1 = vor.u32 %v432_v8, %v431_v57  ;;  %v270_v52 = vld [vmem:[%s7557_s5 + $0x88] sm:$0xff] }
  0x1e   : > { %5157 = vmatprep.subr.bf16.mxu0 %v5669_v40  ;;  %5632 = vmatprep.subr.bf16.mxu1 %v5669_v40  ;;  %v415_v0 = vrot.slane %v413_v58, 7  ;;  %v410_v3 = vor.u32 %v408_v37, %v407_v51  ;;  %v474_v6 = vsel %vm464_vm0, %v472_v46, %v473_v43  ;;  %v424_v10 = vshll.u32 %v5921_v49, 16  ;;  %v254_v37 = vld [vmem:[%s7557_s5 + $0x8] sm:$0xff]  ;;  %v264_v46 = vld [vmem:[%s7557_s5 + $0x58] sm:$0xff] }
  0x1f   : > { %519 = vrot.lane.b32.xlu1 %v468_v35, %s5763_s14  ;;  %502 = vrot.lane.b32.xlu0 %v5861_v16, %s5762_s11  ;;  %v5950_v11 = vsel %vm380_vm1, %v431_v57, %v442_v62  ;;  %v384_v4 = vrot.slane %v382_v17, 7  ;;  %v5955_v7 = vsel %vm380_vm1, %v423_v63, %v434_v1  ;;  %v394_v8 = vor.u32 %v392_v20, %v391_v42  ;;  %v262_v43 = vld [vmem:[%s7557_s5 + $0x48] sm:$0xff] }
  0x20   : > { %v5958_v5 = vsel %vm380_vm1, %v399_v2, %v410_v3  ;;  %v402_v12 = vor.u32 %v400_v25, %v399_v2  ;;  %v450_v17 = vor.u32 %v448_v23, %v447_v54  ;;  %v458_v21 = vor.u32 %v456_v53, %v455_v61 }
  0x21   : > { %5158 = vmatpush3.bf16.msra.mxu0 %v5669_v40  ;;  %5638 = vmatpush3.bf16.msra.mxu1 %v5669_v40  ;;  %v5967_v19 = vor.u32 %v385_v13, %v384_v4  ;;  %v5973_v22 = vsel %vm380_vm1, %v384_v4, %v394_v8  ;;  %v418_v16 = vor.u32 %v416_v39, %v415_v0  ;;  %v491_v25 = vrot.slane %v456_v53, 1  ;;  %v258_v39 = vld [vmem:[%s7557_s5 + $0x28] sm:$0xff]  ;;  %v257_v40 = vld [vmem:[%s7557_s5 + $0x20] sm:$0xff] }
  0x22   : > { %5179 = vmatprep.subr.bf16.mxu1 %v5912_v44  ;;  %5211 = vmatprep.subr.bf16.mxu0 %v5936_v59  ;;  %v5976_v15 = vsel %vm380_vm1, %v391_v42, %v402_v12  ;;  %v426_v20 = vor.u32 %v424_v10, %v423_v63  ;;  %v490_v24 = vor.u32 %v5892_v31, %v445_v48  ;;  %v7583_v29 = vmov 0  ;;  %v259_v42 = vld [vmem:[%s7557_s5 + $0x30] sm:$0xff]  ;;  %v266_v48 = vld [vmem:[%s7557_s5 + $0x68] sm:$0xff]  ;;  %v269_v53 = vld [vmem:[%s7557_s5 + $0x80] sm:$0xff] }
  0x23   : > { %521 = vrot.lane.b32.xlu1 %v471_v50, %s5763_s14  ;;  %533 = vrot.lane.b32.xlu0 %v489_v45, %s5763_s14  ;;  %v5980_v9 = vsel %vm380_vm1, %v439_v41, %v450_v17  ;;  %v5983_v13 = vsel %vm380_vm1, %v447_v54, %v458_v21  ;;  %v5986_v23 = vsel %vm380_vm1, %v407_v51, %v418_v16  ;;  %v7584_v29 = vsel %vm5995_vm3, 4294967295, %v7583_v29  ;;  %v260_v41 = vld [vmem:[%s7557_s5 + $0x38] sm:$0xff]  ;;  %v261_v45 = vld [vmem:[%s7557_s5 + $0x40] sm:$0xff] }
  0x24   : > { %v5989_v27 = vsel %vm380_vm1, %v415_v0, %v426_v20  ;;  %v493_v28 = vor.u32 %v491_v25, %v453_v55  ;;  %7585 = vst [vmem:[#allocation2_spill] sm:$0xff] %v7584_v29  ;;  %v479_v30 = vrot.slane %v424_v10, 1  ;;  %v492_v31 = vsel %vm464_vm0, %v490_v24, %v491_v25  ;;  %v268_v50 = vld [vmem:[%s7557_s5 + $0x78] sm:$0xff]  ;;  %v267_v51 = vld [vmem:[%s7557_s5 + $0x70] sm:$0xff]  ;;  %v5674_v12 = vld [vmem:[%s7553_s1 + $0x80] sm:$0xff]  }
  0x25   : > { %v7559_v33 = vmov 0   ;;  %v478_v35 = vor.u32 %v5917_v47, %v413_v58  ;;  %v263_v47 = vld [vmem:[%s7557_s5 + $0x50] sm:$0xff]  ;;  %v272_v54 = vld [vmem:[%s7557_s5 + $0x98] sm:$0xff]  ;;  %v7586_v61 = vmov 0  ;;  %v463_v0 = vsel %vm6079_vm6, 0, %v5967_v19  ;;  %v5671_v16 = vld [vmem:[%s7553_s1 + $0x20] sm:$0xff]  }
  0x26   : > { %v497_v32 = vsel %vm5995_vm3, %v493_v28, 0  ;;  %5652 = vset.pattern.permute.xlu0 %v7559_v33  ;;  %5653 = vset.pattern.permute.xlu1 %v7559_v33  ;;  %v271_v55 = vld [vmem:[%s7557_s5 + $0x90] sm:$0xff]  ;;  %v7587_v61 = vsel %vm6079_vm6, 4294967295, %v7586_v61  ;;  %v5673_v28 = vld [vmem:[%s7553_s1 + $0x18] sm:$0xff]  }
  0x27   : > { %525 = vrot.lane.b32.xlu1 %v477_v60, %s5763_s14  ;;  %523 = vrot.lane.b32.xlu0 %v474_v6, %s5763_s14  ;;  %7588 = vst [vmem:[#allocation3_spill] sm:$0xff] %v7587_v61 }
  0x2b   : > { %516 = vrot.lane.b32.xlu1 %v5898_v34, %s5762_s11  ;;  %514 = vrot.lane.b32.xlu0 %v5867_v18, %s5762_s11  ;;  %v481_v34 = vor.u32 %v479_v30, %v421_v56 }
  0x2d   : > { %v483_v18 = vsel %vm464_vm0, %v481_v34, %v5855_v14  ;;  %v256_v14 = vld [vmem:[%s7557_s5 + $0x18] sm:$0xff]  ;;  %v5675_v34 = vld [vmem:[%s7553_s1 + $0x10] sm:$0xff]  }
  0x2f   : > { %506 = vrot.lane.b32.xlu1 %v5882_v26, %s5762_s11  ;;  %535 = vrot.lane.b32.xlu0 %v492_v31, %s5763_s14  ;;  %v480_v26 = vsel %vm464_vm0, %v478_v35, %v479_v30  ;;  %v5680_v35 = vld [vmem:[%s7553_s1 + $0x68] sm:$0xff]  }
  0x33   : > { %508 = vrot.lane.b32.xlu1 %v5921_v49, %s5762_s11  ;;  %537 = vrot.lane.b32.xlu0 %v497_v32, %s5763_s14  ;;  %v265_v49 = vld [vmem:[%s7557_s5 + $0x60] sm:$0xff] }
  0x37   : > { %529 = vrot.lane.b32.xlu1 %v483_v18, %s5763_s14  ;;  %527 = vrot.lane.b32.xlu0 %v480_v26, %s5763_s14 }
  0x3b   : > { %1130 = vperm.xlu0 %5652, %v253_v36   ;;  %1135 = vperm.xlu1 %5653, %v254_v37   ;;  %v5677_v36 = vld [vmem:[%s7553_s1 + $0x8] sm:$0xff]  }
  0x3f   : > { %1145 = vperm.xlu0 %5652, %v256_v14   ;;  %1140 = vperm.xlu1 %5653, %v255_v38  }
  0x43   : > { %1155 = vperm.xlu0 %5652, %v258_v39   ;;  %1150 = vperm.xlu1 %5653, %v257_v40   ;;  %v5681_v40 = vld [vmem:[%s7553_s1 + $0x60] sm:$0xff]  }
  0x47   : > { %1165 = vperm.xlu0 %5652, %v260_v41   ;;  %1160 = vperm.xlu1 %5653, %v259_v42  }
  0x4b   : > { %1175 = vperm.xlu0 %5652, %v262_v43   ;;  %1170 = vperm.xlu1 %5653, %v261_v45  }
  0x4f   : > { %1185 = vperm.xlu0 %5652, %v264_v46   ;;  %1180 = vperm.xlu1 %5653, %v263_v47  }
  0x53   : > { %1195 = vperm.xlu0 %5652, %v266_v48   ;;  %1190 = vperm.xlu1 %5653, %v265_v49   ;;  %v5684_v48 = vld [vmem:[%s7553_s1 + $0xb8] sm:$0xff]   ;;  %v5686_v49 = vld [vmem:[%s7553_s1 + $0xb0] sm:$0xff]  }
  0x57   : > { %1205 = vperm.xlu0 %5652, %v268_v50   ;;  %1200 = vperm.xlu1 %5653, %v267_v51   ;;  %v5685_v50 = vld [vmem:[%s7553_s1 + $0xd8] sm:$0xff]   ;;  %v5687_v51 = vld [vmem:[%s7553_s1 + $0xa8] sm:$0xff]  }
  0x5b   : > { %1215 = vperm.xlu0 %5652, %v270_v52   ;;  %1210 = vperm.xlu1 %5653, %v269_v53   ;;  %v5688_v52 = vld [vmem:[%s7553_s1 + $0xd0] sm:$0xff]   ;;  %v5689_v53 = vld [vmem:[%s7553_s1 + $0xa0] sm:$0xff]  }
  0x5f   : > { %1225 = vperm.xlu0 %5652, %v272_v54   ;;  %1220 = vperm.xlu1 %5653, %v271_v55  }
  0x85   : > { %v513_v56 = vpop.permute.xlu1 %512  ;;  %v511_v57 = vpop.permute.xlu0 %510 }
  0x86   : > { %v560_v62 = vsel %vm539_vm5, %v5955_v7, %v511_v57  ;;  %v563_v19 = vsel %vm539_vm5, %v5950_v11, %v513_v56 }
  0x89   : > { %v505_v58 = vpop.permute.xlu1 %504  ;;  %v499_v60 = vpop.permute.xlu0 %498 }
  0x8a   : > { %v542_v3 = vsel %vm539_vm5, %v463_v0, %v499_v60 }
  0x8d   : > { %v532_v63 = vpop.permute.xlu1 %531  ;;  %v501_v1 = vpop.permute.xlu0 %500 }
  0x8e   : > { %v6089_v2 = vsel %vm570_vm7, %v560_v62, %v532_v63  ;;  %v545_v7 = vsel %vm539_vm5, %v5973_v22, %v501_v1  ;;  %v5676_v22 = vld [vmem:[%s7553_s1 + $0x78] sm:$0xff]  }
  0x8f   : > { %5171 = vmatprep.mubr.msk.bf16.mxu1 %vm627_vm8, %v6089_v2 }
  0x91   : > { %v520_v6 = vpop.permute.xlu1 %519  ;;  %v503_v10 = vpop.permute.xlu0 %502 }
  0x92   : > { %v6095_v4 = vsel %vm570_vm7, %v542_v3, %v520_v6  ;;  %v548_v24 = vsel %vm539_vm5, %v5976_v15, %v503_v10  ;;  %v5678_v15 = vld [vmem:[%s7553_s1 + $0x70] sm:$0xff]  }
  0x93   : > { %5159 = vmatprep.mubr.msk.bf16.mxu0 %vm627_vm8, %v6095_v4 }
  0x95   : > { %v522_v8 = vpop.permute.xlu1 %521  ;;  %v534_v17 = vpop.permute.xlu0 %533 }
  0x96   : > { %v6107_v21 = vsel %vm570_vm7, %v545_v7, %v522_v8  ;;  %v6113_v20 = vsel %vm570_vm7, %v563_v19, %v534_v17 }
  0x97   : > { %5160 = vmatmul.mubr.msk.bf16.vlgmr.msra.gmra.mxu0 %vm627_vm8, %v6107_v21  ;;  %5172 = vmatmul.mubr.msk.bf16.vlgmr.msra.gmra.mxu1 %vm627_vm8, %v6113_v20 }
  0x98   : > { %5212 = vmatpush3.bf16.msra.mxu0 %v5936_v59  ;;  %5180 = vmatpush3.bf16.msra.mxu1 %v5912_v44  ;;  %v551_v44 = vsel %vm539_vm5, %v5958_v5, %v505_v58 }
  0x99   : > { %v526_v11 = vpop.permute.xlu1 %525  ;;  %5213 = vmatprep.subr.bf16.mxu0 %v5674_v12  ;;  %v524_v25 = vpop.permute.xlu0 %523  ;;  %5181 = vmatprep.subr.bf16.mxu1 %v5671_v16 }
  0x9a   : > { %v576_v30 = vsel %vm570_vm7, %v548_v24, %v524_v25  ;;  %v578_v31 = vsel %vm570_vm7, %v551_v44, %v526_v11 }
  0x9b   : > { %5163 = vmatprep.mubr.msk.bf16.mxu0 %vm627_vm8, %v576_v30 }
  0x9c   : > { %5214 = vmatpush3.bf16.msra.mxu0 %v5674_v12  ;;  %5182 = vmatpush3.bf16.msra.mxu1 %v5671_v16 }
  0x9d   : > { %v517_v59 = vpop.permute.xlu1 %516  ;;  %5215 = vmatprep.subr.bf16.mxu0 %v5676_v22  ;;  %v515_v32 = vpop.permute.xlu0 %514  ;;  %5183 = vmatprep.subr.bf16.mxu1 %v5673_v28 }
  0x9e   : > { %v566_v18 = vsel %vm539_vm5, %v5980_v9, %v515_v32  ;;  %v569_v38 = vsel %vm539_vm5, %v5983_v13, %v517_v59  ;;  %v5679_v9 = vld [vmem:[%s7553_s1] sm:$0xff]  }
  0x9f   : > { %5164 = vmatmul.mubr.msk.bf16.gmra.mxu0 %vm627_vm8, %v578_v31  ;;  %v6262_v59 = vld [vmem:[%s7554_s2] ss:$0 sm:$0xff] }
  0xa0   : > { %5216 = vmatpush3.bf16.msra.mxu0 %v5676_v22  ;;  %5184 = vmatpush3.bf16.msra.mxu1 %v5673_v28 }
  0xa1   : > { %v507_v5 = vpop.permute.xlu1 %506  ;;  %5217 = vmatprep.subr.bf16.mxu0 %v5678_v15  ;;  %v536_v26 = vpop.permute.xlu0 %535  ;;  %5185 = vmatprep.subr.bf16.mxu1 %v5675_v34 }
  0xa2   : > { %v588_v37 = vsel %vm570_vm7, %v566_v18, %v536_v26  ;;  %v554_v43 = vsel %vm539_vm5, %v5986_v23, %v507_v5  ;;  %v5682_v23 = vld [vmem:[%s7553_s1 + $0xe8] sm:$0xff]  }
  0xa3   : > { %5175 = vmatprep.mubr.msk.bf16.mxu1 %vm627_vm8, %v588_v37 }
  0xa4   : > { %5218 = vmatpush3.bf16.msra.mxu0 %v5678_v15  ;;  %5186 = vmatpush3.bf16.msra.mxu1 %v5675_v34 }
  0xa5   : > { %v509_v14 = vpop.permute.xlu1 %508  ;;  %5219 = vmatprep.subr.bf16.mxu0 %v5680_v35  ;;  %v538_v39 = vpop.permute.xlu0 %537  ;;  %5187 = vmatprep.subr.bf16.mxu1 %v5677_v36 }
  0xa6   : > { %v590_v41 = vsel %vm570_vm7, %v569_v38, %v538_v39  ;;  %v557_v42 = vsel %vm539_vm5, %v5989_v27, %v509_v14  ;;  %v5683_v27 = vld [vmem:[%s7553_s1 + $0xe0] sm:$0xff]  }
  0xa7   : > { %5176 = vmatmul.mubr.msk.bf16.gmra.mxu1 %vm627_vm8, %v590_v41 }
  0xa8   : > { %5220 = vmatpush3.bf16.msra.mxu0 %v5680_v35  ;;  %5188 = vmatpush3.bf16.msra.mxu1 %v5677_v36 }
  0xa9   : > { %v530_v13 = vpop.permute.xlu1 %529  ;;  %5191 = vmatprep.mubr.bf16.mxu1 %v7559_v33  ;;  %v528_v45 = vpop.permute.xlu0 %527  ;;  %5189 = vmatprep.subr.bf16.mxu1 %v5679_v9 }
  0xaa   : > { %v582_v46 = vsel %vm570_vm7, %v557_v42, %v530_v13  ;;  %5221 = vmatprep.subr.bf16.mxu0 %v5681_v40  ;;  %v580_v47 = vsel %vm570_vm7, %v554_v43, %v528_v45  ;;  %v5692_v42 = vld [vmem:[%s7553_s1 + $0x90] sm:$0xff]  }
  0xab   : > { %5167 = vmatprep.mubr.msk.bf16.mxu0 %vm627_vm8, %v580_v47 }
  0xac   : > { %5222 = vmatpush3.bf16.msra.mxu0 %v5681_v40  ;;  %5190 = vmatpush3.bf16.msra.mxu1 %v5679_v9  ;;  %v5690_v40 = vld [vmem:[%s7553_s1 + $0xc8] sm:$0xff]  }
  0xad   : > { %5168 = vmatmul.mubr.msk.bf16.gmra.mxu0 %vm627_vm8, %v582_v46  ;;  %5243 = vmatprep.subr.bf16.mxu1 %v5682_v23 }
  0xae   : > { %5223 = vmatprep.mubr.msk.bf16.mxu0 %vm627_vm8, %v6107_v21  ;;  %5275 = vmatprep.subr.bf16.mxu0 %v5684_v48 }
  0xaf   : > { %5192 = vmatmul.mubr.msk.bf16.vlgmr.msra.gmra.mxu1 %vm627_vm8, %v6095_v4 }
  0xb0   : > { %5195 = vmatprep.mubr.msk.bf16.mxu1 %vm627_vm8, %v6107_v21  ;;  %5244 = vmatpush3.bf16.msra.mxu1 %v5682_v23 }
  0xb1   : > { %5245 = vmatprep.subr.bf16.mxu1 %v5683_v27 }
  0xb4   : > { %5246 = vmatpush3.bf16.msra.mxu1 %v5683_v27 }
  0xb5   : > { %5224 = vmatmul.mubr.msk.bf16.vlgmr.msra.gmra.mxu0 %vm627_vm8, %v576_v30  ;;  %5247 = vmatprep.subr.bf16.mxu1 %v5685_v50 }
  0xb6   : > { %5227 = vmatprep.mubr.msk.bf16.mxu0 %vm627_vm8, %v578_v31  ;;  %5276 = vmatpush3.bf16.msra.mxu0 %v5684_v48  ;;  %v6227_v1 = vpop.permute.xlu1 %1135  ;;  %v6233_v10 = vpop.permute.xlu0 %1130 }
  0xb7   : > { %5196 = vmatmul.mubr.msk.bf16.gmra.mxu1 %vm627_vm8, %v576_v30  ;;  %5277 = vmatprep.subr.bf16.mxu0 %v5686_v49 }
  0xb8   : > { %5199 = vmatprep.mubr.msk.bf16.mxu1 %vm627_vm8, %v578_v31  ;;  %5248 = vmatpush3.bf16.msra.mxu1 %v5685_v50 }
  0xb9   : > { %5249 = vmatprep.subr.bf16.mxu1 %v5688_v52 }
  0xba   : > { %5278 = vmatpush3.bf16.msra.mxu0 %v5686_v49  ;;  %v6239_v8 = vpop.permute.xlu1 %1140  ;;  %v6247_v21 = vpop.permute.xlu0 %1145 }
  0xbb   : > { %5279 = vmatprep.subr.bf16.mxu0 %v5687_v51 }
  0xbc   : > { %5250 = vmatpush3.bf16.msra.mxu1 %v5688_v52 }
  0xbd   : > { %5228 = vmatmul.mubr.msk.bf16.gmra.mxu0 %vm627_vm8, %v580_v47  ;;  %5251 = vmatprep.subr.bf16.mxu1 %v5690_v40 }
  0xbe   : > { %5231 = vmatprep.mubr.msk.bf16.mxu0 %vm627_vm8, %v582_v46  ;;  %5280 = vmatpush3.bf16.msra.mxu0 %v5687_v51  ;;  %v6253_v22 = vpop.permute.xlu1 %1150  ;;  %v6257_v44 = vpop.permute.xlu0 %1155 }
  0xbf   : > { %5200 = vmatmul.mubr.msk.bf16.gmra.mxu1 %vm627_vm8, %v580_v47  ;;  %5281 = vmatprep.subr.bf16.mxu0 %v5689_v53 }
  0xc0   : > { %5203 = vmatprep.mubr.msk.bf16.mxu1 %vm627_vm8, %v582_v46  ;;  %5252 = vmatpush3.bf16.msra.mxu1 %v5690_v40 }
  0xc2   : > { %5282 = vmatpush3.bf16.msra.mxu0 %v5689_v53  ;;  %v6264_v35 = vpop.permute.xlu1 %1160  ;;  %v6276_v13 = vpop.permute.xlu0 %1165 }
  0xc5   : > { %5232 = vmatmul.mubr.msk.bf16.gmra.mxu0 %vm627_vm8, %v6089_v2 }
  0xc6   : > { %5235 = vmatprep.mubr.msk.bf16.mxu0 %vm627_vm8, %v6113_v20  ;;  %v6280_v50 = vpop.permute.xlu1 %1170 }
  0xc7   : > { %5204 = vmatmul.mubr.msk.bf16.gmra.mxu1 %vm627_vm8, %v6089_v2 }
  0xc8   : > { %5207 = vmatprep.mubr.msk.bf16.mxu1 %vm627_vm8, %v6113_v20 }
  0xcd   : > { %5236 = vmatmul.mubr.msk.bf16.gmra.mxu0 %vm627_vm8, %v588_v37 }
  0xce   : > { %5239 = vmatprep.mubr.msk.bf16.mxu0 %vm627_vm8, %v590_v41  ;;  %v5691_v41 = vld [vmem:[%s7553_s1 + $0x98] sm:$0xff]  }
  0xcf   : > { %5208 = vmatmul.mubr.msk.bf16.gmra.mxu1 %vm627_vm8, %v588_v37  ;;  %5283 = vmatprep.subr.bf16.mxu0 %v5691_v41 }
  0xd0   : > { %5284 = vmatpush3.bf16.msra.mxu0 %v5691_v41 }
  0xd1   : > { %5285 = vmatprep.subr.bf16.mxu0 %v5692_v42 }
  0xd4   : > { %5286 = vmatpush3.bf16.msra.mxu0 %v5692_v42 }
  0xd5   : > { %5240 = vmatmul.mubr.bf16.gmra.mxu0 %v7559_v33 }
  0xd6   : > { %5287 = vmatprep.mubr.bf16.mxu0 %v7559_v33 }
 0x157   : > { %v5161_v54 = vpop.f32.mrf.mxu0  ;;  %v6221_v56 = vpop.f32.mrf.mxu1 }
 0x159   : > { %v682_v55 = vpop.f32.mrf.mxu0  ;;  %v6223_v60 = vpop.f32.mrf.mxu1 }
 0x15b   : > { %v5162_v57 = vpop.f32.mrf.mxu0  ;;  %v6225_v63 = vpop.f32.mrf.mxu1 }
 0x15d   : > { %v685_v58 = vpop.f32.mrf.mxu0  ;;  %v6229_v2 = vpop.f32.mrf.mxu1 }
 0x15f   : > { %v5165_v62 = vpop.f32.mrf.mxu0 }
 0x161   : > { %v698_v0 = vpop.f32.mrf.mxu0 }
 0x163   : > { %v5166_v3 = vpop.f32.mrf.mxu0 }
 0x165   : > { %v6237_v7 = vpop.f32.mrf.mxu0 }
 0x167   : > { %v6231_v6 = vpop.f32.mrf.mxu1 }
 0x169   : > { %v6235_v4 = vpop.f32.mrf.mxu1 }
 0x16b   : > { %v6241_v12 = vpop.f32.mrf.mxu1 }
 0x16d   : > { %v6243_v19 = vpop.f32.mrf.mxu0  ;;  %v6245_v17 = vpop.f32.mrf.mxu1 }
 0x16f   : > { %v6249_v16 = vpop.f32.mrf.mxu0  ;;  %v5193_v20 = vpop.f32.mrf.mxu1 }
 0x170   : > { %v843_v28 = vadd.f32 %v5193_v20, %v5161_v54 }
 0x171   : > { %v6251_v11 = vpop.f32.mrf.mxu0  ;;  %v834_v24 = vpop.f32.mrf.mxu1 }
 0x172   : > { %v835_v31 = vadd.f32 %v834_v24, %v682_v55 }
 0x173   : > { %v6255_v25 = vpop.f32.mrf.mxu0  ;;  %v5194_v30 = vpop.f32.mrf.mxu1 }
 0x174   : > { %v846_v18 = vadd.f32 %v5194_v30, %v5162_v57 }
 0x175   : > { %v5225_v15 = vpop.f32.mrf.mxu0  ;;  %v837_v34 = vpop.f32.mrf.mxu1 }
 0x176   : > { %v1064_v32 = vadd.f32 %v5225_v15, %v843_v28  ;;  %v838_v38 = vadd.f32 %v837_v34, %v685_v58 }
 0x177   : > { %v983_v5 = vpop.f32.mrf.mxu0  ;;  %v5197_v37 = vpop.f32.mrf.mxu1 }
 0x178   : > { %v1090_v26 = vadd.f32 %v6262_v59, %v1064_v32  ;;  %v1062_v36 = vadd.f32 %v983_v5, %v835_v31  ;;  %v859_v47 = vadd.f32 %v5197_v37, %v5165_v62  ;;  %v6286_v32 = vpop.permute.xlu0 %1175  ;;  %v5693_v5 = vld [vmem:[%s7553_s1 + $0xc0] sm:$0xff]  }
 0x179   : > { %v5226_v14 = vpop.f32.mrf.mxu0  ;;  %v850_v9 = vpop.f32.mrf.mxu1  ;;  %7589 = vst [vmem:[#allocation4_spill] sm:$0xff] %v6286_v32  ;;  %5253 = vmatprep.subr.bf16.mxu1 %v5693_v5 }
 0x17a   : > { %v1065_v39 = vadd.f32 %v5226_v14, %v846_v18  ;;  %v1110_v43 = vmax.f32 %v1090_v26, 0.0  ;;  %v1088_v45 = vadd.f32 %v6262_v59, %v1062_v36  ;;  %v851_v52 = vadd.f32 %v850_v9, %v698_v0  ;;  %5254 = vmatpush3.bf16.msra.mxu1 %v5693_v5 }
 0x17b   : > { %v986_v46 = vpop.f32.mrf.mxu0  ;;  %v5198_v48 = vpop.f32.mrf.mxu1 }
 0x17c   : > { %v1091_v23 = vadd.f32 %v6262_v59, %v1065_v39  ;;  %v1063_v27 = vadd.f32 %v986_v46, %v838_v38  ;;  %v1230_v57 = vmul.f32 %v6239_v8, %v1110_v43  ;;  %v1108_v58 = vmax.f32 %v1088_v45, 0.0 }
 0x17d   : > { %v5229_v49 = vpop.f32.mrf.mxu0  ;;  %v853_v55 = vpop.f32.mrf.mxu1  ;;  %v862_v62 = vadd.f32 %v5198_v48, %v5166_v3 }
 0x17e   : > { %v1111_v51 = vmax.f32 %v1091_v23, 0.0  ;;  %v1089_v53 = vadd.f32 %v6262_v59, %v1063_v27  ;;  %v1068_v54 = vadd.f32 %v5229_v49, %v859_v47  ;;  %v854_v0 = vadd.f32 %v853_v55, %v6237_v7  ;;  %v6297_v7 = vpop.permute.xlu1 %1180 }
 0x17f   : > { %v999_v20 = vpop.f32.mrf.mxu0  ;;  %v5201_v31 = vpop.f32.mrf.mxu1  ;;  %v1228_v14 = vmul.f32 %v6233_v10, %v1108_v58 }
 0x180   : > { %v1231_v24 = vmul.f32 %v6247_v21, %v1111_v51  ;;  %v1109_v28 = vmax.f32 %v1089_v53, 0.0  ;;  %v1094_v30 = vadd.f32 %v6262_v59, %v1068_v54  ;;  %v1066_v15 = vadd.f32 %v999_v20, %v851_v52  ;;  %v6310_v53 = vpop.permute.xlu0 %1185 }
 0x181   : > { %v5230_v34 = vpop.f32.mrf.mxu0  ;;  %v866_v36 = vpop.f32.mrf.mxu1  ;;  %v875_v40 = vadd.f32 %v5201_v31, %v6243_v19 }
 0x182   : > { %v1114_v18 = vmax.f32 %v1094_v30, 0.0  ;;  %v1092_v3 = vadd.f32 %v6262_v59, %v1066_v15  ;;  %v1069_v26 = vadd.f32 %v5230_v34, %v862_v62  ;;  %v6293_v37 = vpack.c.bf16 %v1231_v24, %v1230_v57 }
 0x183   : > { %v1002_v38 = vpop.f32.mrf.mxu0  ;;  %v1229_v39 = vmul.f32 %v6227_v1, %v1109_v28  ;;  %v5202_v43 = vpop.f32.mrf.mxu1  ;;  %v867_v46 = vadd.f32 %v866_v36, %v6249_v16 }
 0x184   : > { %v1112_v9 = vmax.f32 %v1092_v3, 0.0  ;;  %v1095_v41 = vadd.f32 %v6262_v59, %v1069_v26  ;;  %v1067_v42 = vadd.f32 %v1002_v38, %v854_v0  ;;  %1421 = vrot.lane.b32.xlu0 %v6293_v37, %s5762_s11  ;;  %v1234_v45 = vmul.f32 %v6264_v35, %v1114_v18  ;;  %v6332_v18 = vpop.permute.xlu1 %1190 }
 0x185   : > { %v5233_v47 = vpop.f32.mrf.mxu0  ;;  %v6305_v23 = vpack.c.bf16 %v1229_v39, %v1228_v14  ;;  %v1308_v27 = vshll.u32 %v6293_v37, 16  ;;  %v878_v49 = vadd.f32 %v5202_v43, %v6251_v11  ;;  %v869_v52 = vpop.f32.mrf.mxu1  ;;  %v1305_v58 = vshrl.u32 %v6293_v37, 16  ;;  %v6322_v11 = vld [vmem:[%s7553_s1 + $0x118] sm:$0xff]   ;;  %7590 = vst [vmem:[#allocation5_spill] sm:$0xff] %v6332_v18 }
 0x186   : > { %v1115_v48 = vmax.f32 %v1095_v41, 0.0  ;;  %v1093_v19 = vadd.f32 %v6262_v59, %v1067_v42  ;;  %v1072_v51 = vadd.f32 %v5233_v47, %v875_v40  ;;  %v1232_v54 = vmul.f32 %v6253_v22, %v1112_v9  ;;  %5307 = vmatprep.subr.bf16.mxu1 %v6322_v11  ;;  %v6342_v47 = vpop.permute.xlu0 %1195 }
 0x187   : > { %1419 = vrot.lane.b32.xlu1 %v6305_v23, %s5762_s11  ;;  %v1301_v16 = vshll.u32 %v6305_v23, 16  ;;  %v1015_v55 = vpop.f32.mrf.mxu0  ;;  %v1380_v57 = vrot.slane %v1308_v27, 1  ;;  %v5205_v30 = vpop.f32.mrf.mxu1  ;;  %v870_v15 = vadd.f32 %v869_v52, %v6255_v25  ;;  %v1298_v34 = vshrl.u32 %v6305_v23, 16  ;;  %7591 = vst [vmem:[#allocation6_spill] sm:$0xff] %v6342_v47 }
 0x188   : > { %v1235_v62 = vmul.f32 %v6276_v13, %v1115_v48  ;;  %v1113_v20 = vmax.f32 %v1093_v19, 0.0  ;;  %v1098_v24 = vadd.f32 %v6262_v59, %v1072_v51  ;;  %v1070_v28 = vadd.f32 %v1015_v55, %v867_v46 }
 0x189   : > { %v891_v31 = vadd.f32 %v5205_v30, %v6221_v56  ;;  %v5234_v0 = vpop.f32.mrf.mxu0  ;;  %v1378_v5 = vrot.slane %v1301_v16, 1  ;;  %v882_v38 = vpop.f32.mrf.mxu1  ;;  %v6338_v9 = vrot.slane %v1305_v58, 7  ;;  %v1382_v40 = vor.u32 %v1380_v57, %v1305_v58 }
 0x18a   : > { %v6334_v3 = vpack.c.bf16 %v1235_v62, %v1234_v45  ;;  %v1118_v26 = vmax.f32 %v1098_v24, 0.0  ;;  %v1096_v36 = vadd.f32 %v6262_v59, %v1070_v28  ;;  %v1073_v14 = vadd.f32 %v5234_v0, %v878_v49 }
 0x18b   : > { %v1018_v25 = vpop.f32.mrf.mxu0  ;;  %v1379_v39 = vor.u32 %v1378_v5, %v1298_v34  ;;  %v1233_v56 = vmul.f32 %v6257_v44, %v1113_v20  ;;  %v883_v43 = vadd.f32 %v882_v38, %v6223_v60  ;;  %v5206_v45 = vpop.f32.mrf.mxu1  ;;  %v6348_v52 = vrot.slane %v1298_v34, 7 }
 0x18c   : > { %v1116_v41 = vmax.f32 %v1096_v36, 0.0  ;;  %v1099_v42 = vadd.f32 %v6262_v59, %v1073_v14  ;;  %v1071_v46 = vadd.f32 %v1018_v25, %v870_v15  ;;  %v1324_v51 = vshll.u32 %v6334_v3, 16  ;;  %v6357_v15 = vpop.permute.xlu1 %1200 }
 0x18d   : > { %v1381_v48 = vsel %vm464_vm0, %v1379_v39, %v1380_v57  ;;  %v5237_v19 = vpop.f32.mrf.mxu0  ;;  %v6345_v49 = vpack.c.bf16 %v1233_v56, %v1232_v54  ;;  %v1238_v55 = vmul.f32 %v6297_v7, %v1118_v26  ;;  %v885_v20 = vpop.f32.mrf.mxu1  ;;  %v894_v57 = vadd.f32 %v5206_v45, %v6225_v63  ;;  %7592 = vst [vmem:[#allocation7_spill] sm:$0xff] %v6357_v15 }
 0x18e   : > { %v1119_v58 = vmax.f32 %v1099_v42, 0.0  ;;  %v1097_v62 = vadd.f32 %v6262_v59, %v1071_v46  ;;  %1440 = vrot.lane.b32.xlu1 %v1381_v48, %s5763_s14  ;;  %v1076_v60 = vadd.f32 %v5237_v19, %v891_v31  ;;  %v1236_v24 = vmul.f32 %v6280_v50, %v1116_v41 }
 0x18f   : > { %v1031_v28 = vpop.f32.mrf.mxu0  ;;  %v1316_v54 = vshll.u32 %v6345_v49, 16  ;;  %v1313_v30 = vshrl.u32 %v6345_v49, 16  ;;  %v5209_v36 = vpop.f32.mrf.mxu1  ;;  %v886_v31 = vadd.f32 %v885_v20, %v6229_v2  ;;  %v1386_v25 = vrot.slane %v1324_v51, 1 }
 0x190   : > { %v1239_v0 = vmul.f32 %v6310_v53, %v1119_v58  ;;  %v1117_v34 = vmax.f32 %v1097_v62, 0.0  ;;  %v1102_v5 = vadd.f32 %v6262_v59, %v1076_v60  ;;  %v1074_v26 = vadd.f32 %v1031_v28, %v883_v43  ;;  %v6372_v2 = vpop.permute.xlu0 %1205 }
 0x191   : > { %v907_v14 = vadd.f32 %v5209_v36, %v6231_v6  ;;  %v5238_v38 = vpop.f32.mrf.mxu0  ;;  %v1383_v63 = vrot.slane %v1316_v54, 1  ;;  %v898_v42 = vpop.f32.mrf.mxu1  ;;  %v6370_v43 = vrot.slane %v1313_v30, 7  ;;  %7593 = vst [vmem:[#allocation8_spill] sm:$0xff] %v6372_v2  ;;  %v1321_v19 = vshrl.u32 %v6334_v3, 16 }
 0x192   : > { %v1122_v39 = vmax.f32 %v1102_v5, 0.0  ;;  %v1100_v56 = vadd.f32 %v6262_v59, %v1074_v26  ;;  %1423 = vrot.lane.b32.xlu1 %v6345_v49, %s5762_s11  ;;  %v1077_v41 = vadd.f32 %v5238_v38, %v894_v57  ;;  %v1237_v48 = vmul.f32 %v6286_v32, %v1117_v34  ;;  %v6386_v34 = vpop.permute.xlu1 %1210 }
 0x193   : > { %v1384_v6 = vsel %vm464_vm0, %v1382_v40, %v1383_v63  ;;  %v1034_v46 = vpop.f32.mrf.mxu0  ;;  %v1385_v45 = vor.u32 %v1383_v63, %v1313_v30  ;;  %v6377_v58 = vpack.c.bf16 %v1239_v0, %v1238_v55  ;;  %v5210_v57 = vpop.f32.mrf.mxu1  ;;  %v899_v5 = vadd.f32 %v898_v42, %v6235_v4  ;;  %7594 = vst [vmem:[#allocation9_spill] sm:$0xff] %v6386_v34 }
 0x194   : > { %v1120_v62 = vmax.f32 %v1100_v56, 0.0  ;;  %v1103_v60 = vadd.f32 %v6262_v59, %v1077_v41  ;;  %1442 = vrot.lane.b32.xlu0 %v1384_v6, %s5763_s14  ;;  %v1075_v20 = vadd.f32 %v1034_v46, %v886_v31  ;;  %v1242_v28 = vmul.f32 %v6357_v15, %v1122_v39 }
 0x195   : > { %v1387_v40 = vsel %vm464_vm0, %v1385_v45, %v1386_v25  ;;  %v5241_v30 = vpop.f32.mrf.mxu0  ;;  %v6384_v26 = vpack.c.bf16 %v1237_v48, %v1236_v24  ;;  %v910_v36 = vadd.f32 %v5210_v57, %v6241_v12  ;;  %v901_v38 = vpop.f32.mrf.mxu1  ;;  %v1388_v45 = vor.u32 %v1386_v25, %v1321_v19 }
 0x196   : > { %v1123_v55 = vmax.f32 %v1103_v60, 0.0  ;;  %v1101_v0 = vadd.f32 %v6262_v59, %v1075_v20  ;;  %1444 = vrot.lane.b32.xlu1 %v1387_v40, %s5763_s14  ;;  %v1080_v31 = vadd.f32 %v5241_v30, %v907_v14  ;;  %v1240_v63 = vmul.f32 %v6332_v18, %v1120_v62  ;;  %v6399_v14 = vpop.permute.xlu0 %1215 }
 0x197   : > { %v902_v4 = vadd.f32 %v901_v38, %v6245_v17  ;;  %v1047_v39 = vpop.f32.mrf.mxu0  ;;  %v1332_v56 = vshll.u32 %v6384_v26, 16  ;;  %v1329_v24 = vshrl.u32 %v6384_v26, 16  ;;  %7595 = vst [vmem:[#allocation10_spill] sm:$0xff] %v6399_v14  ;;  %v1340_v48 = vshll.u32 %v6377_v58, 16 }
 0x198   : > { %v1243_v41 = vmul.f32 %v6372_v2, %v1123_v55  ;;  %v1121_v42 = vmax.f32 %v1101_v0, 0.0  ;;  %v1106_v6 = vadd.f32 %v6262_v59, %v1080_v31  ;;  %1425 = vrot.lane.b32.xlu0 %v6334_v3, %s5762_s11  ;;  %v1078_v12 = vadd.f32 %v1047_v39, %v899_v5  ;;  %v6412_v31 = vpop.permute.xlu1 %1220 }
 0x199   : > { %v5242_v46 = vpop.f32.mrf.mxu0  ;;  %v1389_v17 = vrot.slane %v1332_v56, 1  ;;  %v1337_v62 = vshrl.u32 %v6377_v58, 16  ;;  %v1392_v55 = vrot.slane %v1340_v48, 1  ;;  %7596 = vst [vmem:[#allocation11_spill] sm:$0xff] %v6412_v31  ;;  %v1323_v39 = vrot.slane %v1321_v19, 7 }
 0x19a   : > { %v6405_v60 = vpack.c.bf16 %v1243_v41, %v1242_v28  ;;  %v1126_v20 = vmax.f32 %v1106_v6, 0.0  ;;  %v1104_v57 = vadd.f32 %v6262_v59, %v1078_v12  ;;  %v1081_v40 = vadd.f32 %v5242_v46, %v910_v36  ;;  %1427 = vrot.lane.b32.xlu1 %v6384_v26, %s5762_s11 }
 0x19b   : > { %v1050_v5 = vpop.f32.mrf.mxu0  ;;  %v1390_v30 = vsel %vm464_vm0, %v1388_v45, %v1389_v17  ;;  %v1391_v25 = vor.u32 %v1389_v17, %v1329_v24  ;;  %v1241_v0 = vmul.f32 %v6342_v47, %v1121_v42  ;;  %v1331_v41 = vrot.slane %v1329_v24, 7 }
 0x19c   : > { %v1107_v38 = vadd.f32 %v6262_v59, %v1081_v40  ;;  %v1079_v28 = vadd.f32 %v1050_v5, %v902_v4  ;;  %1446 = vrot.lane.b32.xlu0 %v1390_v30, %s5763_s14  ;;  %v1246_v36 = vmul.f32 %v6412_v31, %v1126_v20  ;;  %v1124_v6 = vmax.f32 %v1104_v57, 0.0  ;;  %v6421_v40 = vpop.permute.xlu0 %1225 }
 0x19d   : > { %v1393_v12 = vsel %vm464_vm0, %v1391_v25, %v1392_v55  ;;  %v1254_v46 = vpack.c.bf16 %v1241_v0, %v1240_v63  ;;  %v1339_v42 = vrot.slane %v1337_v62, 7  ;;  %v1356_v33 = vshll.u32 %v6405_v60, 16  ;;  %7597 = vst [vmem:[#allocation12_spill] sm:$0xff] %v6421_v40 }
 0x19e   : > { %v1127_v45 = vmax.f32 %v1107_v38, 0.0  ;;  %v1105_v17 = vadd.f32 %v6262_v59, %v1079_v28  ;;  %1448 = vrot.lane.b32.xlu1 %v1393_v12, %s5763_s14  ;;  %v1353_v24 = vshrl.u32 %v6405_v60, 16  ;;  %v1310_v20 = vor.u32 %v1308_v27, %v6338_v9 }
 0x19f   : > { %v1348_v19 = vshll.u32 %v1254_v46, 16  ;;  %v1345_v4 = vshrl.u32 %v1254_v46, 16  ;;  %v1394_v59 = vor.u32 %v1392_v55, %v1337_v62  ;;  %v1303_v5 = vor.u32 %v1301_v16, %v6348_v52 }
 0x1a0   : > { %v1247_v63 = vmul.f32 %v6421_v40, %v1127_v45  ;;  %v1125_v57 = vmax.f32 %v1105_v17, 0.0  ;;  %1429 = vrot.lane.b32.xlu0 %v6377_v58, %s5762_s11  ;;  %v1244_v30 = vmul.f32 %v6386_v34, %v1124_v6  ;;  %v1398_v0 = vrot.slane %v1356_v33, 1 }
 0x1a1   : > { %v1395_v25 = vrot.slane %v1348_v19, 1  ;;  %v1311_v38 = vsel %vm380_vm1, %v6348_v52, %v1310_v20  ;;  %v1347_v27 = vrot.slane %v1345_v4, 7  ;;  %v1355_v12 = vrot.slane %v1353_v24, 7 }
 0x1a2   : > { %v1257_v37 = vpack.c.bf16 %v1247_v63, %v1246_v36  ;;  %1431 = vrot.lane.b32.xlu1 %v1254_v46, %s5762_s11  ;;  %v1245_v28 = vmul.f32 %v6399_v14, %v1125_v57  ;;  %v1318_v23 = vor.u32 %v1316_v54, %v6370_v43  ;;  %v1326_v16 = vor.u32 %v1324_v51, %v1323_v39 }
 0x1a3   : > { %v1396_v58 = vsel %vm464_vm0, %v1394_v59, %v1395_v25  ;;  %v1397_v62 = vor.u32 %v1395_v25, %v1345_v4  ;;  %v1334_v36 = vor.u32 %v1332_v56, %v1331_v41  ;;  %v1342_v49 = vor.u32 %v1340_v48, %v1339_v42 }
 0x1a4   : > { %1450 = vrot.lane.b32.xlu0 %v1396_v58, %s5763_s14  ;;  %v1256_v52 = vpack.c.bf16 %v1245_v28, %v1244_v30  ;;  %v1369_v55 = vshrl.u32 %v1257_v37, 16  ;;  %v1319_v46 = vsel %vm380_vm1, %v6338_v9, %v1318_v23  ;;  %v1327_v45 = vsel %vm380_vm1, %v6370_v43, %v1326_v16 }
 0x1a5   : > { %v1399_v6 = vsel %vm464_vm0, %v1397_v62, %v1398_v0  ;;  %v1372_v54 = vshll.u32 %v1257_v37, 16  ;;  %v1335_v4 = vsel %vm380_vm1, %v1323_v39, %v1334_v36  ;;  %v6455_v26 = vsel %vm380_vm1, %v1331_v41, %v1342_v49 }
 0x1a6   : > { %1452 = vrot.lane.b32.xlu1 %v1399_v6, %s5763_s14  ;;  %v1364_v3 = vshll.u32 %v1256_v52, 16  ;;  %v1361_v51 = vshrl.u32 %v1256_v52, 16  ;;  %v1371_v17 = vrot.slane %v1369_v55, 7  ;;  %v1350_v56 = vor.u32 %v1348_v19, %v1347_v27 }
 0x1a7   : > { %v1358_v20 = vor.u32 %v1356_v33, %v1355_v12  ;;  %v1400_v9 = vor.u32 %v1398_v0, %v1353_v24  ;;  %v1404_v19 = vrot.slane %v1372_v54, 1 }
 0x1a8   : > { %1433 = vrot.lane.b32.xlu0 %v6405_v60, %s5762_s11  ;;  %v1401_v63 = vrot.slane %v1364_v3, 1  ;;  %v1363_v43 = vrot.slane %v1361_v51, 7  ;;  %v1374_v48 = vor.u32 %v1372_v54, %v1371_v17  ;;  %v6460_v57 = vsel %vm380_vm1, %v1339_v42, %v1350_v56  ;;  %v5697_v54 = vld [vmem:[%s7553_s1 + $0x100] sm:$0xff]  }
 0x1a9   : > { %v6463_v59 = vsel %vm380_vm1, %v1347_v27, %v1358_v20  ;;  %v1406_v24 = vor.u32 %v1404_v19, %v1369_v55  ;;  %v1377_v27 = vsel %vm6079_vm6, 0, %v1303_v5  ;;  %v5695_v5 = vld [vmem:[%s7553_s1 + $0x110] sm:$0xff]  }
 0x1aa   : > { %1435 = vrot.lane.b32.xlu1 %v1256_v52, %s5762_s11  ;;  %v1402_v39 = vsel %vm464_vm0, %v1400_v9, %v1401_v63  ;;  %v1403_v41 = vor.u32 %v1401_v63, %v1361_v51  ;;  %v1366_v33 = vor.u32 %v1364_v3, %v1363_v43  ;;  %v6468_v30 = vsel %vm380_vm1, %v1363_v43, %v1374_v48 }
 0x1ab   : > { %v1408_v25 = vsel %vm5995_vm3, %v1406_v24, 0 }
 0x1ac   : > { %1454 = vrot.lane.b32.xlu0 %v1402_v39, %s5763_s14  ;;  %v1405_v60 = vsel %vm464_vm0, %v1403_v41, %v1404_v19  ;;  %v6473_v42 = vsel %vm380_vm1, %v1355_v12, %v1366_v33  ;;  %v5699_v39 = vld [vmem:[%s7553_s1 + $0xf0] sm:$0xff]  }
 0x1ae   : > { %1456 = vrot.lane.b32.xlu1 %v1405_v60, %s5763_s14 }
 0x1b0   : > { %1437 = vrot.lane.b32.xlu0 %v1257_v37, %s5762_s11 }
 0x1b4   : > { %1458 = vrot.lane.b32.xlu0 %v1408_v25, %s5763_s14 }
 0x1f6   : > { %v1422_v62 = vpop.permute.xlu0 %1421 }
 0x1f7   : > { %v1465_v23 = vsel %vm539_vm5, %v1311_v38, %v1422_v62 }
 0x1f9   : > { %v1420_v0 = vpop.permute.xlu1 %1419 }
 0x1fa   : > { %v1462_v28 = vsel %vm539_vm5, %v1377_v27, %v1420_v0 }
 0x200   : > { %v1441_v58 = vpop.permute.xlu1 %1440 }
 0x201   : > { %v1491_v12 = vsel %vm570_vm7, %v1462_v28, %v1441_v58 }
 0x202   : > { %5255 = vmatprep.mubr.msk.bf16.mxu1 %vm627_vm8, %v1491_v12  ;;  %5288 = vmatmul.mubr.msk.bf16.vlgmr.msra.gmra.mxu0 %vm627_vm8, %v1491_v12 }
 0x204   : > { %v1424_v37 = vpop.permute.xlu1 %1423 }
 0x205   : > { %v1468_v55 = vsel %vm539_vm5, %v1319_v46, %v1424_v37  ;;  %v5696_v46 = vld [vmem:[%s7553_s1 + $0x108] sm:$0xff]   ;;  %v5701_v37 = vld [vmem:[%s7553_s1 + $0x170] sm:$0xff]  }
 0x206   : > { %v1443_v16 = vpop.permute.xlu0 %1442 }
 0x207   : > { %v6488_v52 = vsel %vm570_vm7, %v1465_v23, %v1443_v16  ;;  %v5702_v23 = vld [vmem:[%s7553_s1 + $0x148] sm:$0xff]   ;;  %v5704_v16 = vld [vmem:[%s7553_s1 + $0x140] sm:$0xff]  }
 0x208   : > { %5256 = vmatmul.mubr.msk.bf16.vlgmr.msra.gmra.mxu1 %vm627_vm8, %v6488_v52  ;;  %5291 = vmatprep.mubr.msk.bf16.mxu0 %vm627_vm8, %v6488_v52  ;;  %v1445_v36 = vpop.permute.xlu1 %1444 }
 0x209   : > { %5308 = vmatpush3.bf16.msra.mxu1 %v6322_v11  ;;  %v1495_v38 = vsel %vm570_vm7, %v1468_v55, %v1445_v36  ;;  %v5706_v55 = vld [vmem:[%s7553_s1 + $0x160] sm:$0xff]   ;;  %v5707_v36 = vld [vmem:[%s7553_s1 + $0x130] sm:$0xff]  }
 0x20a   : > { %v1426_v6 = vpop.permute.xlu0 %1425  ;;  %5259 = vmatprep.mubr.msk.bf16.mxu1 %vm627_vm8, %v1495_v38  ;;  %5292 = vmatmul.mubr.msk.bf16.gmra.mxu0 %vm627_vm8, %v1495_v38 }
 0x20b   : > { %5309 = vmatprep.subr.bf16.mxu1 %v5695_v5  ;;  %v1471_v3 = vsel %vm539_vm5, %v1327_v45, %v1426_v6  ;;  %v5698_v45 = vld [vmem:[%s7553_s1 + $0xf8] sm:$0xff]  }
 0x20c   : > { %v1428_v49 = vpop.permute.xlu1 %1427 }
 0x20d   : > { %5310 = vmatpush3.bf16.msra.mxu1 %v5695_v5  ;;  %v1474_v17 = vsel %vm539_vm5, %v1335_v4, %v1428_v49  ;;  %v5705_v5 = vld [vmem:[%s7553_s1 + $0x138] sm:$0xff]  }
 0x20e   : > { %v1447_v51 = vpop.permute.xlu0 %1446  ;;  %5311 = vmatprep.subr.bf16.mxu1 %v5696_v46 }
 0x20f   : > { %v1497_v11 = vsel %vm570_vm7, %v1471_v3, %v1447_v51 }
 0x210   : > { %5260 = vmatmul.mubr.msk.bf16.gmra.mxu1 %vm627_vm8, %v1497_v11  ;;  %5295 = vmatprep.mubr.msk.bf16.mxu0 %vm627_vm8, %v1497_v11  ;;  %v1449_v56 = vpop.permute.xlu1 %1448 }
 0x211   : > { %v1499_v20 = vsel %vm570_vm7, %v1474_v17, %v1449_v56  ;;  %5312 = vmatpush3.bf16.msra.mxu1 %v5696_v46 }
 0x212   : > { %v1430_v9 = vpop.permute.xlu0 %1429  ;;  %5263 = vmatprep.mubr.msk.bf16.mxu1 %vm627_vm8, %v1499_v20  ;;  %5296 = vmatmul.mubr.msk.bf16.gmra.mxu0 %vm627_vm8, %v1499_v20 }
 0x213   : > { %5313 = vmatprep.subr.bf16.mxu1 %v5697_v54  ;;  %v1477_v4 = vsel %vm539_vm5, %v6455_v26, %v1430_v9 }
 0x214   : > { %v1432_v63 = vpop.permute.xlu1 %1431 }
 0x215   : > { %5314 = vmatpush3.bf16.msra.mxu1 %v5697_v54  ;;  %v1480_v41 = vsel %vm539_vm5, %v6460_v57, %v1432_v63 }
 0x216   : > { %v1451_v43 = vpop.permute.xlu0 %1450  ;;  %5315 = vmatprep.subr.bf16.mxu1 %v5698_v45 }
 0x217   : > { %v1501_v48 = vsel %vm570_vm7, %v1477_v4, %v1451_v43 }
 0x218   : > { %v1453_v19 = vpop.permute.xlu1 %1452  ;;  %5264 = vmatmul.mubr.msk.bf16.gmra.mxu1 %vm627_vm8, %v1501_v48  ;;  %5299 = vmatprep.mubr.msk.bf16.mxu0 %vm627_vm8, %v1501_v48 }
 0x219   : > { %v1503_v33 = vsel %vm570_vm7, %v1480_v41, %v1453_v19  ;;  %5316 = vmatpush3.bf16.msra.mxu1 %v5698_v45 }
 0x21a   : > { %v1434_v26 = vpop.permute.xlu0 %1433  ;;  %5267 = vmatprep.mubr.msk.bf16.mxu1 %vm627_vm8, %v1503_v33  ;;  %5300 = vmatmul.mubr.msk.bf16.gmra.mxu0 %vm627_vm8, %v1503_v33 }
 0x21b   : > { %5317 = vmatprep.subr.bf16.mxu1 %v5699_v39  ;;  %v1483_v24 = vsel %vm539_vm5, %v6463_v59, %v1434_v26 }
 0x21c   : > { %v1436_v60 = vpop.permute.xlu1 %1435 }
 0x21d   : > { %5318 = vmatpush3.bf16.msra.mxu1 %v5699_v39  ;;  %v1486_v0 = vsel %vm539_vm5, %v6473_v42, %v1436_v60  ;;  %v5700_v42 = vld [vmem:[%s7553_s1 + $0x178] sm:$0xff]  }
 0x21e   : > { %v1455_v57 = vpop.permute.xlu0 %1454  ;;  %5339 = vmatprep.subr.bf16.mxu0 %v5700_v42  ;;  %5371 = vmatprep.subr.bf16.mxu1 %v5702_v23 }
 0x21f   : > { %v1505_v25 = vsel %vm570_vm7, %v1483_v24, %v1455_v57  ;;  %5340 = vmatpush3.bf16.msra.mxu0 %v5700_v42 }
 0x220   : > { %v1457_v27 = vpop.permute.xlu1 %1456  ;;  %5268 = vmatmul.mubr.msk.bf16.gmra.mxu1 %vm627_vm8, %v1505_v25  ;;  %5303 = vmatprep.mubr.msk.bf16.mxu0 %vm627_vm8, %v1505_v25 }
 0x221   : > { %v1507_v28 = vsel %vm570_vm7, %v1486_v0, %v1457_v27  ;;  %5341 = vmatprep.subr.bf16.mxu0 %v5701_v37 }
 0x222   : > { %v1438_v58 = vpop.permute.xlu0 %1437  ;;  %5271 = vmatprep.mubr.msk.bf16.mxu1 %vm627_vm8, %v1507_v28  ;;  %5304 = vmatmul.mubr.msk.bf16.gmra.mxu0 %vm627_vm8, %v1507_v28 }
 0x223   : > { %v1489_v59 = vsel %vm539_vm5, %v6468_v30, %v1438_v58  ;;  %v7598_v30 = vmov 0   ;;  %5342 = vmatpush3.bf16.msra.mxu0 %v5701_v37 }
 0x226   : > { %v1459_v12 = vpop.permute.xlu0 %1458 }
 0x227   : > { %v1509_v62 = vsel %vm570_vm7, %v1489_v59, %v1459_v12 }
 0x228   : > { %5272 = vmatmul.mubr.msk.bf16.gmra.mxu1 %vm627_vm8, %v1509_v62 }
 0x229   : > { %5319 = vmatprep.mubr.msk.bf16.mxu1 %vm627_vm8, %v6488_v52  ;;  %v5703_v52 = vld [vmem:[%s7553_s1 + $0x168] sm:$0xff]  }
 0x22a   : > { %5343 = vmatprep.subr.bf16.mxu0 %v5703_v52 }
 0x22b   : > { %5344 = vmatpush3.bf16.msra.mxu0 %v5703_v52 }
 0x22c   : > { %5345 = vmatprep.subr.bf16.mxu0 %v5706_v55 }
 0x22f   : > { %5346 = vmatpush3.bf16.msra.mxu0 %v5706_v55 }
 0x230   : > { %5320 = vmatmul.mubr.msk.bf16.vlgmr.msra.gmra.mxu1 %vm627_vm8, %v1495_v38 }
 0x231   : > { %5323 = vmatprep.mubr.msk.bf16.mxu1 %vm627_vm8, %v1497_v11  ;;  %5372 = vmatpush3.bf16.msra.mxu1 %v5702_v23 }
 0x232   : > { %5373 = vmatprep.subr.bf16.mxu1 %v5704_v16 }
 0x235   : > { %5374 = vmatpush3.bf16.msra.mxu1 %v5704_v16 }
 0x236   : > { %5375 = vmatprep.subr.bf16.mxu1 %v5705_v5 }
 0x238   : > { %5324 = vmatmul.mubr.msk.bf16.gmra.mxu1 %vm627_vm8, %v1499_v20 }
 0x239   : > { %5327 = vmatprep.mubr.msk.bf16.mxu1 %vm627_vm8, %v1501_v48  ;;  %5376 = vmatpush3.bf16.msra.mxu1 %v5705_v5  ;;  %v6595_v5 = vld [vmem:[%s7554_s2 + $0x1] ss:$0 sm:$0xff] }
 0x23a   : > { %5377 = vmatprep.subr.bf16.mxu1 %v5707_v36 }
 0x23d   : > { %5378 = vmatpush3.bf16.msra.mxu1 %v5707_v36 }
 0x240   : > { %5328 = vmatmul.mubr.msk.bf16.gmra.mxu1 %vm627_vm8, %v1503_v33 }
 0x241   : > { %5331 = vmatprep.mubr.msk.bf16.mxu1 %vm627_vm8, %v1505_v25 }
 0x248   : > { %5332 = vmatmul.mubr.msk.bf16.gmra.mxu1 %vm627_vm8, %v1507_v28 }
 0x249   : > { %5335 = vmatprep.mubr.msk.bf16.mxu1 %vm627_vm8, %v1509_v62 }
 0x250   : > { %5336 = vmatmul.mubr.bf16.gmra.mxu1 %v7598_v30 }
 0x251   : > { %5383 = vmatprep.mubr.bf16.mxu1 %v7598_v30 }
 0x2c2   : > { %v5289_v38 = vpop.f32.mrf.mxu0 }
 0x2c4   : > { %v1749_v6 = vpop.f32.mrf.mxu0 }
 0x2c6   : > { %v5290_v46 = vpop.f32.mrf.mxu0 }
 0x2c8   : > { %v5257_v49 = vpop.f32.mrf.mxu1  ;;  %v1752_v3 = vpop.f32.mrf.mxu0 }
 0x2c9   : > { %v1758_v37 = vadd.f32 %v5289_v38, %v5257_v49  ;;  %v5708_v38 = vld [vmem:[%s7553_s1 + $0x158] sm:$0xff]   ;;  %v5710_v49 = vld [vmem:[%s7553_s1 + $0x120] sm:$0xff]  }
 0x2ca   : > { %v1600_v51 = vpop.f32.mrf.mxu1  ;;  %v5293_v11 = vpop.f32.mrf.mxu0  ;;  %5347 = vmatprep.subr.bf16.mxu0 %v5708_v38 }
 0x2cb   : > { %v1750_v52 = vadd.f32 %v1749_v6, %v1600_v51  ;;  %v5709_v6 = vld [vmem:[%s7553_s1 + $0x128] sm:$0xff]   ;;  %5348 = vmatpush3.bf16.msra.mxu0 %v5708_v38 }
 0x2cc   : > { %v5258_v54 = vpop.f32.mrf.mxu1  ;;  %v1765_v17 = vpop.f32.mrf.mxu0  ;;  %5379 = vmatprep.subr.bf16.mxu1 %v5709_v6 }
 0x2cd   : > { %v1761_v30 = vadd.f32 %v5290_v46, %v5258_v54  ;;  %5380 = vmatpush3.bf16.msra.mxu1 %v5709_v6 }
 0x2ce   : > { %v1603_v56 = vpop.f32.mrf.mxu1  ;;  %v5294_v20 = vpop.f32.mrf.mxu0  ;;  %5381 = vmatprep.subr.bf16.mxu1 %v5710_v49 }
 0x2cf   : > { %v1753_v34 = vadd.f32 %v1752_v3, %v1603_v56 }
 0x2d0   : > { %v5261_v9 = vpop.f32.mrf.mxu1  ;;  %v1768_v63 = vpop.f32.mrf.mxu0 }
 0x2d1   : > { %v1774_v54 = vadd.f32 %v5293_v11, %v5261_v9  ;;  %5382 = vmatpush3.bf16.msra.mxu1 %v5710_v49 }
 0x2d2   : > { %v1616_v45 = vpop.f32.mrf.mxu1  ;;  %v5297_v48 = vpop.f32.mrf.mxu0 }
 0x2d4   : > { %v5262_v4 = vpop.f32.mrf.mxu1  ;;  %v1781_v19 = vpop.f32.mrf.mxu0 }
 0x2d5   : > { %v1777_v56 = vadd.f32 %v5294_v20, %v5262_v4 }
 0x2d6   : > { %v1619_v43 = vpop.f32.mrf.mxu1  ;;  %v5298_v60 = vpop.f32.mrf.mxu0 }
 0x2d8   : > { %v5265_v39 = vpop.f32.mrf.mxu1  ;;  %v1784_v25 = vpop.f32.mrf.mxu0 }
 0x2da   : > { %v1632_v41 = vpop.f32.mrf.mxu1  ;;  %v5301_v28 = vpop.f32.mrf.mxu0 }
 0x2db   : > { %v1782_v11 = vadd.f32 %v1781_v19, %v1632_v41  ;;  %v5711_v19 = vld [vmem:[%s7553_s1 + $0x150] sm:$0xff]  }
 0x2dc   : > { %v5266_v33 = vpop.f32.mrf.mxu1  ;;  %v1797_v12 = vpop.f32.mrf.mxu0  ;;  %5349 = vmatprep.subr.bf16.mxu0 %v5711_v19 }
 0x2dd   : > { %v6610_v9 = vadd.f32 %v5298_v60, %v5266_v33  ;;  %5350 = vmatpush3.bf16.msra.mxu0 %v5711_v19 }
 0x2de   : > { %v1635_v26 = vpop.f32.mrf.mxu1  ;;  %v5302_v23 = vpop.f32.mrf.mxu0 }
 0x2e0   : > { %v5269_v24 = vpop.f32.mrf.mxu1  ;;  %v1800_v61 = vpop.f32.mrf.mxu0 }
 0x2e1   : > { %v6616_v4 = vadd.f32 %v5301_v28, %v5269_v24 }
 0x2e2   : > { %v1648_v57 = vpop.f32.mrf.mxu1 }
 0x2e4   : > { %v5270_v0 = vpop.f32.mrf.mxu1 }
 0x2e6   : > { %v6582_v27 = vpop.f32.mrf.mxu1 }
 0x2e7   : > { %v6629_v60 = vadd.f32 %v1800_v61, %v6582_v27 }
 0x2e8   : > { %v6584_v58 = vpop.f32.mrf.mxu1 }
 0x2ea   : > { %v6586_v59 = vpop.f32.mrf.mxu1 }
 0x2ec   : > { %v6588_v62 = vpop.f32.mrf.mxu1 }
 0x2ee   : > { %v6590_v42 = vpop.f32.mrf.mxu1 }
 0x2f0   : > { %v5321_v16 = vpop.f32.mrf.mxu1 }
 0x2f1   : > { %v1979_v55 = vadd.f32 %v5321_v16, %v1758_v37  ;;  %v5305_v37 = vpop.f32.mrf.mxu0  ;;  %v1769_v16 = vadd.f32 %v1768_v63, %v1619_v43  ;;  %v6618_v43 = vadd.f32 %v1797_v12, %v1648_v57 }
 0x2f2   : > { %v1898_v36 = vpop.f32.mrf.mxu1  ;;  %v6632_v24 = vadd.f32 %v5305_v37, %v6584_v58 }
 0x2f3   : > { %v1977_v29 = vadd.f32 %v1898_v36, %v1750_v52  ;;  %v2005_v14 = vadd.f32 %v6595_v5, %v1979_v55  ;;  %v1790_v36 = vadd.f32 %v5297_v48, %v5265_v39  ;;  %v6620_v48 = vadd.f32 %v5302_v23, %v5270_v0 }
 0x2f4   : > { %v5322_v40 = vpop.f32.mrf.mxu1 }
 0x2f5   : > { %v1980_v31 = vadd.f32 %v5322_v40, %v1761_v30  ;;  %v2003_v46 = vadd.f32 %v6595_v5, %v1977_v29  ;;  %v1766_v30 = vadd.f32 %v1765_v17, %v1616_v45  ;;  %v2025_v52 = vmax.f32 %v2005_v14, 0.0  ;;  %v1813_v17 = vpop.f32.mrf.mxu0 }
 0x2f6   : > { %v1901_v51 = vpop.f32.mrf.mxu1  ;;  %v6636_v12 = vadd.f32 %v1813_v17, %v6586_v59 }
 0x2f7   : > { %v2006_v3 = vadd.f32 %v6595_v5, %v1980_v31  ;;  %v1978_v40 = vadd.f32 %v1901_v51, %v1753_v34  ;;  %v6612_v31 = vadd.f32 %v1784_v25, %v1635_v26  ;;  %v2023_v34 = vmax.f32 %v2003_v46, 0.0  ;;  %v5306_v28 = vpop.f32.mrf.mxu0 }
 0x2f8   : > { %v5325_v55 = vpop.f32.mrf.mxu1  ;;  %v2045_v39 = vmul.f32 %v2025_v52, %v6239_v8  ;;  %v6640_v61 = vadd.f32 %v5306_v28, %v6588_v62  ;;  %v6652_v52 = vld [vmem:[%s7553_s1 + $0x1a8] sm:$0xff]  }
 0x2f9   : > { %v2026_v47 = vmax.f32 %v2006_v3, 0.0  ;;  %v2004_v2 = vadd.f32 %v6595_v5, %v1978_v40  ;;  %v1983_v29 = vadd.f32 %v5325_v55, %v1774_v54  ;;  %v2043_v57 = vmul.f32 %v2023_v34, %v6233_v10  ;;  %5403 = vmatprep.subr.bf16.mxu0 %v6652_v52 }
 0x2fa   : > { %v1914_v51 = vpop.f32.mrf.mxu1 }
 0x2fb   : > { %v2046_v20 = vmul.f32 %v2026_v47, %v6247_v21  ;;  %v2024_v14 = vmax.f32 %v2004_v2, 0.0  ;;  %v2009_v45 = vadd.f32 %v6595_v5, %v1983_v29  ;;  %v1981_v63 = vadd.f32 %v1914_v51, %v1766_v30 }
 0x2fc   : > { %v5326_v41 = vpop.f32.mrf.mxu1 }
 0x2fd   : > { %v2044_v47 = vmul.f32 %v2024_v14, %v6227_v1  ;;  %v2029_v2 = vmax.f32 %v2009_v45, 0.0  ;;  %v2007_v33 = vadd.f32 %v6595_v5, %v1981_v63  ;;  %v1984_v26 = vadd.f32 %v5326_v41, %v1777_v56 }
 0x2fe   : > { %v1917_v25 = vpop.f32.mrf.mxu1  ;;  %v2064_v0 = vpack.c.bf16 %v2046_v20, %v2045_v39 }
 0x2ff   : > { %v2027_v23 = vmax.f32 %v2007_v33, 0.0  ;;  %v2010_v38 = vadd.f32 %v6595_v5, %v1984_v26  ;;  %v1982_v6 = vadd.f32 %v1917_v25, %v1769_v16  ;;  %v2063_v58 = vpack.c.bf16 %v2044_v47, %v2043_v57  ;;  %v1816_v47 = vpop.f32.mrf.mxu0 }
 0x300   : > { %2236 = vrot.lane.b32.xlu0 %v2064_v0, %s5762_s11  ;;  %v5329_v27 = vpop.f32.mrf.mxu1  ;;  %v2123_v49 = vshll.u32 %v2064_v0, 16  ;;  %v2120_v46 = vshrl.u32 %v2064_v0, 16  ;;  %v2049_v54 = vmul.f32 %v2029_v2, %v6264_v35  ;;  %v6669_v25 = vadd.f32 %v1816_v47, %v6590_v42 }
 0x301   : > { %v2030_v37 = vmax.f32 %v2010_v38, 0.0  ;;  %v2008_v59 = vadd.f32 %v6595_v5, %v1982_v6  ;;  %v1987_v3 = vadd.f32 %v5329_v27, %v1790_v36  ;;  %v2047_v40 = vmul.f32 %v2027_v23, %v6253_v22  ;;  %2234 = vrot.lane.b32.xlu1 %v2063_v58, %s5762_s11 }
 0x302   : > { %v2116_v30 = vshll.u32 %v2063_v58, 16  ;;  %v1930_v56 = vpop.f32.mrf.mxu1  ;;  %v2113_v62 = vshrl.u32 %v2063_v58, 16  ;;  %v6647_v16 = vrot.slane %v2120_v46, 7  ;;  %v2195_v20 = vrot.slane %v2123_v49, 1 }
 0x303   : > { %v2050_v55 = vmul.f32 %v2030_v37, %v6276_v13  ;;  %v2028_v29 = vmax.f32 %v2008_v59, 0.0  ;;  %v2013_v34 = vadd.f32 %v6595_v5, %v1987_v3  ;;  %v1985_v36 = vadd.f32 %v1930_v56, %v1782_v11 }
 0x304   : > { %v5330_v51 = vpop.f32.mrf.mxu1  ;;  %v2193_v17 = vrot.slane %v2116_v30, 1  ;;  %v2115_v14 = vrot.slane %v2113_v62, 7  ;;  %v2125_v45 = vor.u32 %v2123_v49, %v6647_v16  ;;  %v2197_v37 = vor.u32 %v2195_v20, %v2120_v46 }
 0x305   : > { %v6658_v63 = vpack.c.bf16 %v2050_v55, %v2049_v54  ;;  %v2048_v39 = vmul.f32 %v2028_v29, %v6257_v44  ;;  %v2033_v41 = vmax.f32 %v2013_v34, 0.0  ;;  %v2011_v19 = vadd.f32 %v6595_v5, %v1985_v36 }
 0x306   : > { %v1988_v2 = vadd.f32 %v5330_v51, %v6610_v9  ;;  %v1933_v33 = vpop.f32.mrf.mxu1  ;;  %v2194_v11 = vor.u32 %v2193_v17, %v2113_v62  ;;  %v6664_v26 = vsel %vm380_vm1, %v2115_v14, %v2125_v45  ;;  %v6666_v57 = vor.u32 %v2116_v30, %v2115_v14 }
 0x307   : > { %v2031_v0 = vmax.f32 %v2011_v19, 0.0  ;;  %v1986_v28 = vadd.f32 %v1933_v33, %v6612_v31  ;;  %v2065_v23 = vpack.c.bf16 %v2048_v39, %v2047_v40  ;;  %v2139_v9 = vshll.u32 %v6658_v63, 16 }
 0x308   : > { %v2014_v38 = vadd.f32 %v6595_v5, %v1988_v2  ;;  %v2196_v6 = vsel %vm464_vm0, %v2194_v11, %v2195_v20  ;;  %v5333_v27 = vpop.f32.mrf.mxu1  ;;  %v2136_v58 = vshrl.u32 %v6658_v63, 16  ;;  %v2053_v31 = vmul.f32 %v2033_v41, %v6297_v7 }
 0x309   : > { %v2012_v49 = vadd.f32 %v6595_v5, %v1986_v28  ;;  %2255 = vrot.lane.b32.xlu1 %v2196_v6, %s5763_s14  ;;  %v1991_v42 = vadd.f32 %v5333_v27, %v6616_v4  ;;  %v2131_v54 = vshll.u32 %v2065_v23, 16  ;;  %v2128_v40 = vshrl.u32 %v2065_v23, 16 }
 0x30a   : > { %v2034_v59 = vmax.f32 %v2014_v38, 0.0  ;;  %v1946_v3 = vpop.f32.mrf.mxu1  ;;  %v2201_v30 = vrot.slane %v2139_v9, 1  ;;  %v2051_v34 = vmul.f32 %v2031_v0, %v6280_v50  ;;  %v6688_v51 = vrot.slane %v2136_v58, 7 }
 0x30b   : > { %v2032_v56 = vmax.f32 %v2012_v49, 0.0  ;;  %v2017_v62 = vadd.f32 %v6595_v5, %v1991_v42  ;;  %v1989_v55 = vadd.f32 %v1946_v3, %v6618_v43  ;;  %v2198_v29 = vrot.slane %v2131_v54, 1  ;;  %v7599_v3 = vld [vmem:[#allocation8_spill] sm:$0xff] }
 0x30c   : > { %v2054_v4 = vmul.f32 %v2034_v59, %v6310_v53  ;;  %v5334_v36 = vpop.f32.mrf.mxu1  ;;  %v6686_v46 = vrot.slane %v2128_v40, 7  ;;  %v2203_v0 = vor.u32 %v2201_v30, %v2136_v58 }
 0x30d   : > { %v2052_v17 = vmul.f32 %v2032_v56, %v6286_v32  ;;  %v2037_v20 = vmax.f32 %v2017_v62, 0.0  ;;  %v2015_v14 = vadd.f32 %v6595_v5, %v1989_v55  ;;  %2238 = vrot.lane.b32.xlu1 %v2065_v23, %s5762_s11  ;;  %v1992_v45 = vadd.f32 %v5334_v36, %v6620_v48 }
 0x30e   : > { %v6694_v43 = vpack.c.bf16 %v2054_v4, %v2053_v31  ;;  %v2199_v39 = vsel %vm464_vm0, %v2197_v37, %v2198_v29  ;;  %v1949_v41 = vpop.f32.mrf.mxu1  ;;  %v2200_v19 = vor.u32 %v2198_v29, %v2128_v40  ;;  %v2133_v47 = vor.u32 %v2131_v54, %v6686_v46 }
 0x30f   : > { %v2035_v2 = vmax.f32 %v2015_v14, 0.0  ;;  %v2018_v33 = vadd.f32 %v6595_v5, %v1992_v45  ;;  %2257 = vrot.lane.b32.xlu0 %v2199_v39, %s5763_s14  ;;  %v1990_v11 = vadd.f32 %v1949_v41, %v6629_v60  ;;  %v2067_v48 = vpack.c.bf16 %v2052_v17, %v2051_v34  ;;  %v7600_v17 = vld [vmem:[#allocation6_spill] sm:$0xff] }
 0x310   : > { %v2202_v28 = vsel %vm464_vm0, %v2200_v19, %v2201_v30  ;;  %v5337_v23 = vpop.f32.mrf.mxu1  ;;  %v2155_v38 = vshll.u32 %v6694_v43, 16  ;;  %v2152_v6 = vshrl.u32 %v6694_v43, 16  ;;  %v2057_v27 = vmul.f32 %v2037_v20, %v6357_v15 }
 0x311   : > { %v2038_v49 = vmax.f32 %v2018_v33, 0.0  ;;  %v2016_v42 = vadd.f32 %v6595_v5, %v1990_v11  ;;  %2259 = vrot.lane.b32.xlu1 %v2202_v28, %s5763_s14  ;;  %v1995_v54 = vadd.f32 %v5337_v23, %v6632_v24  ;;  %v2055_v60 = vmul.f32 %v2035_v2, %v6332_v18 }
 0x312   : > { %v1962_v58 = vpop.f32.mrf.mxu1  ;;  %v2147_v37 = vshll.u32 %v2067_v48, 16  ;;  %v2144_v31 = vshrl.u32 %v2067_v48, 16  ;;  %v2207_v59 = vrot.slane %v2155_v38, 1  ;;  %v2154_v24 = vrot.slane %v2152_v6, 7 }
 0x313   : > { %v2058_v40 = vmul.f32 %v2038_v49, %v7599_v3  ;;  %v2036_v30 = vmax.f32 %v2016_v42, 0.0  ;;  %v2021_v56 = vadd.f32 %v6595_v5, %v1995_v54  ;;  %2240 = vrot.lane.b32.xlu0 %v6658_v63, %s5762_s11  ;;  %v1993_v62 = vadd.f32 %v1962_v58, %v6636_v12  ;;  %v7602_v42 = vld [vmem:[#allocation9_spill] sm:$0xff] }
 0x314   : > { %v5338_v55 = vpop.f32.mrf.mxu1  ;;  %v2204_v29 = vrot.slane %v2147_v37, 1  ;;  %v2146_v34 = vrot.slane %v2144_v31, 7  ;;  %v6716_v4 = vsel %vm380_vm1, %v6647_v16, %v2133_v47  ;;  %v2141_v2 = vor.u32 %v2139_v9, %v6688_v51 }
 0x315   : > { %v2070_v36 = vpack.c.bf16 %v2058_v40, %v2057_v27  ;;  %v2056_v20 = vmul.f32 %v2036_v30, %v7600_v17  ;;  %v2041_v14 = vmax.f32 %v2021_v56, 0.0  ;;  %v2019_v45 = vadd.f32 %v6595_v5, %v1993_v62  ;;  %2242 = vrot.lane.b32.xlu1 %v2067_v48, %s5762_s11 }
 0x316   : > { %v1996_v39 = vadd.f32 %v5338_v55, %v6640_v61  ;;  %v2205_v12 = vsel %vm464_vm0, %v2203_v0, %v2204_v29  ;;  %v1965_v41 = vpop.f32.mrf.mxu1  ;;  %v2206_v19 = vor.u32 %v2204_v29, %v2144_v31  ;;  %v2209_v11 = vor.u32 %v2207_v59, %v2152_v6  ;;  %v7601_v0 = vld [vmem:[#allocation11_spill] sm:$0xff]  ;;  %v7604_v29 = vld [vmem:[#allocation10_spill] sm:$0xff] }
 0x317   : > { %v2039_v16 = vmax.f32 %v2019_v45, 0.0  ;;  %2261 = vrot.lane.b32.xlu0 %v2205_v12, %s5763_s14  ;;  %v1994_v47 = vadd.f32 %v1965_v41, %v6669_v25  ;;  %v2069_v33 = vpack.c.bf16 %v2056_v20, %v2055_v60  ;;  %v2171_v61 = vshll.u32 %v2070_v36, 16 }
 0x318   : > { %v2022_v28 = vadd.f32 %v6595_v5, %v1996_v39  ;;  %v2208_v23 = vsel %vm464_vm0, %v2206_v19, %v2207_v59  ;;  %v2168_v48 = vshrl.u32 %v2070_v36, 16  ;;  %v2061_v27 = vmul.f32 %v2041_v14, %v7601_v0 }
 0x319   : > { %v2020_v49 = vadd.f32 %v6595_v5, %v1994_v47  ;;  %2263 = vrot.lane.b32.xlu1 %v2208_v23, %s5763_s14  ;;  %v2163_v63 = vshll.u32 %v2069_v33, 16  ;;  %v2160_v9 = vshrl.u32 %v2069_v33, 16  ;;  %v2059_v54 = vmul.f32 %v2039_v16, %v7602_v42  ;;  %v7603_v5 = vld [vmem:[#allocation12_spill] sm:$0xff] }
 0x31a   : > { %v2042_v58 = vmax.f32 %v2022_v28, 0.0  ;;  %v2170_v25 = vrot.slane %v2168_v48, 7  ;;  %v6736_v6 = vsel %vm380_vm1, %v6686_v46, %v2141_v2  ;;  %v2149_v40 = vor.u32 %v2147_v37, %v2146_v34 }
 0x31b   : > { %v2040_v60 = vmax.f32 %v2020_v49, 0.0  ;;  %2244 = vrot.lane.b32.xlu0 %v6694_v43, %s5762_s11  ;;  %v2210_v31 = vrot.slane %v2163_v63, 1  ;;  %v2162_v59 = vrot.slane %v2160_v9, 7  ;;  %v2213_v56 = vrot.slane %v2171_v61, 1 }
 0x31c   : > { %v2062_v30 = vmul.f32 %v2042_v58, %v7603_v5  ;;  %v2157_v62 = vor.u32 %v2155_v38, %v2154_v24  ;;  %v2173_v55 = vor.u32 %v2171_v61, %v2170_v25  ;;  %v6746_v45 = vsel %vm380_vm1, %v6688_v51, %v2149_v40 }
 0x31d   : > { %v2060_v20 = vmul.f32 %v2040_v60, %v7604_v29  ;;  %2246 = vrot.lane.b32.xlu1 %v2069_v33, %s5762_s11  ;;  %v2211_v14 = vsel %vm464_vm0, %v2209_v11, %v2210_v31  ;;  %v2212_v46 = vor.u32 %v2210_v31, %v2160_v9  ;;  %v2165_v37 = vor.u32 %v2163_v63, %v2162_v59 }
 0x31e   : > { %v2072_v43 = vpack.c.bf16 %v2062_v30, %v2061_v27  ;;  %v6749_v39 = vsel %vm380_vm1, %v2146_v34, %v2157_v62  ;;  %v6752_v12 = vsel %vm380_vm1, %v2162_v59, %v2173_v55  ;;  %v2215_v33 = vor.u32 %v2213_v56, %v2168_v48 }
 0x31f   : > { %2265 = vrot.lane.b32.xlu0 %v2211_v14, %s5763_s14  ;;  %v2214_v38 = vsel %vm464_vm0, %v2212_v46, %v2213_v56  ;;  %v2071_v41 = vpack.c.bf16 %v2060_v20, %v2059_v54  ;;  %v6757_v2 = vsel %vm380_vm1, %v2154_v24, %v2165_v37  ;;  %v2192_v59 = vsel %vm6079_vm6, 0, %v6666_v57  ;;  %v5713_v57 = vld [vmem:[%s7553_s1 + $0x1a0] sm:$0xff]  }
 0x320   : > { %v2184_v19 = vshrl.u32 %v2072_v43, 16  ;;  %v2187_v47 = vshll.u32 %v2072_v43, 16 }
 0x321   : > { %2267 = vrot.lane.b32.xlu1 %v2214_v38, %s5763_s14  ;;  %v2179_v51 = vshll.u32 %v2071_v41, 16  ;;  %v2176_v16 = vshrl.u32 %v2071_v41, 16 }
 0x322   : > { %v2186_v34 = vrot.slane %v2184_v19, 7  ;;  %v2219_v49 = vrot.slane %v2187_v47, 1 }
 0x323   : > { %2248 = vrot.lane.b32.xlu0 %v2070_v36, %s5762_s11  ;;  %v2216_v11 = vrot.slane %v2179_v51, 1  ;;  %v2178_v28 = vrot.slane %v2176_v16, 7 }
 0x324   : > { %v2189_v23 = vor.u32 %v2187_v47, %v2186_v34  ;;  %v2221_v48 = vor.u32 %v2219_v49, %v2184_v19 }
 0x325   : > { %2250 = vrot.lane.b32.xlu1 %v2071_v41, %s5762_s11  ;;  %v2217_v61 = vsel %vm464_vm0, %v2215_v33, %v2216_v11  ;;  %v2218_v27 = vor.u32 %v2216_v11, %v2176_v16  ;;  %v2181_v24 = vor.u32 %v2179_v51, %v2178_v28  ;;  %v5715_v51 = vld [vmem:[%s7553_s1 + $0x190] sm:$0xff]   ;;  %v5716_v33 = vld [vmem:[%s7553_s1 + $0x188] sm:$0xff]  }
 0x326   : > { %v6764_v63 = vsel %vm380_vm1, %v2178_v28, %v2189_v23  ;;  %v2223_v58 = vsel %vm5995_vm3, %v2221_v48, 0 }
 0x327   : > { %2269 = vrot.lane.b32.xlu0 %v2217_v61, %s5763_s14  ;;  %v2220_v9 = vsel %vm464_vm0, %v2218_v27, %v2219_v49  ;;  %v6769_v36 = vsel %vm380_vm1, %v2170_v25, %v2181_v24  ;;  %v5717_v61 = vld [vmem:[%s7553_s1 + $0x180] sm:$0xff]  }
 0x329   : > { %2271 = vrot.lane.b32.xlu1 %v2220_v9, %s5763_s14 }
 0x32b   : > { %2252 = vrot.lane.b32.xlu0 %v2072_v43, %s5762_s11 }
 0x32f   : > { %2273 = vrot.lane.b32.xlu0 %v2223_v58, %s5763_s14 }
 0x372   : > { %v2237_v56 = vpop.permute.xlu0 %2236 }
 0x373   : > { %v2235_v60 = vpop.permute.xlu1 %2234  ;;  %v2280_v55 = vsel %vm539_vm5, %v6664_v26, %v2237_v56 }
 0x374   : > { %v2277_v40 = vsel %vm539_vm5, %v2192_v59, %v2235_v60 }
 0x37b   : > { %v2256_v30 = vpop.permute.xlu1 %2255 }
 0x37c   : > { %v2306_v25 = vsel %vm570_vm7, %v2277_v40, %v2256_v30 }
 0x37d   : > { %5351 = vmatprep.mubr.msk.bf16.mxu0 %vm627_vm8, %v2306_v25  ;;  %5384 = vmatmul.mubr.msk.bf16.vlgmr.msra.gmra.mxu1 %vm627_vm8, %v2306_v25 }
 0x37f   : > { %v2239_v62 = vpop.permute.xlu1 %2238 }
 0x380   : > { %v2283_v46 = vsel %vm539_vm5, %v6716_v4, %v2239_v62  ;;  %v5714_v4 = vld [vmem:[%s7553_s1 + $0x198] sm:$0xff]   ;;  %v5719_v62 = vld [vmem:[%s7553_s1 + $0x200] sm:$0xff]  }
 0x381   : > { %v2258_v20 = vpop.permute.xlu0 %2257 }
 0x382   : > { %v6786_v14 = vsel %vm570_vm7, %v2280_v55, %v2258_v20  ;;  %v5720_v55 = vld [vmem:[%s7553_s1 + $0x1d8] sm:$0xff]   ;;  %v5722_v20 = vld [vmem:[%s7553_s1 + $0x1d0] sm:$0xff]  }
 0x383   : > { %5352 = vmatmul.mubr.msk.bf16.vlgmr.msra.gmra.mxu0 %vm627_vm8, %v6786_v14  ;;  %5387 = vmatprep.mubr.msk.bf16.mxu1 %vm627_vm8, %v6786_v14  ;;  %v2260_v43 = vpop.permute.xlu1 %2259 }
 0x384   : > { %5404 = vmatpush3.bf16.msra.mxu0 %v6652_v52  ;;  %v2310_v26 = vsel %vm570_vm7, %v2283_v46, %v2260_v43  ;;  %v5724_v46 = vld [vmem:[%s7553_s1 + $0x1f0] sm:$0xff]   ;;  %v5725_v43 = vld [vmem:[%s7553_s1 + $0x1c0] sm:$0xff]  }
 0x385   : > { %v2241_v37 = vpop.permute.xlu0 %2240  ;;  %5355 = vmatprep.mubr.msk.bf16.mxu0 %vm627_vm8, %v2310_v26  ;;  %5388 = vmatmul.mubr.msk.bf16.gmra.mxu1 %vm627_vm8, %v2310_v26 }
 0x386   : > { %5405 = vmatprep.subr.bf16.mxu0 %v5713_v57  ;;  %v2286_v41 = vsel %vm539_vm5, %v6736_v6, %v2241_v37 }
 0x387   : > { %v2243_v38 = vpop.permute.xlu1 %2242 }
 0x388   : > { %5406 = vmatpush3.bf16.msra.mxu0 %v5713_v57  ;;  %v2289_v16 = vsel %vm539_vm5, %v6746_v45, %v2243_v38  ;;  %v5723_v57 = vld [vmem:[%s7553_s1 + $0x1c8] sm:$0xff]  }
 0x389   : > { %v2262_v19 = vpop.permute.xlu0 %2261  ;;  %5407 = vmatprep.subr.bf16.mxu0 %v5714_v4 }
 0x38a   : > { %v2312_v52 = vsel %vm570_vm7, %v2286_v41, %v2262_v19 }
 0x38b   : > { %5356 = vmatmul.mubr.msk.bf16.gmra.mxu0 %vm627_vm8, %v2312_v52  ;;  %5391 = vmatprep.mubr.msk.bf16.mxu1 %vm627_vm8, %v2312_v52  ;;  %v2264_v47 = vpop.permute.xlu1 %2263 }
 0x38c   : > { %v2314_v34 = vsel %vm570_vm7, %v2289_v16, %v2264_v47  ;;  %5408 = vmatpush3.bf16.msra.mxu0 %v5714_v4 }
 0x38d   : > { %v2245_v6 = vpop.permute.xlu0 %2244  ;;  %5359 = vmatprep.mubr.msk.bf16.mxu0 %vm627_vm8, %v2314_v34  ;;  %5392 = vmatmul.mubr.msk.bf16.gmra.mxu1 %vm627_vm8, %v2314_v34 }
 0x38e   : > { %5409 = vmatprep.subr.bf16.mxu0 %v5715_v51  ;;  %v2292_v45 = vsel %vm539_vm5, %v6749_v39, %v2245_v6 }
 0x38f   : > { %v2247_v11 = vpop.permute.xlu1 %2246 }
 0x390   : > { %5410 = vmatpush3.bf16.msra.mxu0 %v5715_v51  ;;  %v2295_v27 = vsel %vm539_vm5, %v6757_v2, %v2247_v11 }
 0x391   : > { %v2266_v28 = vpop.permute.xlu0 %2265  ;;  %5411 = vmatprep.subr.bf16.mxu0 %v5716_v33 }
 0x392   : > { %v2316_v23 = vsel %vm570_vm7, %v2292_v45, %v2266_v28 }
 0x393   : > { %5360 = vmatmul.mubr.msk.bf16.gmra.mxu0 %vm627_vm8, %v2316_v23  ;;  %5395 = vmatprep.mubr.msk.bf16.mxu1 %vm627_vm8, %v2316_v23  ;;  %v2268_v49 = vpop.permute.xlu1 %2267 }
 0x394   : > { %v2318_v24 = vsel %vm570_vm7, %v2295_v27, %v2268_v49  ;;  %5412 = vmatpush3.bf16.msra.mxu0 %v5716_v33 }
 0x395   : > { %v2249_v39 = vpop.permute.xlu0 %2248  ;;  %5363 = vmatprep.mubr.msk.bf16.mxu0 %vm627_vm8, %v2318_v24  ;;  %5396 = vmatmul.mubr.msk.bf16.gmra.mxu1 %vm627_vm8, %v2318_v24 }
 0x396   : > { %5413 = vmatprep.subr.bf16.mxu0 %v5717_v61  ;;  %v2298_v48 = vsel %vm539_vm5, %v6752_v12, %v2249_v39 }
 0x397   : > { %v2251_v9 = vpop.permute.xlu1 %2250 }
 0x398   : > { %5414 = vmatpush3.bf16.msra.mxu0 %v5717_v61  ;;  %v2301_v60 = vsel %vm539_vm5, %v6769_v36, %v2251_v9  ;;  %v5718_v36 = vld [vmem:[%s7553_s1 + $0x208] sm:$0xff]  }
 0x399   : > { %v2270_v2 = vpop.permute.xlu0 %2269  ;;  %5435 = vmatprep.subr.bf16.mxu1 %v5718_v36  ;;  %5467 = vmatprep.subr.bf16.mxu0 %v5720_v55 }
 0x39a   : > { %v2320_v58 = vsel %vm570_vm7, %v2298_v48, %v2270_v2  ;;  %5436 = vmatpush3.bf16.msra.mxu1 %v5718_v36 }
 0x39b   : > { %5364 = vmatmul.mubr.msk.bf16.gmra.mxu0 %vm627_vm8, %v2320_v58  ;;  %5399 = vmatprep.mubr.msk.bf16.mxu1 %vm627_vm8, %v2320_v58  ;;  %v2272_v59 = vpop.permute.xlu1 %2271 }
 0x39c   : > { %v2322_v40 = vsel %vm570_vm7, %v2301_v60, %v2272_v59  ;;  %5437 = vmatprep.subr.bf16.mxu1 %v5719_v62 }
 0x39d   : > { %v2253_v30 = vpop.permute.xlu0 %2252  ;;  %5367 = vmatprep.mubr.msk.bf16.mxu0 %vm627_vm8, %v2322_v40  ;;  %5400 = vmatmul.mubr.msk.bf16.gmra.mxu1 %vm627_vm8, %v2322_v40 }
 0x39e   : > { %v2304_v12 = vsel %vm539_vm5, %v6764_v63, %v2253_v30  ;;  %v7607_v63 = vmov 0   ;;  %5438 = vmatpush3.bf16.msra.mxu1 %v5719_v62 }
 0x3a1   : > { %v2274_v25 = vpop.permute.xlu0 %2273 }
 0x3a2   : > { %v2324_v56 = vsel %vm570_vm7, %v2304_v12, %v2274_v25 }
 0x3a3   : > { %5368 = vmatmul.mubr.msk.bf16.gmra.mxu0 %vm627_vm8, %v2324_v56 }
 0x3a4   : > { %5415 = vmatprep.mubr.msk.bf16.mxu0 %vm627_vm8, %v6786_v14  ;;  %v5721_v14 = vld [vmem:[%s7553_s1 + $0x1f8] sm:$0xff]  }
 0x3a5   : > { %5439 = vmatprep.subr.bf16.mxu1 %v5721_v14 }
 0x3a6   : > { %5440 = vmatpush3.bf16.msra.mxu1 %v5721_v14 }
 0x3a7   : > { %5441 = vmatprep.subr.bf16.mxu1 %v5724_v46 }
 0x3aa   : > { %5442 = vmatpush3.bf16.msra.mxu1 %v5724_v46 }
 0x3ab   : > { %5416 = vmatmul.mubr.msk.bf16.vlgmr.msra.gmra.mxu0 %vm627_vm8, %v2310_v26 }
 0x3ac   : > { %5419 = vmatprep.mubr.msk.bf16.mxu0 %vm627_vm8, %v2312_v52  ;;  %5468 = vmatpush3.bf16.msra.mxu0 %v5720_v55 }
 0x3ad   : > { %5469 = vmatprep.subr.bf16.mxu0 %v5722_v20 }
 0x3b0   : > { %5470 = vmatpush3.bf16.msra.mxu0 %v5722_v20 }
 0x3b1   : > { %5471 = vmatprep.subr.bf16.mxu0 %v5723_v57 }
 0x3b3   : > { %5420 = vmatmul.mubr.msk.bf16.gmra.mxu0 %vm627_vm8, %v2314_v34 }
 0x3b4   : > { %5423 = vmatprep.mubr.msk.bf16.mxu0 %vm627_vm8, %v2316_v23  ;;  %5472 = vmatpush3.bf16.msra.mxu0 %v5723_v57  ;;  %v6896_v57 = vld [vmem:[%s7554_s2 + $0x2] ss:$0 sm:$0xff] }
 0x3b5   : > { %5473 = vmatprep.subr.bf16.mxu0 %v5725_v43 }
 0x3b8   : > { %5474 = vmatpush3.bf16.msra.mxu0 %v5725_v43 }
 0x3bb   : > { %5424 = vmatmul.mubr.msk.bf16.gmra.mxu0 %vm627_vm8, %v2318_v24 }
 0x3bc   : > { %5427 = vmatprep.mubr.msk.bf16.mxu0 %vm627_vm8, %v2320_v58 }
 0x3c3   : > { %5428 = vmatmul.mubr.msk.bf16.gmra.mxu0 %vm627_vm8, %v2322_v40 }
 0x3c4   : > { %5431 = vmatprep.mubr.msk.bf16.mxu0 %vm627_vm8, %v2324_v56 }
 0x3cb   : > { %5432 = vmatmul.mubr.bf16.gmra.mxu0 %v7607_v63 }
 0x3cc   : > { %5479 = vmatprep.mubr.bf16.mxu0 %v7607_v63 }
 0x43d   : > { %v5385_v26 = vpop.f32.mrf.mxu1 }
 0x43f   : > { %v2564_v37 = vpop.f32.mrf.mxu1 }
 0x441   : > { %v5386_v4 = vpop.f32.mrf.mxu1 }
 0x443   : > { %v5353_v38 = vpop.f32.mrf.mxu0  ;;  %v2567_v41 = vpop.f32.mrf.mxu1 }
 0x444   : > { %v2573_v62 = vadd.f32 %v5385_v26, %v5353_v38  ;;  %v5726_v26 = vld [vmem:[%s7553_s1 + $0x1e8] sm:$0xff]   ;;  %v5728_v38 = vld [vmem:[%s7553_s1 + $0x1b0] sm:$0xff]  }
 0x445   : > { %v2415_v19 = vpop.f32.mrf.mxu0  ;;  %v5389_v52 = vpop.f32.mrf.mxu1  ;;  %5443 = vmatprep.subr.bf16.mxu1 %v5726_v26 }
 0x446   : > { %v2565_v14 = vadd.f32 %v2564_v37, %v2415_v19  ;;  %v5727_v37 = vld [vmem:[%s7553_s1 + $0x1b8] sm:$0xff]   ;;  %5444 = vmatpush3.bf16.msra.mxu1 %v5726_v26 }
 0x447   : > { %v5354_v51 = vpop.f32.mrf.mxu0  ;;  %v2580_v16 = vpop.f32.mrf.mxu1  ;;  %5475 = vmatprep.subr.bf16.mxu0 %v5727_v37 }
 0x448   : > { %v2576_v63 = vadd.f32 %v5386_v4, %v5354_v51  ;;  %5476 = vmatpush3.bf16.msra.mxu0 %v5727_v37 }
 0x449   : > { %v2418_v47 = vpop.f32.mrf.mxu0  ;;  %v5390_v34 = vpop.f32.mrf.mxu1  ;;  %5477 = vmatprep.subr.bf16.mxu0 %v5728_v38 }
 0x44a   : > { %v2568_v42 = vadd.f32 %v2567_v41, %v2418_v47 }
 0x44b   : > { %v5357_v6 = vpop.f32.mrf.mxu0  ;;  %v2583_v11 = vpop.f32.mrf.mxu1 }
 0x44c   : > { %v2589_v51 = vadd.f32 %v5389_v52, %v5357_v6  ;;  %5478 = vmatpush3.bf16.msra.mxu0 %v5728_v38 }
 0x44d   : > { %v2431_v33 = vpop.f32.mrf.mxu0  ;;  %v5393_v23 = vpop.f32.mrf.mxu1 }
 0x44f   : > { %v5358_v45 = vpop.f32.mrf.mxu0  ;;  %v2596_v49 = vpop.f32.mrf.mxu1 }
 0x450   : > { %v2592_v47 = vadd.f32 %v5390_v34, %v5358_v45 }
 0x451   : > { %v2434_v28 = vpop.f32.mrf.mxu0  ;;  %v5394_v9 = vpop.f32.mrf.mxu1 }
 0x453   : > { %v5361_v61 = vpop.f32.mrf.mxu0  ;;  %v2599_v58 = vpop.f32.mrf.mxu1 }
 0x455   : > { %v2447_v27 = vpop.f32.mrf.mxu0  ;;  %v5397_v40 = vpop.f32.mrf.mxu1 }
 0x456   : > { %v2597_v52 = vadd.f32 %v2596_v49, %v2447_v27  ;;  %v5729_v49 = vld [vmem:[%s7553_s1 + $0x1e0] sm:$0xff]  }
 0x457   : > { %v5362_v24 = vpop.f32.mrf.mxu0  ;;  %v2612_v25 = vpop.f32.mrf.mxu1  ;;  %5445 = vmatprep.subr.bf16.mxu1 %v5729_v49 }
 0x458   : > { %v6911_v6 = vadd.f32 %v5394_v9, %v5362_v24  ;;  %5446 = vmatpush3.bf16.msra.mxu1 %v5729_v49 }
 0x459   : > { %v2450_v39 = vpop.f32.mrf.mxu0  ;;  %v5398_v55 = vpop.f32.mrf.mxu1 }
 0x45b   : > { %v5365_v48 = vpop.f32.mrf.mxu0  ;;  %v2615_v31 = vpop.f32.mrf.mxu1 }
 0x45c   : > { %v6917_v45 = vadd.f32 %v5397_v40, %v5365_v48 }
 0x45d   : > { %v2463_v2 = vpop.f32.mrf.mxu0 }
 0x45f   : > { %v5366_v60 = vpop.f32.mrf.mxu0 }
 0x461   : > { %v6883_v59 = vpop.f32.mrf.mxu0 }
 0x462   : > { %v6930_v9 = vadd.f32 %v2615_v31, %v6883_v59 }
 0x463   : > { %v6885_v30 = vpop.f32.mrf.mxu0 }
 0x465   : > { %v6887_v12 = vpop.f32.mrf.mxu0 }
 0x467   : > { %v6889_v56 = vpop.f32.mrf.mxu0 }
 0x469   : > { %v6891_v36 = vpop.f32.mrf.mxu0 }
 0x46b   : > { %v5417_v20 = vpop.f32.mrf.mxu0 }
 0x46c   : > { %v2794_v46 = vadd.f32 %v5417_v20, %v2573_v62  ;;  %v5401_v62 = vpop.f32.mrf.mxu1  ;;  %v2584_v20 = vadd.f32 %v2583_v11, %v2434_v28  ;;  %v6919_v28 = vadd.f32 %v2612_v25, %v2463_v2 }
 0x46d   : > { %v2713_v43 = vpop.f32.mrf.mxu0  ;;  %v6933_v48 = vadd.f32 %v5401_v62, %v6885_v30 }
 0x46e   : > { %v2792_v54 = vadd.f32 %v2713_v43, %v2565_v14  ;;  %v2820_v29 = vadd.f32 %v6896_v57, %v2794_v46  ;;  %v2605_v43 = vadd.f32 %v5393_v23, %v5361_v61  ;;  %v6921_v23 = vadd.f32 %v5398_v55, %v5366_v60 }
 0x46f   : > { %v5418_v5 = vpop.f32.mrf.mxu0 }
 0x470   : > { %v2795_v0 = vadd.f32 %v5418_v5, %v2576_v63  ;;  %v2818_v4 = vadd.f32 %v6896_v57, %v2792_v54  ;;  %v2581_v63 = vadd.f32 %v2580_v16, %v2431_v33  ;;  %v2840_v14 = vmax.f32 %v2820_v29, 0.0  ;;  %v2628_v16 = vpop.f32.mrf.mxu1 }
 0x471   : > { %v2716_v19 = vpop.f32.mrf.mxu0  ;;  %v6937_v25 = vadd.f32 %v2628_v16, %v6887_v12 }
 0x472   : > { %v2821_v41 = vadd.f32 %v6896_v57, %v2795_v0  ;;  %v2793_v5 = vadd.f32 %v2716_v19, %v2568_v42  ;;  %v6913_v0 = vadd.f32 %v2599_v58, %v2450_v39  ;;  %v2838_v42 = vmax.f32 %v2818_v4, 0.0  ;;  %v5402_v40 = vpop.f32.mrf.mxu1 }
 0x473   : > { %v5421_v46 = vpop.f32.mrf.mxu0  ;;  %v2860_v61 = vmul.f32 %v2840_v14, %v6239_v8  ;;  %v6941_v31 = vadd.f32 %v5402_v40, %v6889_v56  ;;  %v6953_v14 = vld [vmem:[%s7553_s1 + $0x238] sm:$0xff]  }
 0x474   : > { %v2841_v17 = vmax.f32 %v2821_v41, 0.0  ;;  %v2819_v3 = vadd.f32 %v6896_v57, %v2793_v5  ;;  %v2798_v54 = vadd.f32 %v5421_v46, %v2589_v51  ;;  %v2858_v2 = vmul.f32 %v2838_v42, %v6233_v10  ;;  %5499 = vmatprep.subr.bf16.mxu1 %v6953_v14 }
 0x475   : > { %v2729_v19 = vpop.f32.mrf.mxu0 }
 0x476   : > { %v2861_v34 = vmul.f32 %v2841_v17, %v6247_v21  ;;  %v2839_v29 = vmax.f32 %v2819_v3, 0.0  ;;  %v2824_v33 = vadd.f32 %v6896_v57, %v2798_v54  ;;  %v2796_v11 = vadd.f32 %v2729_v19, %v2581_v63 }
 0x477   : > { %v5422_v27 = vpop.f32.mrf.mxu0 }
 0x478   : > { %v2859_v17 = vmul.f32 %v2839_v29, %v6227_v1  ;;  %v2844_v3 = vmax.f32 %v2824_v33, 0.0  ;;  %v2822_v24 = vadd.f32 %v6896_v57, %v2796_v11  ;;  %v2799_v39 = vadd.f32 %v5422_v27, %v2592_v47 }
 0x479   : > { %v2732_v58 = vpop.f32.mrf.mxu0  ;;  %v2879_v60 = vpack.c.bf16 %v2861_v34, %v2860_v61 }
 0x47a   : > { %v2842_v55 = vmax.f32 %v2822_v24, 0.0  ;;  %v2825_v26 = vadd.f32 %v6896_v57, %v2799_v39  ;;  %v2797_v37 = vadd.f32 %v2732_v58, %v2584_v20  ;;  %v2878_v30 = vpack.c.bf16 %v2859_v17, %v2858_v2  ;;  %v2631_v17 = vpop.f32.mrf.mxu1 }
 0x47b   : > { %3051 = vrot.lane.b32.xlu0 %v2879_v60, %s5762_s11  ;;  %v5425_v59 = vpop.f32.mrf.mxu0  ;;  %v2938_v38 = vshll.u32 %v2879_v60, 16  ;;  %v2935_v4 = vshrl.u32 %v2879_v60, 16  ;;  %v2864_v51 = vmul.f32 %v2844_v3, %v6264_v35  ;;  %v6970_v58 = vadd.f32 %v2631_v17, %v6891_v36 }
 0x47c   : > { %v2845_v62 = vmax.f32 %v2825_v26, 0.0  ;;  %v2823_v12 = vadd.f32 %v6896_v57, %v2797_v37  ;;  %v2802_v41 = vadd.f32 %v5425_v59, %v2605_v43  ;;  %v2862_v5 = vmul.f32 %v2842_v55, %v6253_v22  ;;  %3049 = vrot.lane.b32.xlu1 %v2878_v30, %s5762_s11 }
 0x47d   : > { %v2931_v63 = vshll.u32 %v2878_v30, 16  ;;  %v2745_v47 = vpop.f32.mrf.mxu0  ;;  %v2928_v56 = vshrl.u32 %v2878_v30, 16  ;;  %v6948_v20 = vrot.slane %v2935_v4, 7  ;;  %v3010_v34 = vrot.slane %v2938_v38, 1 }
 0x47e   : > { %v2865_v46 = vmul.f32 %v2845_v62, %v6276_v13  ;;  %v2843_v54 = vmax.f32 %v2823_v12, 0.0  ;;  %v2828_v42 = vadd.f32 %v6896_v57, %v2802_v41  ;;  %v2800_v43 = vadd.f32 %v2745_v47, %v2597_v52 }
 0x47f   : > { %v5426_v19 = vpop.f32.mrf.mxu0  ;;  %v3008_v16 = vrot.slane %v2931_v63, 1  ;;  %v2930_v29 = vrot.slane %v2928_v56, 7  ;;  %v2940_v33 = vor.u32 %v2938_v38, %v6948_v20  ;;  %v3012_v62 = vor.u32 %v3010_v34, %v2935_v4 }
 0x480   : > { %v6959_v11 = vpack.c.bf16 %v2865_v46, %v2864_v51  ;;  %v2863_v61 = vmul.f32 %v2843_v54, %v6257_v44  ;;  %v2848_v27 = vmax.f32 %v2828_v42, 0.0  ;;  %v2826_v49 = vadd.f32 %v6896_v57, %v2800_v43 }
 0x481   : > { %v2803_v3 = vadd.f32 %v5426_v19, %v6911_v6  ;;  %v2748_v24 = vpop.f32.mrf.mxu0  ;;  %v3009_v52 = vor.u32 %v3008_v16, %v2928_v56  ;;  %v6965_v39 = vsel %vm380_vm1, %v2930_v29, %v2940_v33  ;;  %v6967_v2 = vor.u32 %v2931_v63, %v2930_v29 }
 0x482   : > { %v2846_v60 = vmax.f32 %v2826_v49, 0.0  ;;  %v2801_v40 = vadd.f32 %v2748_v24, %v6913_v0  ;;  %v2880_v55 = vpack.c.bf16 %v2863_v61, %v2862_v5  ;;  %v2954_v6 = vshll.u32 %v6959_v11, 16 }
 0x483   : > { %v2829_v26 = vadd.f32 %v6896_v57, %v2803_v3  ;;  %v3011_v37 = vsel %vm464_vm0, %v3009_v52, %v3010_v34  ;;  %v5429_v59 = vpop.f32.mrf.mxu0  ;;  %v2951_v30 = vshrl.u32 %v6959_v11, 16  ;;  %v2868_v0 = vmul.f32 %v2848_v27, %v6297_v7 }
 0x484   : > { %v2827_v38 = vadd.f32 %v6896_v57, %v2801_v40  ;;  %3070 = vrot.lane.b32.xlu1 %v3011_v37, %s5763_s14  ;;  %v2806_v36 = vadd.f32 %v5429_v59, %v6917_v45  ;;  %v2946_v51 = vshll.u32 %v2880_v55, 16  ;;  %v2943_v5 = vshrl.u32 %v2880_v55, 16 }
 0x485   : > { %v2849_v12 = vmax.f32 %v2829_v26, 0.0  ;;  %v2761_v41 = vpop.f32.mrf.mxu0  ;;  %v3016_v63 = vrot.slane %v2954_v6, 1  ;;  %v2866_v42 = vmul.f32 %v2846_v60, %v6280_v50  ;;  %v6989_v19 = vrot.slane %v2951_v30, 7 }
 0x486   : > { %v2847_v47 = vmax.f32 %v2827_v38, 0.0  ;;  %v2832_v56 = vadd.f32 %v6896_v57, %v2806_v36  ;;  %v2804_v46 = vadd.f32 %v2761_v41, %v6919_v28  ;;  %v3013_v54 = vrot.slane %v2946_v51, 1  ;;  %v7608_v41 = vld [vmem:[#allocation8_spill] sm:$0xff] }
 0x487   : > { %v2869_v45 = vmul.f32 %v2849_v12, %v6310_v53  ;;  %v5430_v43 = vpop.f32.mrf.mxu0  ;;  %v6987_v4 = vrot.slane %v2943_v5, 7  ;;  %v3018_v60 = vor.u32 %v3016_v63, %v2951_v30 }
 0x488   : > { %v2867_v16 = vmul.f32 %v2847_v47, %v6286_v32  ;;  %v2852_v34 = vmax.f32 %v2832_v56, 0.0  ;;  %v2830_v29 = vadd.f32 %v6896_v57, %v2804_v46  ;;  %3053 = vrot.lane.b32.xlu1 %v2880_v55, %s5762_s11  ;;  %v2807_v33 = vadd.f32 %v5430_v43, %v6921_v23 }
 0x489   : > { %v6995_v28 = vpack.c.bf16 %v2869_v45, %v2868_v0  ;;  %v3014_v61 = vsel %vm464_vm0, %v3012_v62, %v3013_v54  ;;  %v2764_v27 = vpop.f32.mrf.mxu0  ;;  %v3015_v49 = vor.u32 %v3013_v54, %v2943_v5  ;;  %v2948_v17 = vor.u32 %v2946_v51, %v6987_v4 }
 0x48a   : > { %v2850_v3 = vmax.f32 %v2830_v29, 0.0  ;;  %v2833_v24 = vadd.f32 %v6896_v57, %v2807_v33  ;;  %3072 = vrot.lane.b32.xlu0 %v3014_v61, %s5763_s14  ;;  %v2805_v52 = vadd.f32 %v2764_v27, %v6930_v9  ;;  %v2882_v23 = vpack.c.bf16 %v2867_v16, %v2866_v42  ;;  %v7609_v16 = vld [vmem:[#allocation6_spill] sm:$0xff] }
 0x48b   : > { %v3017_v40 = vsel %vm464_vm0, %v3015_v49, %v3016_v63  ;;  %v5433_v55 = vpop.f32.mrf.mxu0  ;;  %v2970_v26 = vshll.u32 %v6995_v28, 16  ;;  %v2967_v37 = vshrl.u32 %v6995_v28, 16  ;;  %v2872_v59 = vmul.f32 %v2852_v34, %v6357_v15 }
 0x48c   : > { %v2853_v38 = vmax.f32 %v2833_v24, 0.0  ;;  %v2831_v36 = vadd.f32 %v6896_v57, %v2805_v52  ;;  %3074 = vrot.lane.b32.xlu1 %v3017_v40, %s5763_s14  ;;  %v2810_v51 = vadd.f32 %v5433_v55, %v6933_v48  ;;  %v2870_v9 = vmul.f32 %v2850_v3, %v6332_v18 }
 0x48d   : > { %v2777_v30 = vpop.f32.mrf.mxu0  ;;  %v2962_v62 = vshll.u32 %v2882_v23, 16  ;;  %v2959_v0 = vshrl.u32 %v2882_v23, 16  ;;  %v3022_v12 = vrot.slane %v2970_v26, 1  ;;  %v2969_v48 = vrot.slane %v2967_v37, 7 }
 0x48e   : > { %v2873_v5 = vmul.f32 %v2853_v38, %v7608_v41  ;;  %v2851_v63 = vmax.f32 %v2831_v36, 0.0  ;;  %v2836_v47 = vadd.f32 %v6896_v57, %v2810_v51  ;;  %3055 = vrot.lane.b32.xlu0 %v6959_v11, %s5762_s11  ;;  %v2808_v56 = vadd.f32 %v2777_v30, %v6937_v25  ;;  %v7611_v36 = vld [vmem:[#allocation9_spill] sm:$0xff] }
 0x48f   : > { %v5434_v46 = vpop.f32.mrf.mxu0  ;;  %v3019_v54 = vrot.slane %v2962_v62, 1  ;;  %v2961_v42 = vrot.slane %v2959_v0, 7  ;;  %v7017_v45 = vsel %vm380_vm1, %v6948_v20, %v2948_v17  ;;  %v2956_v3 = vor.u32 %v2954_v6, %v6989_v19 }
 0x490   : > { %v2885_v43 = vpack.c.bf16 %v2873_v5, %v2872_v59  ;;  %v2871_v34 = vmul.f32 %v2851_v63, %v7609_v16  ;;  %v2856_v29 = vmax.f32 %v2836_v47, 0.0  ;;  %v2834_v33 = vadd.f32 %v6896_v57, %v2808_v56  ;;  %3057 = vrot.lane.b32.xlu1 %v2882_v23, %s5762_s11 }
 0x491   : > { %v2811_v61 = vadd.f32 %v5434_v46, %v6941_v31  ;;  %v3020_v25 = vsel %vm464_vm0, %v3018_v60, %v3019_v54  ;;  %v2780_v27 = vpop.f32.mrf.mxu0  ;;  %v3021_v49 = vor.u32 %v3019_v54, %v2959_v0  ;;  %v3024_v52 = vor.u32 %v3022_v12, %v2967_v37  ;;  %v7610_v60 = vld [vmem:[#allocation11_spill] sm:$0xff]  ;;  %v7613_v54 = vld [vmem:[#allocation10_spill] sm:$0xff] }
 0x492   : > { %v2854_v20 = vmax.f32 %v2834_v33, 0.0  ;;  %3076 = vrot.lane.b32.xlu0 %v3020_v25, %s5763_s14  ;;  %v2809_v17 = vadd.f32 %v2780_v27, %v6970_v58  ;;  %v2884_v24 = vpack.c.bf16 %v2871_v34, %v2870_v9  ;;  %v2986_v31 = vshll.u32 %v2885_v43, 16 }
 0x493   : > { %v2837_v40 = vadd.f32 %v6896_v57, %v2811_v61  ;;  %v3023_v55 = vsel %vm464_vm0, %v3021_v49, %v3022_v12  ;;  %v2983_v23 = vshrl.u32 %v2885_v43, 16  ;;  %v2876_v59 = vmul.f32 %v2856_v29, %v7610_v60 }
 0x494   : > { %v2835_v38 = vadd.f32 %v6896_v57, %v2809_v17  ;;  %3078 = vrot.lane.b32.xlu1 %v3023_v55, %s5763_s14  ;;  %v2978_v11 = vshll.u32 %v2884_v24, 16  ;;  %v2975_v6 = vshrl.u32 %v2884_v24, 16  ;;  %v2874_v51 = vmul.f32 %v2854_v20, %v7611_v36  ;;  %v7612_v57 = vld [vmem:[#allocation12_spill] sm:$0xff]  ;;  %v5744_v36 = vld [vmem:[%s7555_s3 + $0x38] sm:$0xff]  }
 0x495   : > { %v2857_v30 = vmax.f32 %v2837_v40, 0.0  ;;  %v2985_v58 = vrot.slane %v2983_v23, 7  ;;  %v7037_v37 = vsel %vm380_vm1, %v6987_v4, %v2956_v3  ;;  %v2964_v5 = vor.u32 %v2962_v62, %v2961_v42 }
 0x496   : > { %v2855_v9 = vmax.f32 %v2835_v38, 0.0  ;;  %3059 = vrot.lane.b32.xlu0 %v6995_v28, %s5762_s11  ;;  %v3025_v0 = vrot.slane %v2978_v11, 1  ;;  %v2977_v12 = vrot.slane %v2975_v6, 7  ;;  %v3028_v47 = vrot.slane %v2986_v31, 1 }
 0x497   : > { %v2877_v63 = vmul.f32 %v2857_v30, %v7612_v57  ;;  %v2972_v56 = vor.u32 %v2970_v26, %v2969_v48  ;;  %v2988_v46 = vor.u32 %v2986_v31, %v2985_v58  ;;  %v7047_v33 = vsel %vm380_vm1, %v6989_v19, %v2964_v5 }
 0x498   : > { %v2875_v34 = vmul.f32 %v2855_v9, %v7613_v54  ;;  %3061 = vrot.lane.b32.xlu1 %v2884_v24, %s5762_s11  ;;  %v3026_v29 = vsel %vm464_vm0, %v3024_v52, %v3025_v0  ;;  %v3027_v4 = vor.u32 %v3025_v0, %v2975_v6  ;;  %v2980_v62 = vor.u32 %v2978_v11, %v2977_v12 }
 0x499   : > { %v2887_v28 = vpack.c.bf16 %v2877_v63, %v2876_v59  ;;  %v7050_v61 = vsel %vm380_vm1, %v2961_v42, %v2972_v56  ;;  %v7053_v25 = vsel %vm380_vm1, %v2977_v12, %v2988_v46  ;;  %v3030_v24 = vor.u32 %v3028_v47, %v2983_v23 }
 0x49a   : > { %3080 = vrot.lane.b32.xlu0 %v3026_v29, %s5763_s14  ;;  %v3029_v26 = vsel %vm464_vm0, %v3027_v4, %v3028_v47  ;;  %v2886_v27 = vpack.c.bf16 %v2875_v34, %v2874_v51  ;;  %v7058_v3 = vsel %vm380_vm1, %v2969_v48, %v2980_v62  ;;  %v3007_v12 = vsel %vm6079_vm6, 0, %v6967_v2  ;;  %v5731_v2 = vld [vmem:[%s7553_s1 + $0x230] sm:$0xff]  }
 0x49b   : > { %v2999_v49 = vshrl.u32 %v2887_v28, 16  ;;  %v3002_v17 = vshll.u32 %v2887_v28, 16 }
 0x49c   : > { %3082 = vrot.lane.b32.xlu1 %v3029_v26, %s5763_s14  ;;  %v2991_v19 = vshrl.u32 %v2886_v27, 16  ;;  %v2994_v20 = vshll.u32 %v2886_v27, 16 }
 0x49d   : > { %v3001_v42 = vrot.slane %v2999_v49, 7  ;;  %v3034_v38 = vrot.slane %v3002_v17, 1 }
 0x49e   : > { %3063 = vrot.lane.b32.xlu0 %v2885_v43, %s5762_s11  ;;  %v3031_v52 = vrot.slane %v2994_v20, 1  ;;  %v2993_v40 = vrot.slane %v2991_v19, 7 }
 0x49f   : > { %v3004_v55 = vor.u32 %v3002_v17, %v3001_v42  ;;  %v3036_v23 = vor.u32 %v3034_v38, %v2999_v49 }
 0x4a0   : > { %3065 = vrot.lane.b32.xlu1 %v2886_v27, %s5762_s11  ;;  %v3032_v31 = vsel %vm464_vm0, %v3030_v24, %v3031_v52  ;;  %v3033_v59 = vor.u32 %v3031_v52, %v2991_v19  ;;  %v2996_v48 = vor.u32 %v2994_v20, %v2993_v40  ;;  %v5733_v19 = vld [vmem:[%s7553_s1 + $0x220] sm:$0xff]   ;;  %v5734_v24 = vld [vmem:[%s7553_s1 + $0x218] sm:$0xff]  }
 0x4a1   : > { %v7065_v11 = vsel %vm380_vm1, %v2993_v40, %v3004_v55  ;;  %v3038_v30 = vsel %vm5995_vm3, %v3036_v23, 0 }
 0x4a2   : > { %3084 = vrot.lane.b32.xlu0 %v3032_v31, %s5763_s14  ;;  %v3035_v6 = vsel %vm464_vm0, %v3033_v59, %v3034_v38  ;;  %v7070_v43 = vsel %vm380_vm1, %v2985_v58, %v2996_v48  ;;  %v5735_v31 = vld [vmem:[%s7553_s1 + $0x210] sm:$0xff]  }
 0x4a4   : > { %3086 = vrot.lane.b32.xlu1 %v3035_v6, %s5763_s14 }
 0x4a6   : > { %3067 = vrot.lane.b32.xlu0 %v2887_v28, %s5762_s11 }
 0x4aa   : > { %3088 = vrot.lane.b32.xlu0 %v3038_v30, %s5763_s14 }
 0x4ed   : > { %v3052_v47 = vpop.permute.xlu0 %3051 }
 0x4ee   : > { %v3050_v9 = vpop.permute.xlu1 %3049  ;;  %v3095_v46 = vsel %vm539_vm5, %v6965_v39, %v3052_v47 }
 0x4ef   : > { %v3092_v5 = vsel %vm539_vm5, %v3007_v12, %v3050_v9 }
 0x4f6   : > { %v3071_v63 = vpop.permute.xlu1 %3070 }
 0x4f7   : > { %v3121_v58 = vsel %vm570_vm7, %v3092_v5, %v3071_v63 }
 0x4f8   : > { %5447 = vmatprep.mubr.msk.bf16.mxu1 %vm627_vm8, %v3121_v58  ;;  %5480 = vmatmul.mubr.msk.bf16.vlgmr.msra.gmra.mxu0 %vm627_vm8, %v3121_v58 }
 0x4fa   : > { %v3054_v56 = vpop.permute.xlu1 %3053 }
 0x4fb   : > { %v3098_v4 = vsel %vm539_vm5, %v7017_v45, %v3054_v56  ;;  %v5732_v45 = vld [vmem:[%s7553_s1 + $0x228] sm:$0xff]   ;;  %v5737_v56 = vld [vmem:[%s7555_s3 + $0x50] sm:$0xff]  }
 0x4fc   : > { %v3073_v34 = vpop.permute.xlu0 %3072 }
 0x4fd   : > { %v7087_v29 = vsel %vm570_vm7, %v3095_v46, %v3073_v34  ;;  %v5738_v46 = vld [vmem:[%s7555_s3 + $0x28] sm:$0xff]   ;;  %v5740_v34 = vld [vmem:[%s7555_s3 + $0x20] sm:$0xff]  }
 0x4fe   : > { %5448 = vmatmul.mubr.msk.bf16.vlgmr.msra.gmra.mxu1 %vm627_vm8, %v7087_v29  ;;  %5483 = vmatprep.mubr.msk.bf16.mxu0 %vm627_vm8, %v7087_v29  ;;  %v3075_v28 = vpop.permute.xlu1 %3074 }
 0x4ff   : > { %5500 = vmatpush3.bf16.msra.mxu1 %v6953_v14  ;;  %v3125_v39 = vsel %vm570_vm7, %v3098_v4, %v3075_v28  ;;  %v5742_v4 = vld [vmem:[%s7555_s3 + $0x40] sm:$0xff]   ;;  %v5743_v28 = vld [vmem:[%s7555_s3 + $0x10] sm:$0xff]  }
 0x500   : > { %v3056_v62 = vpop.permute.xlu0 %3055  ;;  %5451 = vmatprep.mubr.msk.bf16.mxu1 %vm627_vm8, %v3125_v39  ;;  %5484 = vmatmul.mubr.msk.bf16.gmra.mxu0 %vm627_vm8, %v3125_v39 }
 0x501   : > { %5501 = vmatprep.subr.bf16.mxu1 %v5731_v2  ;;  %v3101_v27 = vsel %vm539_vm5, %v7037_v37, %v3056_v62 }
 0x502   : > { %v3058_v26 = vpop.permute.xlu1 %3057 }
 0x503   : > { %5502 = vmatpush3.bf16.msra.mxu1 %v5731_v2  ;;  %v3104_v20 = vsel %vm539_vm5, %v7047_v33, %v3058_v26  ;;  %v5741_v2 = vld [vmem:[%s7555_s3 + $0x18] sm:$0xff]  }
 0x504   : > { %v3077_v49 = vpop.permute.xlu0 %3076  ;;  %5503 = vmatprep.subr.bf16.mxu1 %v5732_v45 }
 0x505   : > { %v3127_v14 = vsel %vm570_vm7, %v3101_v27, %v3077_v49 }
 0x506   : > { %5452 = vmatmul.mubr.msk.bf16.gmra.mxu1 %vm627_vm8, %v3127_v14  ;;  %5487 = vmatprep.mubr.msk.bf16.mxu0 %vm627_vm8, %v3127_v14  ;;  %v3079_v17 = vpop.permute.xlu1 %3078 }
 0x507   : > { %v3129_v42 = vsel %vm570_vm7, %v3104_v20, %v3079_v17  ;;  %5504 = vmatpush3.bf16.msra.mxu1 %v5732_v45 }
 0x508   : > { %v3060_v37 = vpop.permute.xlu0 %3059  ;;  %5455 = vmatprep.mubr.msk.bf16.mxu1 %vm627_vm8, %v3129_v42  ;;  %5488 = vmatmul.mubr.msk.bf16.gmra.mxu0 %vm627_vm8, %v3129_v42 }
 0x509   : > { %5505 = vmatprep.subr.bf16.mxu1 %v5733_v19  ;;  %v3107_v33 = vsel %vm539_vm5, %v7050_v61, %v3060_v37 }
 0x50a   : > { %v3062_v52 = vpop.permute.xlu1 %3061 }
 0x50b   : > { %5506 = vmatpush3.bf16.msra.mxu1 %v5733_v19  ;;  %v3110_v59 = vsel %vm539_vm5, %v7058_v3, %v3062_v52 }
 0x50c   : > { %v3081_v40 = vpop.permute.xlu0 %3080  ;;  %5507 = vmatprep.subr.bf16.mxu1 %v5734_v24 }
 0x50d   : > { %v3131_v55 = vsel %vm570_vm7, %v3107_v33, %v3081_v40 }
 0x50e   : > { %5456 = vmatmul.mubr.msk.bf16.gmra.mxu1 %vm627_vm8, %v3131_v55  ;;  %5491 = vmatprep.mubr.msk.bf16.mxu0 %vm627_vm8, %v3131_v55  ;;  %v3083_v38 = vpop.permute.xlu1 %3082 }
 0x50f   : > { %v3133_v48 = vsel %vm570_vm7, %v3110_v59, %v3083_v38  ;;  %5508 = vmatpush3.bf16.msra.mxu1 %v5734_v24 }
 0x510   : > { %v3064_v61 = vpop.permute.xlu0 %3063  ;;  %5459 = vmatprep.mubr.msk.bf16.mxu1 %vm627_vm8, %v3133_v48  ;;  %5492 = vmatmul.mubr.msk.bf16.gmra.mxu0 %vm627_vm8, %v3133_v48 }
 0x511   : > { %5509 = vmatprep.subr.bf16.mxu1 %v5735_v31  ;;  %v3113_v23 = vsel %vm539_vm5, %v7053_v25, %v3064_v61 }
 0x512   : > { %v3066_v6 = vpop.permute.xlu1 %3065 }
 0x513   : > { %5510 = vmatpush3.bf16.msra.mxu1 %v5735_v31  ;;  %v3116_v9 = vsel %vm539_vm5, %v7070_v43, %v3066_v6  ;;  %v5736_v43 = vld [vmem:[%s7555_s3 + $0x58] sm:$0xff]  }
 0x514   : > { %v3085_v3 = vpop.permute.xlu0 %3084  ;;  %5531 = vmatprep.subr.bf16.mxu0 %v5736_v43  ;;  %5563 = vmatprep.subr.bf16.mxu1 %v5738_v46 }
 0x515   : > { %v3135_v30 = vsel %vm570_vm7, %v3113_v23, %v3085_v3  ;;  %5532 = vmatpush3.bf16.msra.mxu0 %v5736_v43 }
 0x516   : > { %5460 = vmatmul.mubr.msk.bf16.gmra.mxu1 %vm627_vm8, %v3135_v30  ;;  %5495 = vmatprep.mubr.msk.bf16.mxu0 %vm627_vm8, %v3135_v30  ;;  %v3087_v12 = vpop.permute.xlu1 %3086 }
 0x517   : > { %v3137_v5 = vsel %vm570_vm7, %v3116_v9, %v3087_v12  ;;  %5533 = vmatprep.subr.bf16.mxu0 %v5737_v56 }
 0x518   : > { %v3068_v63 = vpop.permute.xlu0 %3067  ;;  %5463 = vmatprep.mubr.msk.bf16.mxu1 %vm627_vm8, %v3137_v5  ;;  %5496 = vmatmul.mubr.msk.bf16.gmra.mxu0 %vm627_vm8, %v3137_v5 }
 0x519   : > { %v3119_v25 = vsel %vm539_vm5, %v7065_v11, %v3068_v63  ;;  %v7616_v11 = vmov 0   ;;  %5534 = vmatpush3.bf16.msra.mxu0 %v5737_v56 }
 0x51c   : > { %v3089_v58 = vpop.permute.xlu0 %3088 }
 0x51d   : > { %v3139_v47 = vsel %vm570_vm7, %v3119_v25, %v3089_v58 }
 0x51e   : > { %5464 = vmatmul.mubr.msk.bf16.gmra.mxu1 %vm627_vm8, %v3139_v47 }
 0x51f   : > { %5511 = vmatprep.mubr.msk.bf16.mxu1 %vm627_vm8, %v7087_v29  ;;  %v5739_v29 = vld [vmem:[%s7555_s3 + $0x48] sm:$0xff]  }
 0x520   : > { %5535 = vmatprep.subr.bf16.mxu0 %v5739_v29 }
 0x521   : > { %5536 = vmatpush3.bf16.msra.mxu0 %v5739_v29 }
 0x522   : > { %5537 = vmatprep.subr.bf16.mxu0 %v5742_v4 }
 0x525   : > { %5538 = vmatpush3.bf16.msra.mxu0 %v5742_v4 }
 0x526   : > { %5512 = vmatmul.mubr.msk.bf16.vlgmr.msra.gmra.mxu1 %vm627_vm8, %v3125_v39  ;;  %5539 = vmatprep.subr.bf16.mxu0 %v5744_v36 }
 0x527   : > { %5515 = vmatprep.mubr.msk.bf16.mxu1 %vm627_vm8, %v3127_v14  ;;  %5564 = vmatpush3.bf16.msra.mxu1 %v5738_v46 }
 0x528   : > { %5565 = vmatprep.subr.bf16.mxu1 %v5740_v34 }
 0x529   : > { %5540 = vmatpush3.bf16.msra.mxu0 %v5744_v36 }
 0x52b   : > { %5566 = vmatpush3.bf16.msra.mxu1 %v5740_v34  ;;  %v7197_v34 = vld [vmem:[%s7554_s2 + $0x3] ss:$0 sm:$0xff] }
 0x52c   : > { %5567 = vmatprep.subr.bf16.mxu1 %v5741_v2 }
 0x52e   : > { %5516 = vmatmul.mubr.msk.bf16.gmra.mxu1 %vm627_vm8, %v3129_v42 }
 0x52f   : > { %5519 = vmatprep.mubr.msk.bf16.mxu1 %vm627_vm8, %v3131_v55  ;;  %5568 = vmatpush3.bf16.msra.mxu1 %v5741_v2 }
 0x530   : > { %5569 = vmatprep.subr.bf16.mxu1 %v5743_v28 }
 0x533   : > { %5570 = vmatpush3.bf16.msra.mxu1 %v5743_v28 }
 0x536   : > { %5520 = vmatmul.mubr.msk.bf16.gmra.mxu1 %vm627_vm8, %v3133_v48 }
 0x537   : > { %5523 = vmatprep.mubr.msk.bf16.mxu1 %vm627_vm8, %v3135_v30 }
 0x53e   : > { %5524 = vmatmul.mubr.msk.bf16.gmra.mxu1 %vm627_vm8, %v3137_v5 }
 0x53f   : > { %5527 = vmatprep.mubr.msk.bf16.mxu1 %vm627_vm8, %v3139_v47 }
 0x546   : > { %5528 = vmatmul.mubr.bf16.gmra.mxu1 %v7616_v11 }
 0x547   : > { %5575 = vmatprep.mubr.bf16.mxu1 %v7616_v11 }
 0x5b8   : > { %v5481_v39 = vpop.f32.mrf.mxu0 }
 0x5ba   : > { %v3379_v62 = vpop.f32.mrf.mxu0 }
 0x5bc   : > { %v5482_v45 = vpop.f32.mrf.mxu0 }
 0x5be   : > { %v5449_v26 = vpop.f32.mrf.mxu1  ;;  %v3382_v27 = vpop.f32.mrf.mxu0 }
 0x5bf   : > { %v3388_v46 = vadd.f32 %v5481_v39, %v5449_v26  ;;  %v5745_v39 = vld [vmem:[%s7555_s3 + $0x8] sm:$0xff]  }
 0x5c0   : > { %v3230_v49 = vpop.f32.mrf.mxu1  ;;  %v5485_v14 = vpop.f32.mrf.mxu0  ;;  %5571 = vmatprep.subr.bf16.mxu1 %v5745_v39 }
 0x5c1   : > { %v3380_v2 = vadd.f32 %v3379_v62, %v3230_v49  ;;  %v5746_v62 = vld [vmem:[%s7555_s3] sm:$0xff]   ;;  %5572 = vmatpush3.bf16.msra.mxu1 %v5745_v39 }
 0x5c2   : > { %v5450_v19 = vpop.f32.mrf.mxu1  ;;  %v3395_v20 = vpop.f32.mrf.mxu0  ;;  %5573 = vmatprep.subr.bf16.mxu1 %v5746_v62 }
 0x5c3   : > { %v3391_v0 = vadd.f32 %v5482_v45, %v5450_v19 }
 0x5c4   : > { %v3233_v17 = vpop.f32.mrf.mxu1  ;;  %v5486_v42 = vpop.f32.mrf.mxu0 }
 0x5c5   : > { %v3383_v26 = vadd.f32 %v3382_v27, %v3233_v17  ;;  %5574 = vmatpush3.bf16.msra.mxu1 %v5746_v62 }
 0x5c6   : > { %v5453_v37 = vpop.f32.mrf.mxu1  ;;  %v3398_v24 = vpop.f32.mrf.mxu0 }
 0x5c8   : > { %v3246_v52 = vpop.f32.mrf.mxu1  ;;  %v5489_v40 = vpop.f32.mrf.mxu0 }
 0x5c9   : > { %v3396_v60 = vadd.f32 %v3395_v20, %v3246_v52 }
 0x5ca   : > { %v5454_v33 = vpop.f32.mrf.mxu1  ;;  %v3411_v59 = vpop.f32.mrf.mxu0 }
 0x5cb   : > { %v3407_v16 = vadd.f32 %v5486_v42, %v5454_v33 }
 0x5cc   : > { %v3249_v55 = vpop.f32.mrf.mxu1  ;;  %v5490_v61 = vpop.f32.mrf.mxu0 }
 0x5cd   : > { %v3399_v18 = vadd.f32 %v3398_v24, %v3249_v55 }
 0x5ce   : > { %v5457_v31 = vpop.f32.mrf.mxu1  ;;  %v3414_v3 = vpop.f32.mrf.mxu0 }
 0x5cf   : > { %v3420_v27 = vadd.f32 %v5489_v40, %v5457_v31 }
 0x5d0   : > { %v3262_v38 = vpop.f32.mrf.mxu1  ;;  %v5493_v12 = vpop.f32.mrf.mxu0 }
 0x5d2   : > { %v5458_v48 = vpop.f32.mrf.mxu1  ;;  %v3427_v25 = vpop.f32.mrf.mxu0 }
 0x5d3   : > { %v3423_v17 = vadd.f32 %v5490_v61, %v5458_v48 }
 0x5d4   : > { %v3265_v6 = vpop.f32.mrf.mxu1  ;;  %v5494_v43 = vpop.f32.mrf.mxu0 }
 0x5d5   : > { %v7212_v32 = vadd.f32 %v3414_v3, %v3265_v6 }
 0x5d6   : > { %v5461_v23 = vpop.f32.mrf.mxu1  ;;  %v3430_v28 = vpop.f32.mrf.mxu0 }
 0x5d7   : > { %v7217_v33 = vadd.f32 %v5493_v12, %v5461_v23 }
 0x5d8   : > { %v3278_v30 = vpop.f32.mrf.mxu1  ;;  %v5497_v19 = vpop.f32.mrf.mxu0 }
 0x5d9   : > { %v7219_v40 = vadd.f32 %v3427_v25, %v3278_v30 }
 0x5da   : > { %v5462_v9 = vpop.f32.mrf.mxu1 }
 0x5dc   : > { %v7184_v5 = vpop.f32.mrf.mxu1 }
 0x5dd   : > { %v7230_v48 = vadd.f32 %v3430_v28, %v7184_v5 }
 0x5de   : > { %v7186_v63 = vpop.f32.mrf.mxu1 }
 0x5df   : > { %v7233_v6 = vadd.f32 %v5497_v19, %v7186_v63 }
 0x5e0   : > { %v7188_v58 = vpop.f32.mrf.mxu1 }
 0x5e2   : > { %v7190_v47 = vpop.f32.mrf.mxu1 }
 0x5e4   : > { %v7192_v56 = vpop.f32.mrf.mxu1 }
 0x5e6   : > { %v5513_v29 = vpop.f32.mrf.mxu1 }
 0x5e7   : > { %v3609_v4 = vadd.f32 %v5513_v29, %v3388_v46  ;;  %v3404_v29 = vadd.f32 %v5485_v14, %v5453_v37  ;;  %v3443_v14 = vpop.f32.mrf.mxu0 }
 0x5e8   : > { %v3528_v11 = vpop.f32.mrf.mxu1 }
 0x5e9   : > { %v3635_v51 = vadd.f32 %v7197_v34, %v3609_v4  ;;  %v3607_v54 = vadd.f32 %v3528_v11, %v3380_v2  ;;  %v5498_v61 = vpop.f32.mrf.mxu0 }
 0x5ea   : > { %v5514_v57 = vpop.f32.mrf.mxu1  ;;  %v7239_v3 = vadd.f32 %v5498_v61, %v7190_v47 }
 0x5eb   : > { %v3633_v49 = vadd.f32 %v7197_v34, %v3607_v54  ;;  %v3610_v45 = vadd.f32 %v5514_v57, %v3391_v0  ;;  %v3655_v46 = vmax.f32 %v3635_v51, 0.0  ;;  %v3412_v0 = vadd.f32 %v3411_v59, %v3262_v38 }
 0x5ec   : > { %v3531_v11 = vpop.f32.mrf.mxu1 }
 0x5ed   : > { %v3636_v2 = vadd.f32 %v7197_v34, %v3610_v45  ;;  %v3608_v4 = vadd.f32 %v3531_v11, %v3383_v26  ;;  %v3653_v41 = vmax.f32 %v3633_v49, 0.0  ;;  %v3675_v37 = vmul.f32 %v3655_v46, %v6239_v8  ;;  %v5747_v8 = vld [vmem:[%s7555_s3 + $0x30] sm:$0xff]   ;;  %v7251_v49 = vld [vmem:[%s7555_s3 + $0x88] sm:$0xff]  }
 0x5ee   : > { %v5517_v15 = vpop.f32.mrf.mxu1  ;;  %5541 = vmatprep.subr.bf16.mxu0 %v5747_v8 }
 0x5ef   : > { %v3656_v54 = vmax.f32 %v3636_v2, 0.0  ;;  %v3634_v57 = vadd.f32 %v7197_v34, %v3608_v4  ;;  %v3613_v51 = vadd.f32 %v5517_v15, %v3404_v29  ;;  %v7221_v15 = vadd.f32 %v5494_v43, %v5462_v9  ;;  %5542 = vmatpush3.bf16.msra.mxu0 %v5747_v8 }
 0x5f0   : > { %v3544_v36 = vpop.f32.mrf.mxu1  ;;  %v3673_v55 = vmul.f32 %v3653_v41, %v6233_v10  ;;  %v7236_v10 = vadd.f32 %v3443_v14, %v7188_v58  ;;  %5595 = vmatprep.subr.bf16.mxu0 %v7251_v49 }
 0x5f1   : > { %v3676_v20 = vmul.f32 %v3656_v54, %v6247_v21  ;;  %v3654_v42 = vmax.f32 %v3634_v57, 0.0  ;;  %v3639_v24 = vadd.f32 %v7197_v34, %v3613_v51  ;;  %v3611_v52 = vadd.f32 %v3544_v36, %v3396_v60 }
 0x5f2   : > { %v5518_v31 = vpop.f32.mrf.mxu1 }
 0x5f3   : > { %v3694_v59 = vpack.c.bf16 %v3676_v20, %v3675_v37  ;;  %v3674_v21 = vmul.f32 %v3654_v42, %v6227_v1  ;;  %v3659_v38 = vmax.f32 %v3639_v24, 0.0  ;;  %v3637_v60 = vadd.f32 %v7197_v34, %v3611_v52  ;;  %v3446_v37 = vpop.f32.mrf.mxu0 }
 0x5f4   : > { %v3614_v41 = vadd.f32 %v5518_v31, %v3407_v16  ;;  %v3547_v23 = vpop.f32.mrf.mxu1  ;;  %v7268_v42 = vadd.f32 %v3446_v37, %v7192_v56 }
 0x5f5   : > { %v3693_v1 = vpack.c.bf16 %v3674_v21, %v3673_v55  ;;  %v3612_v30 = vadd.f32 %v3547_v23, %v3399_v18  ;;  %3864 = vrot.lane.b32.xlu0 %v3694_v59, %s5762_s11  ;;  %v3657_v9 = vmax.f32 %v3637_v60, 0.0  ;;  %v3751_v63 = vshll.u32 %v3694_v59, 16 }
 0x5f6   : > { %v3640_v12 = vadd.f32 %v7197_v34, %v3614_v41  ;;  %v5521_v5 = vpop.f32.mrf.mxu1  ;;  %v3748_v25 = vshrl.u32 %v3694_v59, 16  ;;  %v3679_v58 = vmul.f32 %v3659_v38, %v6264_v35 }
 0x5f7   : > { %v3744_v43 = vshll.u32 %v3693_v1, 16  ;;  %v3638_v16 = vadd.f32 %v7197_v34, %v3612_v30  ;;  %v3617_v28 = vadd.f32 %v5521_v5, %v3420_v27  ;;  %3862 = vrot.lane.b32.xlu1 %v3693_v1, %s5762_s11  ;;  %v3741_v18 = vshrl.u32 %v3693_v1, 16 }
 0x5f8   : > { %v3660_v47 = vmax.f32 %v3640_v12, 0.0  ;;  %v3560_v39 = vpop.f32.mrf.mxu1  ;;  %v3823_v62 = vrot.slane %v3751_v63, 1  ;;  %v7246_v26 = vrot.slane %v3748_v25, 7  ;;  %v3677_v11 = vmul.f32 %v3657_v9, %v6253_v22 }
 0x5f9   : > { %v3658_v45 = vmax.f32 %v3638_v16, 0.0  ;;  %v3643_v19 = vadd.f32 %v7197_v34, %v3617_v28  ;;  %v3615_v35 = vadd.f32 %v3560_v39, %v3412_v0  ;;  %v3821_v46 = vrot.slane %v3744_v43, 1 }
 0x5fa   : > { %v3680_v29 = vmul.f32 %v3660_v47, %v6276_v13  ;;  %v5522_v2 = vpop.f32.mrf.mxu1  ;;  %v3743_v4 = vrot.slane %v3741_v18, 7  ;;  %v3753_v27 = vor.u32 %v3751_v63, %v7246_v26  ;;  %v3825_v52 = vor.u32 %v3823_v62, %v3748_v25  ;;  %v7617_v47 = vld [vmem:[#allocation4_spill] sm:$0xff] }
 0x5fb   : > { %v3678_v54 = vmul.f32 %v3658_v45, %v6257_v44  ;;  %v3663_v57 = vmax.f32 %v3643_v19, 0.0  ;;  %v3641_v51 = vadd.f32 %v7197_v34, %v3615_v35  ;;  %v3618_v14 = vadd.f32 %v5522_v2, %v3423_v17  ;;  %v7618_v45 = vld [vmem:[#allocation7_spill] sm:$0xff] }
 0x5fc   : > { %v7260_v36 = vpack.c.bf16 %v3680_v29, %v3679_v58  ;;  %v3563_v0 = vpop.f32.mrf.mxu1  ;;  %v3822_v20 = vor.u32 %v3821_v46, %v3741_v18  ;;  %v7263_v22 = vsel %vm380_vm1, %v3743_v4, %v3753_v27  ;;  %v7265_v13 = vor.u32 %v3744_v43, %v3743_v4 }
 0x5fd   : > { %v3695_v24 = vpack.c.bf16 %v3678_v54, %v3677_v11  ;;  %v3644_v44 = vadd.f32 %v7197_v34, %v3618_v14  ;;  %v3661_v55 = vmax.f32 %v3641_v51, 0.0  ;;  %v3616_v17 = vadd.f32 %v3563_v0, %v7212_v32 }
 0x5fe   : > { %v3824_v31 = vsel %vm464_vm0, %v3822_v20, %v3823_v62  ;;  %v5525_v8 = vpop.f32.mrf.mxu1  ;;  %v3767_v59 = vshll.u32 %v7260_v36, 16  ;;  %v3683_v21 = vmul.f32 %v3663_v57, %v6297_v7  ;;  %v3764_v32 = vshrl.u32 %v7260_v36, 16 }
 0x5ff   : > { %v3664_v38 = vmax.f32 %v3644_v44, 0.0  ;;  %3883 = vrot.lane.b32.xlu1 %v3824_v31, %s5763_s14  ;;  %v3621_v56 = vadd.f32 %v5525_v8, %v7217_v33  ;;  %v3759_v60 = vshll.u32 %v3695_v24, 16  ;;  %v3642_v61 = vadd.f32 %v7197_v34, %v3616_v17  ;;  %v7619_v44 = vld [vmem:[#allocation8_spill] sm:$0xff]  ;;  %v7620_v31 = vld [vmem:[#allocation5_spill] sm:$0xff] }
 0x600   : > { %v3576_v41 = vpop.f32.mrf.mxu1  ;;  %v3756_v23 = vshrl.u32 %v3695_v24, 16  ;;  %v3829_v1 = vrot.slane %v3767_v59, 1  ;;  %v3681_v5 = vmul.f32 %v3661_v55, %v6280_v50  ;;  %v3766_v11 = vrot.slane %v3764_v32, 7 }
 0x601   : > { %v3684_v30 = vmul.f32 %v3664_v38, %v6310_v53  ;;  %v3647_v9 = vadd.f32 %v7197_v34, %v3621_v56  ;;  %v3619_v12 = vadd.f32 %v3576_v41, %v7219_v40  ;;  %v3826_v7 = vrot.slane %v3759_v60, 1  ;;  %v7621_v41 = vld [vmem:[#allocation6_spill] sm:$0xff] }
 0x602   : > { %v3662_v63 = vmax.f32 %v3642_v61, 0.0  ;;  %v5526_v25 = vpop.f32.mrf.mxu1  ;;  %v3831_v33 = vor.u32 %v3829_v1, %v3764_v32  ;;  %v3758_v43 = vrot.slane %v3756_v23, 7  ;;  %v3769_v56 = vor.u32 %v3767_v59, %v3766_v11 }
 0x603   : > { %v7283_v58 = vpack.c.bf16 %v3684_v30, %v3683_v21  ;;  %v3667_v16 = vmax.f32 %v3647_v9, 0.0  ;;  %v3645_v28 = vadd.f32 %v7197_v34, %v3619_v12  ;;  %3866 = vrot.lane.b32.xlu1 %v3695_v24, %s5762_s11  ;;  %v3622_v53 = vadd.f32 %v5526_v25, %v7221_v15 }
 0x604   : > { %v3682_v39 = vmul.f32 %v3662_v63, %v7617_v47  ;;  %v3827_v40 = vsel %vm464_vm0, %v3825_v52, %v3826_v7  ;;  %v3579_v18 = vpop.f32.mrf.mxu1  ;;  %v3828_v62 = vor.u32 %v3826_v7, %v3756_v23  ;;  %v3761_v50 = vor.u32 %v3759_v60, %v3758_v43 }
 0x605   : > { %v3687_v19 = vmul.f32 %v3667_v16, %v7618_v45  ;;  %v3648_v35 = vadd.f32 %v7197_v34, %v3622_v53  ;;  %3885 = vrot.lane.b32.xlu0 %v3827_v40, %s5763_s14  ;;  %v3620_v46 = vadd.f32 %v3579_v18, %v7230_v48  ;;  %v3665_v2 = vmax.f32 %v3645_v28, 0.0  ;;  %v7622_v28 = vld [vmem:[#allocation11_spill] sm:$0xff] }
 0x606   : > { %v3697_v29 = vpack.c.bf16 %v3682_v39, %v3681_v5  ;;  %v3830_v15 = vsel %vm464_vm0, %v3828_v62, %v3829_v1  ;;  %v5529_v4 = vpop.f32.mrf.mxu1  ;;  %v3783_v27 = vshll.u32 %v7283_v58, 16  ;;  %v3780_v14 = vshrl.u32 %v7283_v58, 16  ;;  %v7623_v39 = vld [vmem:[#allocation9_spill] sm:$0xff] }
 0x607   : > { %v3668_v54 = vmax.f32 %v3648_v35, 0.0  ;;  %v3646_v57 = vadd.f32 %v7197_v34, %v3620_v46  ;;  %3887 = vrot.lane.b32.xlu1 %v3830_v15, %s5763_s14  ;;  %v3625_v51 = vadd.f32 %v5529_v4, %v7233_v6  ;;  %v7302_v24 = vsel %vm380_vm1, %v7246_v26, %v3761_v50  ;;  %v7624_v46 = vld [vmem:[#allocation12_spill] sm:$0xff]  ;;  %v7625_v4 = vld [vmem:[#allocation10_spill] sm:$0xff] }
 0x608   : > { %v3592_v37 = vpop.f32.mrf.mxu1  ;;  %v3775_v0 = vshll.u32 %v3697_v29, 16  ;;  %v3772_v48 = vshrl.u32 %v3697_v29, 16  ;;  %v3835_v20 = vrot.slane %v3783_v27, 1  ;;  %v3685_v8 = vmul.f32 %v3665_v2, %v7620_v31 }
 0x609   : > { %v3688_v52 = vmul.f32 %v3668_v54, %v7619_v44  ;;  %v3666_v55 = vmax.f32 %v3646_v57, 0.0  ;;  %v3651_v17 = vadd.f32 %v7197_v34, %v3625_v51  ;;  %3868 = vrot.lane.b32.xlu0 %v7260_v36, %s5762_s11  ;;  %v3623_v6 = vadd.f32 %v3592_v37, %v7236_v10 }
 0x60a   : > { %v5530_v21 = vpop.f32.mrf.mxu1  ;;  %v3832_v38 = vrot.slane %v3775_v0, 1  ;;  %v3774_v60 = vrot.slane %v3772_v48, 7  ;;  %v7316_v9 = vsel %vm380_vm1, %v3758_v43, %v3769_v56  ;;  %v3837_v5 = vor.u32 %v3835_v20, %v3780_v14 }
 0x60b   : > { %v3700_v61 = vpack.c.bf16 %v3688_v52, %v3687_v19  ;;  %v3686_v26 = vmul.f32 %v3666_v55, %v7621_v41  ;;  %v3671_v23 = vmax.f32 %v3651_v17, 0.0  ;;  %v3649_v1 = vadd.f32 %v7197_v34, %v3623_v6  ;;  %3870 = vrot.lane.b32.xlu1 %v3697_v29, %s5762_s11 }
 0x60c   : > { %v3626_v32 = vadd.f32 %v5530_v21, %v7239_v3  ;;  %v3833_v36 = vsel %vm464_vm0, %v3831_v33, %v3832_v38  ;;  %v3595_v30 = vpop.f32.mrf.mxu1  ;;  %v3834_v10 = vor.u32 %v3832_v38, %v3772_v48  ;;  %v3777_v62 = vor.u32 %v3775_v0, %v3774_v60 }
 0x60d   : > { %v3699_v12 = vpack.c.bf16 %v3686_v26, %v3685_v8  ;;  %v3669_v59 = vmax.f32 %v3649_v1, 0.0  ;;  %3889 = vrot.lane.b32.xlu0 %v3833_v36, %s5763_s14  ;;  %v3624_v7 = vadd.f32 %v3595_v30, %v7268_v42  ;;  %v3799_v16 = vshll.u32 %v3700_v61, 16 }
 0x60e   : > { %v3652_v63 = vadd.f32 %v7197_v34, %v3626_v32  ;;  %v3836_v25 = vsel %vm464_vm0, %v3834_v10, %v3835_v20  ;;  %v3796_v3 = vshrl.u32 %v3700_v61, 16  ;;  %v3691_v33 = vmul.f32 %v3671_v23, %v7622_v28 }
 0x60f   : > { %v3650_v53 = vadd.f32 %v7197_v34, %v3624_v7  ;;  %3891 = vrot.lane.b32.xlu1 %v3836_v25, %s5763_s14  ;;  %v3791_v43 = vshll.u32 %v3699_v12, 16  ;;  %v3788_v47 = vshrl.u32 %v3699_v12, 16  ;;  %v3689_v40 = vmul.f32 %v3669_v59, %v7623_v39 }
 0x610   : > { %v3672_v18 = vmax.f32 %v3652_v63, 0.0  ;;  %v3782_v42 = vrot.slane %v3780_v14, 7  ;;  %v3798_v35 = vrot.slane %v3796_v3, 7  ;;  %v3841_v2 = vrot.slane %v3799_v16, 1 }
 0x611   : > { %v3670_v50 = vmax.f32 %v3650_v53, 0.0  ;;  %3872 = vrot.lane.b32.xlu0 %v7283_v58, %s5762_s11  ;;  %v3838_v45 = vrot.slane %v3791_v43, 1  ;;  %v3790_v19 = vrot.slane %v3788_v47, 7  ;;  %v7330_v34 = vsel %vm380_vm1, %v3766_v11, %v3777_v62  ;;  %v5751_v62 = vld [vmem:[%s7555_s3 + $0x70] sm:$0xff]  }
 0x612   : > { %v3692_v29 = vmul.f32 %v3672_v18, %v7624_v46  ;;  %v3785_v15 = vor.u32 %v3783_v27, %v3782_v42  ;;  %v3801_v0 = vor.u32 %v3799_v16, %v3798_v35  ;;  %v3843_v31 = vor.u32 %v3841_v2, %v3796_v3 }
 0x613   : > { %v3690_v54 = vmul.f32 %v3670_v50, %v7625_v4  ;;  %3874 = vrot.lane.b32.xlu1 %v3699_v12, %s5762_s11  ;;  %v3839_v57 = vsel %vm464_vm0, %v3837_v5, %v3838_v45  ;;  %v3840_v51 = vor.u32 %v3838_v45, %v3788_v47  ;;  %v3793_v14 = vor.u32 %v3791_v43, %v3790_v19 }
 0x614   : > { %v3702_v37 = vpack.c.bf16 %v3692_v29, %v3691_v33  ;;  %v7336_v58 = vsel %vm380_vm1, %v3774_v60, %v3785_v15  ;;  %v7344_v44 = vsel %vm380_vm1, %v3790_v19, %v3801_v0  ;;  %v3820_v59 = vsel %vm6079_vm6, 0, %v7265_v13  ;;  %v5749_v13 = vld [vmem:[%s7555_s3 + $0x80] sm:$0xff]   ;;  %v5752_v19 = vld [vmem:[%s7555_s3 + $0x68] sm:$0xff]  }
 0x615   : > { %v3701_v48 = vpack.c.bf16 %v3690_v54, %v3689_v40  ;;  %3893 = vrot.lane.b32.xlu0 %v3839_v57, %s5763_s14  ;;  %v3842_v11 = vsel %vm464_vm0, %v3840_v51, %v3841_v2  ;;  %v7341_v27 = vsel %vm380_vm1, %v3782_v42, %v3793_v14 }
 0x616   : > { %v3812_v20 = vshrl.u32 %v3702_v37, 16  ;;  %v3815_v17 = vshll.u32 %v3702_v37, 16 }
 0x617   : > { %3895 = vrot.lane.b32.xlu1 %v3842_v11, %s5763_s14  ;;  %v3807_v52 = vshll.u32 %v3701_v48, 16  ;;  %v3804_v55 = vshrl.u32 %v3701_v48, 16 }
 0x618   : > { %v3814_v6 = vrot.slane %v3812_v20, 7  ;;  %v3847_v41 = vrot.slane %v3815_v17, 1 }
 0x619   : > { %3876 = vrot.lane.b32.xlu0 %v3700_v61, %s5762_s11  ;;  %v3844_v8 = vrot.slane %v3807_v52, 1  ;;  %v3806_v21 = vrot.slane %v3804_v55, 7 }
 0x61a   : > { %v3817_v38 = vor.u32 %v3815_v17, %v3814_v6  ;;  %v3849_v32 = vor.u32 %v3847_v41, %v3812_v20 }
 0x61b   : > { %3878 = vrot.lane.b32.xlu1 %v3701_v48, %s5762_s11  ;;  %v3845_v56 = vsel %vm464_vm0, %v3843_v31, %v3844_v8  ;;  %v3846_v60 = vor.u32 %v3844_v8, %v3804_v55  ;;  %v3809_v26 = vor.u32 %v3807_v52, %v3806_v21  ;;  %v7628_v55 = vmov 0  }
 0x61c   : > { %v7351_v23 = vsel %vm380_vm1, %v3806_v21, %v3817_v38  ;;  %v3851_v30 = vsel %vm5995_vm3, %v3849_v32, 0 }
 0x61d   : > { %3897 = vrot.lane.b32.xlu0 %v3845_v56, %s5763_s14  ;;  %v3848_v1 = vsel %vm464_vm0, %v3846_v60, %v3847_v41  ;;  %v7356_v61 = vsel %vm380_vm1, %v3798_v35, %v3809_v26 }
 0x61f   : > { %3899 = vrot.lane.b32.xlu1 %v3848_v1, %s5763_s14 }
 0x621   : > { %3880 = vrot.lane.b32.xlu0 %v3702_v37, %s5762_s11 }
 0x625   : > { %3901 = vrot.lane.b32.xlu0 %v3851_v30, %s5763_s14 }
 0x667   : > { %v3865_v25 = vpop.permute.xlu0 %3864 }
 0x668   : > { %v3908_v3 = vsel %vm539_vm5, %v7263_v22, %v3865_v25 }
 0x669   : > { %v3863_v10 = vpop.permute.xlu1 %3862 }
 0x66a   : > { %v3905_v7 = vsel %vm539_vm5, %v3820_v59, %v3863_v10 }
 0x671   : > { %v3884_v5 = vpop.permute.xlu1 %3883 }
 0x672   : > { %v3934_v63 = vsel %vm570_vm7, %v3905_v7, %v3884_v5 }
 0x673   : > { %5543 = vmatprep.mubr.msk.bf16.mxu0 %vm627_vm8, %v3934_v63  ;;  %5576 = vmatmul.mubr.msk.bf16.vlgmr.msra.gmra.mxu1 %vm627_vm8, %v3934_v63 }
 0x675   : > { %v3867_v16 = vpop.permute.xlu1 %3866 }
 0x676   : > { %v3911_v53 = vsel %vm539_vm5, %v7302_v24, %v3867_v16  ;;  %v5750_v24 = vld [vmem:[%s7555_s3 + $0x78] sm:$0xff]  }
 0x677   : > { %v3886_v28 = vpop.permute.xlu0 %3885 }
 0x678   : > { %v7373_v33 = vsel %vm570_vm7, %v3908_v3, %v3886_v28 }
 0x679   : > { %5544 = vmatmul.mubr.msk.bf16.vlgmr.msra.gmra.mxu0 %vm627_vm8, %v7373_v33  ;;  %5579 = vmatprep.mubr.msk.bf16.mxu1 %vm627_vm8, %v7373_v33  ;;  %v3888_v43 = vpop.permute.xlu1 %3887 }
 0x67a   : > { %5596 = vmatpush3.bf16.msra.mxu0 %v7251_v49  ;;  %v3938_v22 = vsel %vm570_vm7, %v3911_v53, %v3888_v43 }
 0x67b   : > { %v3869_v47 = vpop.permute.xlu0 %3868  ;;  %5547 = vmatprep.mubr.msk.bf16.mxu0 %vm627_vm8, %v3938_v22  ;;  %5580 = vmatmul.mubr.msk.bf16.gmra.mxu1 %vm627_vm8, %v3938_v22 }
 0x67c   : > { %5597 = vmatprep.subr.bf16.mxu0 %v5749_v13  ;;  %v3914_v40 = vsel %vm539_vm5, %v7316_v9, %v3869_v47 }
 0x67d   : > { %v3871_v39 = vpop.permute.xlu1 %3870 }
 0x67e   : > { %5598 = vmatpush3.bf16.msra.mxu0 %v5749_v13  ;;  %v3917_v42 = vsel %vm539_vm5, %v7330_v34, %v3871_v39  ;;  %v5753_v34 = vld [vmem:[%s7555_s3 + $0x60] sm:$0xff]  }
 0x67f   : > { %v3890_v18 = vpop.permute.xlu0 %3889  ;;  %5599 = vmatprep.subr.bf16.mxu0 %v5750_v24 }
 0x680   : > { %v3940_v49 = vsel %vm570_vm7, %v3914_v40, %v3890_v18 }
 0x681   : > { %5548 = vmatmul.mubr.msk.bf16.gmra.mxu0 %vm627_vm8, %v3940_v49  ;;  %5583 = vmatprep.mubr.msk.bf16.mxu1 %vm627_vm8, %v3940_v49  ;;  %v3892_v50 = vpop.permute.xlu1 %3891 }
 0x682   : > { %v3942_v45 = vsel %vm570_vm7, %v3917_v42, %v3892_v50  ;;  %5600 = vmatpush3.bf16.msra.mxu0 %v5750_v24  ;;  %v7471_v24 = vld [vmem:[%s7556_s4] ss:$0 sm:$0xff] }
 0x683   : > { %v3873_v9 = vpop.permute.xlu0 %3872  ;;  %5551 = vmatprep.mubr.msk.bf16.mxu0 %vm627_vm8, %v3942_v45  ;;  %5584 = vmatmul.mubr.msk.bf16.gmra.mxu1 %vm627_vm8, %v3942_v45 }
 0x684   : > { %5601 = vmatprep.subr.bf16.mxu0 %v5751_v62  ;;  %v3920_v46 = vsel %vm539_vm5, %v7336_v58, %v3873_v9 }
 0x685   : > { %v3875_v35 = vpop.permute.xlu1 %3874 }
 0x686   : > { %5602 = vmatpush3.bf16.msra.mxu0 %v5751_v62  ;;  %v3923_v15 = vsel %vm539_vm5, %v7341_v27, %v3875_v35 }
 0x687   : > { %v3894_v29 = vpop.permute.xlu0 %3893  ;;  %5603 = vmatprep.subr.bf16.mxu0 %v5752_v19 }
 0x688   : > { %v3944_v2 = vsel %vm570_vm7, %v3920_v46, %v3894_v29 }
 0x689   : > { %5552 = vmatmul.mubr.msk.bf16.gmra.mxu0 %vm627_vm8, %v3944_v2  ;;  %5587 = vmatprep.mubr.msk.bf16.mxu1 %vm627_vm8, %v3944_v2  ;;  %v3896_v4 = vpop.permute.xlu1 %3895 }
 0x68a   : > { %v3946_v54 = vsel %vm570_vm7, %v3923_v15, %v3896_v4  ;;  %5604 = vmatpush3.bf16.msra.mxu0 %v5752_v19 }
 0x68b   : > { %v3877_v57 = vpop.permute.xlu0 %3876  ;;  %5555 = vmatprep.mubr.msk.bf16.mxu0 %vm627_vm8, %v3946_v54  ;;  %5588 = vmatmul.mubr.msk.bf16.gmra.mxu1 %vm627_vm8, %v3946_v54 }
 0x68c   : > { %5605 = vmatprep.subr.bf16.mxu0 %v5753_v34  ;;  %v3926_v14 = vsel %vm539_vm5, %v7344_v44, %v3877_v57 }
 0x68d   : > { %v3879_v51 = vpop.permute.xlu1 %3878 }
 0x68e   : > { %5606 = vmatpush3.bf16.msra.mxu0 %v5753_v34  ;;  %v3929_v0 = vsel %vm539_vm5, %v7356_v61, %v3879_v51 }
 0x68f   : > { %v3898_v37 = vpop.permute.xlu0 %3897 }
 0x690   : > { %v3948_v58 = vsel %vm570_vm7, %v3926_v14, %v3898_v37 }
 0x691   : > { %5556 = vmatmul.mubr.msk.bf16.gmra.mxu0 %vm627_vm8, %v3948_v58  ;;  %5591 = vmatprep.mubr.msk.bf16.mxu1 %vm627_vm8, %v3948_v58  ;;  %v3900_v48 = vpop.permute.xlu1 %3899 }
 0x692   : > { %v3950_v11 = vsel %vm570_vm7, %v3929_v0, %v3900_v48 }
 0x693   : > { %v3881_v27 = vpop.permute.xlu0 %3880  ;;  %5559 = vmatprep.mubr.msk.bf16.mxu0 %vm627_vm8, %v3950_v11  ;;  %5592 = vmatmul.mubr.msk.bf16.gmra.mxu1 %vm627_vm8, %v3950_v11 }
 0x694   : > { %v3932_v20 = vsel %vm539_vm5, %v7351_v23, %v3881_v27 }
 0x697   : > { %v3902_v44 = vpop.permute.xlu0 %3901 }
 0x698   : > { %v3952_v52 = vsel %vm570_vm7, %v3932_v20, %v3902_v44 }
 0x699   : > { %5560 = vmatmul.mubr.msk.bf16.gmra.mxu0 %vm627_vm8, %v3952_v52 }
 0x69a   : > { %5607 = vmatprep.mubr.msk.bf16.mxu0 %vm627_vm8, %v7373_v33 }
 0x6a1   : > { %5608 = vmatmul.mubr.msk.bf16.vlgmr.msra.gmra.mxu0 %vm627_vm8, %v3938_v22 }
 0x6a2   : > { %5611 = vmatprep.mubr.msk.bf16.mxu0 %vm627_vm8, %v3940_v49 }
 0x6a9   : > { %5612 = vmatmul.mubr.msk.bf16.gmra.mxu0 %vm627_vm8, %v3942_v45 }
 0x6aa   : > { %5615 = vmatprep.mubr.msk.bf16.mxu0 %vm627_vm8, %v3944_v2 }
 0x6b1   : > { %5616 = vmatmul.mubr.msk.bf16.gmra.mxu0 %vm627_vm8, %v3946_v54 }
 0x6b2   : > { %5619 = vmatprep.mubr.msk.bf16.mxu0 %vm627_vm8, %v3948_v58 }
 0x6b9   : > { %5620 = vmatmul.mubr.msk.bf16.gmra.mxu0 %vm627_vm8, %v3950_v11 }
 0x6ba   : > { %5623 = vmatprep.mubr.msk.bf16.mxu0 %vm627_vm8, %v3952_v52 }
 0x6c1   : > { %5624 = vmatmul.mubr.bf16.gmra.mxu0 %v7628_v55 }
 0x733   : > { %v5577_v17 = vpop.f32.mrf.mxu1 }
 0x735   : > { %v4192_v8 = vpop.f32.mrf.mxu1 }
 0x737   : > { %v5578_v56 = vpop.f32.mrf.mxu1 }
 0x739   : > { %v5545_v6 = vpop.f32.mrf.mxu0  ;;  %v4195_v26 = vpop.f32.mrf.mxu1 }
 0x73a   : > { %v4201_v22 = vadd.f32 %v5577_v17, %v5545_v6 }
 0x73b   : > { %v4043_v31 = vpop.f32.mrf.mxu0  ;;  %v5581_v61 = vpop.f32.mrf.mxu1 }
 0x73c   : > { %v4193_v40 = vadd.f32 %v4192_v8, %v4043_v31 }
 0x73d   : > { %v5546_v21 = vpop.f32.mrf.mxu0  ;;  %v4208_v30 = vpop.f32.mrf.mxu1 }
 0x73e   : > { %v4204_v62 = vadd.f32 %v5578_v56, %v5546_v21 }
 0x73f   : > { %v4046_v38 = vpop.f32.mrf.mxu0  ;;  %v5582_v59 = vpop.f32.mrf.mxu1 }
 0x740   : > { %v4196_v19 = vadd.f32 %v4195_v26, %v4046_v38 }
 0x741   : > { %v5549_v60 = vpop.f32.mrf.mxu0  ;;  %v4211_v63 = vpop.f32.mrf.mxu1 }
 0x742   : > { %v4217_v2 = vadd.f32 %v5581_v61, %v5549_v60 }
 0x743   : > { %v4059_v41 = vpop.f32.mrf.mxu0  ;;  %v5585_v3 = vpop.f32.mrf.mxu1 }
 0x744   : > { %v4209_v57 = vadd.f32 %v4208_v30, %v4059_v41 }
 0x745   : > { %v5550_v23 = vpop.f32.mrf.mxu0  ;;  %v4224_v13 = vpop.f32.mrf.mxu1 }
 0x746   : > { %v4220_v58 = vadd.f32 %v5582_v59, %v5550_v23 }
 0x747   : > { %v4062_v1 = vpop.f32.mrf.mxu0  ;;  %v5586_v47 = vpop.f32.mrf.mxu1 }
 0x748   : > { %v4212_v20 = vadd.f32 %v4211_v63, %v4062_v1 }
 0x749   : > { %v5553_v32 = vpop.f32.mrf.mxu0  ;;  %v4227_v45 = vpop.f32.mrf.mxu1 }
 0x74a   : > { %v4233_v17 = vadd.f32 %v5585_v3, %v5553_v32 }
 0x74b   : > { %v7445_v36 = vpop.f32.mrf.mxu0  ;;  %v5589_v4 = vpop.f32.mrf.mxu1 }
 0x74c   : > { %v4225_v38 = vadd.f32 %v4224_v13, %v7445_v36 }
 0x74d   : > { %v7447_v10 = vpop.f32.mrf.mxu0  ;;  %v4240_v11 = vpop.f32.mrf.mxu1 }
 0x74e   : > { %v4236_v26 = vadd.f32 %v5586_v47, %v7447_v10 }
 0x74f   : > { %v7449_v12 = vpop.f32.mrf.mxu0  ;;  %v5590_v8 = vpop.f32.mrf.mxu1 }
 0x750   : > { %v4228_v30 = vadd.f32 %v4227_v45, %v7449_v12 }
 0x751   : > { %v7451_v7 = vpop.f32.mrf.mxu0  ;;  %v4243_v61 = vpop.f32.mrf.mxu1 }
 0x752   : > { %v4249_v3 = vadd.f32 %v5589_v4, %v7451_v7 }
 0x753   : > { %v7453_v5 = vpop.f32.mrf.mxu0 }
 0x755   : > { %v7455_v25 = vpop.f32.mrf.mxu0 }
 0x757   : > { %v7457_v16 = vpop.f32.mrf.mxu0 }
 0x758   : > { %v4244_v45 = vadd.f32 %v4243_v61, %v7457_v16 }
 0x759   : > { %v7459_v28 = vpop.f32.mrf.mxu0 }
 0x75b   : > { %v7461_v33 = vpop.f32.mrf.mxu0 }
 0x75d   : > { %v7463_v53 = vpop.f32.mrf.mxu0 }
 0x75f   : > { %v7465_v43 = vpop.f32.mrf.mxu0 }
 0x761   : > { %v5609_v39 = vpop.f32.mrf.mxu0 }
 0x762   : > { %v4422_v18 = vadd.f32 %v5609_v39, %v4201_v22  ;;  %v5593_v22 = vpop.f32.mrf.mxu1  ;;  %v4241_v39 = vadd.f32 %v4240_v11, %v7453_v5 }
 0x763   : > { %v4341_v49 = vpop.f32.mrf.mxu0 }
 0x764   : > { %v4448_v42 = vadd.f32 %v7471_v24, %v4422_v18  ;;  %v4420_v50 = vadd.f32 %v4341_v49, %v4193_v40  ;;  %v4252_v49 = vadd.f32 %v5590_v8, %v7455_v25 }
 0x765   : > { %v5610_v9 = vpop.f32.mrf.mxu0 }
 0x766   : > { %4469 = vst.msk [vmem:[%s7476_s16 + $0x10] sm:$0xff] %vm4466_vm9, %v4448_v42  ;;  %v4446_v35 = vadd.f32 %v7471_v24, %v4420_v50  ;;  %v4423_v46 = vadd.f32 %v5610_v9, %v4204_v62  ;;  %v4256_v42 = vpop.f32.mrf.mxu1 }
 0x767   : > { %v4344_v29 = vpop.f32.mrf.mxu0 }
 0x768   : > { %4467 = vst.msk [vmem:[%s7476_s16] sm:$0xff] %vm4466_vm9, %v4446_v35  ;;  %v4449_v34 = vadd.f32 %v7471_v24, %v4423_v46  ;;  %v4421_v15 = vadd.f32 %v4344_v29, %v4196_v19  ;;  %v4265_v35 = vadd.f32 %v5593_v22, %v7459_v28  ;;  %v5594_v29 = vpop.f32.mrf.mxu1 }
 0x769   : > { %v5613_v54 = vpop.f32.mrf.mxu0  ;;  %v4268_v28 = vadd.f32 %v5594_v29, %v7463_v53 }
 0x76a   : > { %4470 = vst.msk [vmem:[%s7476_s16 + $0x18] sm:$0xff] %vm4466_vm9, %v4449_v34  ;;  %v4447_v51 = vadd.f32 %v7471_v24, %v4421_v15  ;;  %v4426_v14 = vadd.f32 %v5613_v54, %v4217_v2  ;;  %v4257_v34 = vadd.f32 %v4256_v42, %v7461_v33 }
 0x76b   : > { %v4357_v37 = vpop.f32.mrf.mxu0 }
 0x76c   : > { %4468 = vst.msk [vmem:[%s7476_s16 + $0x8] sm:$0xff] %vm4466_vm9, %v4447_v51  ;;  %v4452_v0 = vadd.f32 %v7471_v24, %v4426_v14  ;;  %v4424_v48 = vadd.f32 %v4357_v37, %v4209_v57  ;;  %v4259_v51 = vpop.f32.mrf.mxu1 }
 0x76d   : > { %v5614_v27 = vpop.f32.mrf.mxu0  ;;  %v4260_v33 = vadd.f32 %v4259_v51, %v7465_v43 }
 0x76e   : > { %4473 = vst.msk [vmem:[%s7476_s16 + $0x30] sm:$0xff] %vm4466_vm9, %v4452_v0  ;;  %v4450_v44 = vadd.f32 %v7471_v24, %v4424_v48  ;;  %v4427_v52 = vadd.f32 %v5614_v27, %v4220_v58 }
 0x76f   : > { %v4360_v55 = vpop.f32.mrf.mxu0 }
 0x770   : > { %4471 = vst.msk [vmem:[%s7476_s16 + $0x20] sm:$0xff] %vm4466_vm9, %v4450_v44  ;;  %v4453_v6 = vadd.f32 %v7471_v24, %v4427_v52  ;;  %v4425_v31 = vadd.f32 %v4360_v55, %v4212_v20 }
 0x771   : > { %v5617_v21 = vpop.f32.mrf.mxu0 }
 0x772   : > { %4474 = vst.msk [vmem:[%s7476_s16 + $0x38] sm:$0xff] %vm4466_vm9, %v4453_v6  ;;  %v4451_v56 = vadd.f32 %v7471_v24, %v4425_v31  ;;  %v4430_v60 = vadd.f32 %v5617_v21, %v4233_v17 }
 0x773   : > { %v4373_v41 = vpop.f32.mrf.mxu0 }
 0x774   : > { %4472 = vst.msk [vmem:[%s7476_s16 + $0x28] sm:$0xff] %vm4466_vm9, %v4451_v56  ;;  %v4456_v23 = vadd.f32 %v7471_v24, %v4430_v60  ;;  %v4428_v1 = vadd.f32 %v4373_v41, %v4225_v38 }
 0x775   : > { %v5618_v32 = vpop.f32.mrf.mxu0 }
 0x776   : > { %4477 = vst.msk [vmem:[%s7476_s16 + $0x50] sm:$0xff] %vm4466_vm9, %v4456_v23  ;;  %v4454_v36 = vadd.f32 %v7471_v24, %v4428_v1  ;;  %v4431_v59 = vadd.f32 %v5618_v32, %v4236_v26 }
 0x777   : > { %v4376_v63 = vpop.f32.mrf.mxu0 }
 0x778   : > { %4475 = vst.msk [vmem:[%s7476_s16 + $0x40] sm:$0xff] %vm4466_vm9, %v4454_v36  ;;  %v4457_v10 = vadd.f32 %v7471_v24, %v4431_v59  ;;  %v4429_v13 = vadd.f32 %v4376_v63, %v4228_v30 }
 0x779   : > { %v5621_v47 = vpop.f32.mrf.mxu0 }
 0x77a   : > { %4478 = vst.msk [vmem:[%s7476_s16 + $0x58] sm:$0xff] %vm4466_vm9, %v4457_v10  ;;  %v4455_v12 = vadd.f32 %v7471_v24, %v4429_v13  ;;  %v4434_v40 = vadd.f32 %v5621_v47, %v4249_v3 }
 0x77b   : > { %v4389_v18 = vpop.f32.mrf.mxu0 }
 0x77c   : > { %4476 = vst.msk [vmem:[%s7476_s16 + $0x48] sm:$0xff] %vm4466_vm9, %v4455_v12  ;;  %v4460_v7 = vadd.f32 %v7471_v24, %v4434_v40  ;;  %v4432_v62 = vadd.f32 %v4389_v18, %v4241_v39 }
 0x77d   : > { %v5622_v50 = vpop.f32.mrf.mxu0 }
 0x77e   : > { %4481 = vst.msk [vmem:[%s7476_s16 + $0x70] sm:$0xff] %vm4466_vm9, %v4460_v7  ;;  %v4458_v5 = vadd.f32 %v7471_v24, %v4432_v62  ;;  %v4435_v9 = vadd.f32 %v5622_v50, %v4252_v49 }
 0x77f   : > { %v4392_v19 = vpop.f32.mrf.mxu0 }
 0x780   : > { %4479 = vst.msk [vmem:[%s7476_s16 + $0x60] sm:$0xff] %vm4466_vm9, %v4458_v5  ;;  %v4461_v25 = vadd.f32 %v7471_v24, %v4435_v9  ;;  %v4433_v46 = vadd.f32 %v4392_v19, %v4244_v45 }
 0x781   : > { %v5625_v2 = vpop.f32.mrf.mxu0 }
 0x782   : > { %4482 = vst.msk [vmem:[%s7476_s16 + $0x78] sm:$0xff] %vm4466_vm9, %v4461_v25  ;;  %v4459_v16 = vadd.f32 %v7471_v24, %v4433_v46  ;;  %v4438_v15 = vadd.f32 %v5625_v2, %v4265_v35 }
 0x783   : > { %v4405_v4 = vpop.f32.mrf.mxu0 }
 0x784   : > { %4480 = vst.msk [vmem:[%s7476_s16 + $0x68] sm:$0xff] %vm4466_vm9, %v4459_v16  ;;  %v4464_v54 = vadd.f32 %v7471_v24, %v4438_v15  ;;  %v4436_v57 = vadd.f32 %v4405_v4, %v4257_v34 }
 0x785   : > { %v5626_v14 = vpop.f32.mrf.mxu0 }
 0x786   : > { %4485 = vst.msk [vmem:[%s7476_s16 + $0x90] sm:$0xff] %vm4466_vm9, %v4464_v54  ;;  %v4462_v37 = vadd.f32 %v7471_v24, %v4436_v57  ;;  %v4439_v58 = vadd.f32 %v5626_v14, %v4268_v28 }
 0x787   : > { %v4408_v0 = vpop.f32.mrf.mxu0 }
 0x788   : > { %4483 = vst.msk [vmem:[%s7476_s16 + $0x80] sm:$0xff] %vm4466_vm9, %v4462_v37  ;;  %v4465_v53 = vadd.f32 %v7471_v24, %v4439_v58  ;;  %v4437_v48 = vadd.f32 %v4408_v0, %v4260_v33 }
 0x78a   : > { %4486 = vst.msk [vmem:[%s7476_s16 + $0x98] sm:$0xff] %vm4466_vm9, %v4465_v53  ;;  %v4463_v11 = vadd.f32 %v7471_v24, %v4437_v48 }
 0x78c   : > { %4484 = vst.msk [vmem:[%s7476_s16 + $0x88] sm:$0xff] %vm4466_vm9, %v4463_v11 }
 0x78d PF: > { %s16_s21 = sadd.s32 1, %s5760_s21  }
 0x78e   : > { %p13_p4 = scmp.ge.s32.totalorder %s16_s21, 4  }
 0x790   :  { %15 = sbr.rel (!%p13_p4) target bundleno = 1 (0x1), region = 80 }

</bundles_post_ra>
